<compile_context>
chip_gen: v6e
topology: v6e:2x2x1
jax: 0.10.0
libtpu: 0.0.40
codegen_flags: <defaults>
</compile_context>

<pallas_src>
import functools

import numpy as np

import jax
import jax.numpy as jnp
from jax import lax
from jax.experimental import pallas as pl
from jax.experimental.pallas import tpu as pltpu


def _conv_plan(n_ch):
    """Static enumeration of (row-tap dy, col-tap dx, channel-offset d) conv terms."""
    return [(dy, dx, d)
            for dy in range(3)
            for dx in (-1, 0, 1)
            for d in range(-(n_ch - 1), n_ch)]


def _build_weight_rows(w, n_ch, width, spb, scale=1.0):
    """Per-lane weight rows for the packed-slab conv.

    w: (C_out, C_in, 3, 3) PyTorch-layout weights.
    Returns (len(plan), spb*C*W) float32.  Conv zero-padding at plane boundaries and
    `scale` (res_scale) are folded into the rows.
    """
    w = np.asarray(w, np.float32) * np.float32(scale)
    L = spb * n_ch * width
    plan = _conv_plan(n_ch)
    rows = np.zeros((len(plan), L), np.float32)
    q = np.arange(width)
    for e, (dy, dx, d) in enumerate(plan):
        col_ok = ((q + dx >= 0) & (q + dx < width)).astype(np.float32)
        for nl in range(spb):
            for co in range(n_ch):
                ci = co + d
                if 0 <= ci < n_ch:
                    base = (nl * n_ch + co) * width
                    rows[e, base:base + width] = w[co, ci, dy, dx + 1] * col_ok
    return rows


def _ddtb_resblock_kernel(xw_ref, w1_ref, w2_ref, out_ref, *,
                          k_bits, spb, n_ch, width, pad_c):
    hp2, wwide = xw_ref.shape            # (H+2, 2*pad_c + L), zero ring / lane pads
    H = hp2 - 2
    L = out_ref.shape[-1]                # spb * n_ch * width (128 here)
    f32 = jnp.float32
    cw = n_ch * width
    plan = _conv_plan(n_ch)

    lane = lax.broadcasted_iota(jnp.int32, (1, L), 1)
    big = f32(3e38)

    def qdq(v):
        # dynamic per-sample asymmetric quantize -> dequantize with k_bits levels
        if k_bits >= 16:                 # treated as full precision (identity)
            return v
        levels = f32(2 ** k_bits - 1)
        vmin_row = inv_row = scale_row = None
        for n in range(spb):
            m = (lane >= n * cw) & (lane < (n + 1) * cw)     # this sample's lanes
            mf = m.astype(f32)
            vmin = jnp.min(jnp.where(m, v, big))
            vmax = jnp.max(jnp.where(m, v, -big))
            scale = jnp.maximum((vmax - vmin) / levels, 1e-8)
            inv = 1.0 / scale            # one exact scalar divide per sample/stage
            if vmin_row is None:
                vmin_row, inv_row, scale_row = mf * vmin, mf * inv, mf * scale
            else:
                vmin_row = vmin_row + mf * vmin
                inv_row = inv_row + mf * inv
                scale_row = scale_row + mf * scale
        q = jnp.clip(jnp.round((v - vmin_row) * inv_row), 0.0, levels)
        return q * scale_row + vmin_row

    xw = xw_ref[...].astype(f32)         # (H+2, Wwide)
    w1r = w1_ref[...]                    # (E, L)
    w2r = w2_ref[...]                    # (E, L)

    def conv3x3(slab_pad, wrows):
        # slab_pad: (H+2, Wwide); data lanes live in [pad_c, pad_c+L), zeros elsewhere.
        rows = [slab_pad[dy:dy + H, :] for dy in range(3)]   # 3 row-shifted views
        acc = None
        for e, (dy, dx, d) in enumerate(plan):
            s = pad_c + d * width + dx                       # static lane offset
            term = wrows[e:e + 1, :] * rows[dy][:, s:s + L]
            acc = term if acc is None else acc + term
        return acc

    # ---------------- residual = quant_act1(shortcut(x)) --------------------
    x_core = xw[1:1 + H, pad_c:pad_c + L]
    residual = qdq(x_core)

    # ---------------- conv1 -> ReLU -> quant_act2 (in registers) ------------
    h = jnp.maximum(conv3x3(xw, w1r), 0.0)
    hq = qdq(h)

    # re-pad the quantized activation into the same slab geometry for conv2
    zlane = jnp.zeros((H, pad_c), f32)
    zrow = jnp.zeros((1, wwide), f32)
    hq_pad = jnp.concatenate(
        [zrow, jnp.concatenate([zlane, hq, zlane], axis=1), zrow], axis=0)

    # ---------------- conv2 (res_scale folded into rows) -> quant_act3 ------
    body = conv3x3(hq_pad, w2r)
    out_ref[...] = (qdq(body) + residual).astype(out_ref.dtype)


def ddtb_resblock(x, w1, w2, *, k_bits=8, res_scale=1.0):
    """x: (N, C, H, W) float32; w1, w2: (C, C, 3, 3) float32 (PyTorch layout)."""
    N, C, H, W = x.shape
    # Fold enough samples into one grid step to make the packed lane width >= 128
    # (lane-dense, unmasked stores).  For larger N this still leaves multiple
    # "parallel" grid steps (good for v7x's two TensorCores).
    target = max(1, -(-128 // (C * W)))          # ceil(128 / (C*W))
    spb = 1
    for d in range(1, N + 1):
        if N % d == 0 and d <= target:
            spb = d
    G = N // spb
    L = spb * C * W
    pad_c = (C - 1) * W + 1                       # lane head-room for channel mixing
    wwide = L + 2 * pad_c

    xf = x.astype(jnp.float32)
    # pack: (N,C,H,W) -> (G, H, L) with lane index ((nl*C + c)*W + q)
    xp = xf.reshape(G, spb, C, H, W).transpose(0, 3, 1, 2, 4).reshape(G, H, L)
    # zero-pad: 1 row top/bottom (conv pad) + pad_c lanes each side (shift head-room)
    xw = jnp.pad(xp, ((0, 0), (1, 1), (pad_c, pad_c)))

    w1rows = jnp.asarray(_build_weight_rows(w1, C, W, spb, 1.0))
    w2rows = jnp.asarray(_build_weight_rows(w2, C, W, spb, res_scale))
    E = w1rows.shape[0]

    kernel = functools.partial(_ddtb_resblock_kernel, k_bits=k_bits, spb=spb,
                               n_ch=C, width=W, pad_c=pad_c)
    out_packed = pl.pallas_call(
        kernel,
        out_shape=jax.ShapeDtypeStruct((G, H, L), x.dtype),
        grid_spec=pltpu.PrefetchScalarGridSpec(
            num_scalar_prefetch=0,
            grid=(G,),
            in_specs=[
                pl.BlockSpec((None, H + 2, wwide), lambda g: (g, 0, 0)),
                pl.BlockSpec((E, L), lambda g: (0, 0)),
                pl.BlockSpec((E, L), lambda g: (0, 0)),
            ],
            out_specs=pl.BlockSpec((None, H, L), lambda g: (g, 0, 0)),
        ),
        compiler_params=pltpu.CompilerParams(dimension_semantics=("parallel",)),
    )(xw, w1rows, w2rows)

    # unpack: (G, H, L) -> (N, C, H, W)
    out = out_packed.reshape(G, H, spb, C, W).transpose(0, 2, 3, 1, 4)
    return out.reshape(N, C, H, W)


# ----------------------------- pure-JAX reference ---------------------------
def _conv3x3_ref(xs, w):
    C_in, H, W = xs.shape
    xp = jnp.pad(xs, ((0, 0), (1, 1), (1, 1)))
    out = jnp.zeros((w.shape[0], H, W), jnp.float32)
    for ky in range(3):
        for kx in range(3):
            tap = xp[:, ky:ky + H, kx:kx + W]
            out = out + jnp.sum(w[:, :, ky, kx][:, :, None, None] * tap[None], axis=1)
    return out


def _reference(x, w1, w2, *, k_bits=8, res_scale=1.0):
    def qdq(v):
        if k_bits >= 16:
            return v
        levels = float(2 ** k_bits - 1)
        vmin, vmax = jnp.min(v), jnp.max(v)
        scale = jnp.maximum((vmax - vmin) / levels, 1e-8)
        inv = 1.0 / scale
        return jnp.clip(jnp.round((v - vmin) * inv), 0.0, levels) * scale + vmin

    outs = []
    for i in range(x.shape[0]):
        xs = x[i].astype(jnp.float32)
        residual = qdq(xs)
        h = qdq(jnp.maximum(_conv3x3_ref(xs, w1), 0.0))
        body = _conv3x3_ref(h, w2) * res_scale
        outs.append(qdq(body) + residual)
    return jnp.stack(outs, 0)


if __name__ == "__main__":
    key = jax.random.PRNGKey(0)
    kx, k1, k2 = jax.random.split(key, 3)
    N, C, H, W = 2, 4, 16, 16                 # batch=2, n_feats=4, 16x16 spatial
    x = jax.random.normal(kx, (N, C, H, W), jnp.float32)
    wstd = (2.0 / (C * 9)) ** 0.5
    w1 = jax.random.normal(k1, (C, C, 3, 3), jnp.float32) * wstd
    w2 = jax.random.normal(k2, (C, C, 3, 3), jnp.float32) * wstd

    out = jax.block_until_ready(ddtb_resblock(x, w1, w2, k_bits=8, res_scale=1.0))
    ref = jax.block_until_ready(_reference(x, w1, w2, k_bits=8, res_scale=1.0))

    assert out.shape == (N, C, H, W)
    assert bool(jnp.all(jnp.isfinite(out)))
    err = jnp.abs(out - ref)
    # The bulk of the output must match tightly; an occasional element may differ by
    # ~1-2 dynamic-quantization steps (~0.02-0.04) because fp accumulation-order
    # differences between the fused kernel and the reference can flip round() exactly
    # at a quant-level boundary.
    assert float(jnp.mean(err)) < 1e-3, float(jnp.mean(err))
    assert float(jnp.max(err)) < 1e-1, float(jnp.max(err))
    print("KERNEL_OK")
</pallas_src>

<mosaic_0001>
module attributes {stable_mosaic.version = 11 : i64} {
  func.func @_ddtb_resblock_kernel(%arg0: i32, %arg1: memref<1x18x226xf32, #tpu.memory_space<vmem>>, %arg2: memref<63x128xf32, #tpu.memory_space<vmem>>, %arg3: memref<63x128xf32, #tpu.memory_space<vmem>>, %arg4: memref<1x16x128xf32, #tpu.memory_space<vmem>>) attributes {dimension_semantics = [#tpu.dimension_semantics<parallel>], iteration_bounds = array<i64: 1>, scalar_prefetch = 0 : i64, scratch_operands = 0 : i64, tpu.core_type = #tpu.core_type<tc>, window_params = [{transform_indices = @transform_0, window_bounds = array<i64: 1, 18, 226>}, {pipeline_mode = #tpu.pipeline_mode<synchronous>, transform_indices = @transform_1, window_bounds = array<i64: 63, 128>}, {pipeline_mode = #tpu.pipeline_mode<synchronous>, transform_indices = @transform_2, window_bounds = array<i64: 63, 128>}, {transform_indices = @transform_3, window_bounds = array<i64: 1, 16, 128>}]} {
    %0 = tpu.iota {dimensions = array<i32: 1>} : vector<1x128xi32>
    %c0 = arith.constant 0 : index
    %c0_0 = arith.constant 0 : index
    %c0_1 = arith.constant 0 : index
    %1 = vector.load %arg1[%c0, %c0_0, %c0_1] : memref<1x18x226xf32, #tpu.memory_space<vmem>>, vector<1x18x226xf32>
    %2 = vector.shape_cast %1 : vector<1x18x226xf32> to vector<18x226xf32>
    %c0_2 = arith.constant 0 : index
    %c0_3 = arith.constant 0 : index
    %3 = vector.load %arg2[%c0_2, %c0_3] : memref<63x128xf32, #tpu.memory_space<vmem>>, vector<63x128xf32>
    %c0_4 = arith.constant 0 : index
    %c0_5 = arith.constant 0 : index
    %4 = vector.load %arg3[%c0_4, %c0_5] : memref<63x128xf32, #tpu.memory_space<vmem>>, vector<63x128xf32>
    %5 = vector.extract_strided_slice %2 {offsets = [1, 49], sizes = [16, 128], strides = [1, 1]} : vector<18x226xf32> to vector<16x128xf32>
    %c0_i32 = arith.constant 0 : i32
    %6 = vector.broadcast %c0_i32 : i32 to vector<1x128xi32>
    %7 = arith.cmpi sge, %0, %6 : vector<1x128xi32>
    %c64_i32 = arith.constant 64 : i32
    %8 = vector.broadcast %c64_i32 : i32 to vector<1x128xi32>
    %9 = arith.cmpi slt, %0, %8 : vector<1x128xi32>
    %10 = arith.andi %7, %9 : vector<1x128xi1>
    %11 = arith.extui %10 : vector<1x128xi1> to vector<1x128xi32>
    %12 = arith.sitofp %11 : vector<1x128xi32> to vector<1x128xf32>
    %cst = arith.constant 3.000000e+38 : f32
    %13 = vector.shape_cast %10 : vector<1x128xi1> to vector<1x128xi1>
    %14 = vector.broadcast %13 : vector<1x128xi1> to vector<16x128xi1>
    %15 = vector.broadcast %cst : f32 to vector<16x128xf32>
    %16 = arith.select %14, %5, %15 : vector<16x128xi1>, vector<16x128xf32>
    %17 = vector.shape_cast %16 : vector<16x128xf32> to vector<1x16x128xf32>
    %cst_6 = arith.constant dense<0x7F800000> : vector<1xf32>
    %18 = vector.multi_reduction <minimumf>, %17, %cst_6 [1, 2] : vector<1x16x128xf32> to vector<1xf32>
    %19 = vector.shape_cast %18 : vector<1xf32> to vector<1x1x1xf32>
    %20 = vector.extract %19[0, 0, 0] : f32 from vector<1x1x1xf32>
    %cst_7 = arith.constant 0.000000e+00 : f32
    %cst_8 = arith.constant 3.000000e+38 : f32
    %21 = arith.subf %cst_7, %cst_8 : f32
    %22 = vector.shape_cast %10 : vector<1x128xi1> to vector<1x128xi1>
    %23 = vector.broadcast %22 : vector<1x128xi1> to vector<16x128xi1>
    %24 = vector.broadcast %21 : f32 to vector<16x128xf32>
    %25 = arith.select %23, %5, %24 : vector<16x128xi1>, vector<16x128xf32>
    %26 = vector.shape_cast %25 : vector<16x128xf32> to vector<1x16x128xf32>
    %cst_9 = arith.constant dense<0xFF800000> : vector<1xf32>
    %27 = vector.multi_reduction <maximumf>, %26, %cst_9 [1, 2] : vector<1x16x128xf32> to vector<1xf32>
    %28 = vector.shape_cast %27 : vector<1xf32> to vector<1x1x1xf32>
    %29 = vector.extract %28[0, 0, 0] : f32 from vector<1x1x1xf32>
    %30 = arith.subf %29, %20 : f32
    %cst_10 = arith.constant 2.550000e+02 : f32
    %31 = arith.divf %30, %cst_10 : f32
    %cst_11 = arith.constant 9.99999993E-9 : f32
    %32 = arith.maximumf %31, %cst_11 : f32
    %cst_12 = arith.constant 1.000000e+00 : f32
    %33 = arith.divf %cst_12, %32 : f32
    %34 = vector.broadcast %20 : f32 to vector<1x128xf32>
    %35 = arith.mulf %12, %34 : vector<1x128xf32>
    %36 = vector.broadcast %33 : f32 to vector<1x128xf32>
    %37 = arith.mulf %12, %36 : vector<1x128xf32>
    %38 = vector.broadcast %32 : f32 to vector<1x128xf32>
    %39 = arith.mulf %12, %38 : vector<1x128xf32>
    %c64_i32_13 = arith.constant 64 : i32
    %40 = vector.broadcast %c64_i32_13 : i32 to vector<1x128xi32>
    %41 = arith.cmpi sge, %0, %40 : vector<1x128xi32>
    %c128_i32 = arith.constant 128 : i32
    %42 = vector.broadcast %c128_i32 : i32 to vector<1x128xi32>
    %43 = arith.cmpi slt, %0, %42 : vector<1x128xi32>
    %44 = arith.andi %41, %43 : vector<1x128xi1>
    %45 = arith.extui %44 : vector<1x128xi1> to vector<1x128xi32>
    %46 = arith.sitofp %45 : vector<1x128xi32> to vector<1x128xf32>
    %cst_14 = arith.constant 3.000000e+38 : f32
    %47 = vector.shape_cast %44 : vector<1x128xi1> to vector<1x128xi1>
    %48 = vector.broadcast %47 : vector<1x128xi1> to vector<16x128xi1>
    %49 = vector.broadcast %cst_14 : f32 to vector<16x128xf32>
    %50 = arith.select %48, %5, %49 : vector<16x128xi1>, vector<16x128xf32>
    %51 = vector.shape_cast %50 : vector<16x128xf32> to vector<1x16x128xf32>
    %cst_15 = arith.constant dense<0x7F800000> : vector<1xf32>
    %52 = vector.multi_reduction <minimumf>, %51, %cst_15 [1, 2] : vector<1x16x128xf32> to vector<1xf32>
    %53 = vector.shape_cast %52 : vector<1xf32> to vector<1x1x1xf32>
    %54 = vector.extract %53[0, 0, 0] : f32 from vector<1x1x1xf32>
    %cst_16 = arith.constant 0.000000e+00 : f32
    %cst_17 = arith.constant 3.000000e+38 : f32
    %55 = arith.subf %cst_16, %cst_17 : f32
    %56 = vector.shape_cast %44 : vector<1x128xi1> to vector<1x128xi1>
    %57 = vector.broadcast %56 : vector<1x128xi1> to vector<16x128xi1>
    %58 = vector.broadcast %55 : f32 to vector<16x128xf32>
    %59 = arith.select %57, %5, %58 : vector<16x128xi1>, vector<16x128xf32>
    %60 = vector.shape_cast %59 : vector<16x128xf32> to vector<1x16x128xf32>
    %cst_18 = arith.constant dense<0xFF800000> : vector<1xf32>
    %61 = vector.multi_reduction <maximumf>, %60, %cst_18 [1, 2] : vector<1x16x128xf32> to vector<1xf32>
    %62 = vector.shape_cast %61 : vector<1xf32> to vector<1x1x1xf32>
    %63 = vector.extract %62[0, 0, 0] : f32 from vector<1x1x1xf32>
    %64 = arith.subf %63, %54 : f32
    %cst_19 = arith.constant 2.550000e+02 : f32
    %65 = arith.divf %64, %cst_19 : f32
    %cst_20 = arith.constant 9.99999993E-9 : f32
    %66 = arith.maximumf %65, %cst_20 : f32
    %cst_21 = arith.constant 1.000000e+00 : f32
    %67 = arith.divf %cst_21, %66 : f32
    %68 = vector.broadcast %54 : f32 to vector<1x128xf32>
    %69 = arith.mulf %46, %68 : vector<1x128xf32>
    %70 = arith.addf %35, %69 : vector<1x128xf32>
    %71 = vector.broadcast %67 : f32 to vector<1x128xf32>
    %72 = arith.mulf %46, %71 : vector<1x128xf32>
    %73 = arith.addf %37, %72 : vector<1x128xf32>
    %74 = vector.broadcast %66 : f32 to vector<1x128xf32>
    %75 = arith.mulf %46, %74 : vector<1x128xf32>
    %76 = arith.addf %39, %75 : vector<1x128xf32>
    %77 = vector.broadcast %70 : vector<1x128xf32> to vector<16x128xf32>
    %78 = arith.subf %5, %77 : vector<16x128xf32>
    %79 = vector.broadcast %73 : vector<1x128xf32> to vector<16x128xf32>
    %80 = arith.mulf %78, %79 : vector<16x128xf32>
    %81 = math.roundeven %80 : vector<16x128xf32>
    %cst_22 = arith.constant 0.000000e+00 : f32
    %cst_23 = arith.constant 2.550000e+02 : f32
    %82 = vector.broadcast %cst_22 : f32 to vector<16x128xf32>
    %83 = arith.maximumf %82, %81 : vector<16x128xf32>
    %84 = vector.broadcast %cst_23 : f32 to vector<16x128xf32>
    %85 = arith.minimumf %84, %83 : vector<16x128xf32>
    %86 = vector.broadcast %76 : vector<1x128xf32> to vector<16x128xf32>
    %87 = arith.mulf %85, %86 : vector<16x128xf32>
    %88 = vector.broadcast %70 : vector<1x128xf32> to vector<16x128xf32>
    %89 = arith.addf %87, %88 : vector<16x128xf32>
    %90 = vector.extract_strided_slice %2 {offsets = [0, 0], sizes = [16, 226], strides = [1, 1]} : vector<18x226xf32> to vector<16x226xf32>
    %91 = vector.extract_strided_slice %2 {offsets = [1, 0], sizes = [16, 226], strides = [1, 1]} : vector<18x226xf32> to vector<16x226xf32>
    %92 = vector.extract_strided_slice %2 {offsets = [2, 0], sizes = [16, 226], strides = [1, 1]} : vector<18x226xf32> to vector<16x226xf32>
    %93 = vector.extract_strided_slice %3 {offsets = [0, 0], sizes = [1, 128], strides = [1, 1]} : vector<63x128xf32> to vector<1x128xf32>
    %94 = vector.extract_strided_slice %90 {offsets = [0, 0], sizes = [16, 128], strides = [1, 1]} : vector<16x226xf32> to vector<16x128xf32>
    %95 = vector.broadcast %93 : vector<1x128xf32> to vector<16x128xf32>
    %96 = arith.mulf %95, %94 : vector<16x128xf32>
    %97 = vector.extract_strided_slice %3 {offsets = [1, 0], sizes = [1, 128], strides = [1, 1]} : vector<63x128xf32> to vector<1x128xf32>
    %98 = vector.extract_strided_slice %90 {offsets = [0, 16], sizes = [16, 128], strides = [1, 1]} : vector<16x226xf32> to vector<16x128xf32>
    %99 = vector.broadcast %97 : vector<1x128xf32> to vector<16x128xf32>
    %100 = arith.mulf %99, %98 : vector<16x128xf32>
    %101 = arith.addf %96, %100 : vector<16x128xf32>
    %102 = vector.extract_strided_slice %3 {offsets = [2, 0], sizes = [1, 128], strides = [1, 1]} : vector<63x128xf32> to vector<1x128xf32>
    %103 = vector.extract_strided_slice %90 {offsets = [0, 32], sizes = [16, 128], strides = [1, 1]} : vector<16x226xf32> to vector<16x128xf32>
    %104 = vector.broadcast %102 : vector<1x128xf32> to vector<16x128xf32>
    %105 = arith.mulf %104, %103 : vector<16x128xf32>
    %106 = arith.addf %101, %105 : vector<16x128xf32>
    %107 = vector.extract_strided_slice %3 {offsets = [3, 0], sizes = [1, 128], strides = [1, 1]} : vector<63x128xf32> to vector<1x128xf32>
    %108 = vector.extract_strided_slice %90 {offsets = [0, 48], sizes = [16, 128], strides = [1, 1]} : vector<16x226xf32> to vector<16x128xf32>
    %109 = vector.broadcast %107 : vector<1x128xf32> to vector<16x128xf32>
    %110 = arith.mulf %109, %108 : vector<16x128xf32>
    %111 = arith.addf %106, %110 : vector<16x128xf32>
    %112 = vector.extract_strided_slice %3 {offsets = [4, 0], sizes = [1, 128], strides = [1, 1]} : vector<63x128xf32> to vector<1x128xf32>
    %113 = vector.extract_strided_slice %90 {offsets = [0, 64], sizes = [16, 128], strides = [1, 1]} : vector<16x226xf32> to vector<16x128xf32>
    %114 = vector.broadcast %112 : vector<1x128xf32> to vector<16x128xf32>
    %115 = arith.mulf %114, %113 : vector<16x128xf32>
    %116 = arith.addf %111, %115 : vector<16x128xf32>
    %117 = vector.extract_strided_slice %3 {offsets = [5, 0], sizes = [1, 128], strides = [1, 1]} : vector<63x128xf32> to vector<1x128xf32>
    %118 = vector.extract_strided_slice %90 {offsets = [0, 80], sizes = [16, 128], strides = [1, 1]} : vector<16x226xf32> to vector<16x128xf32>
    %119 = vector.broadcast %117 : vector<1x128xf32> to vector<16x128xf32>
    %120 = arith.mulf %119, %118 : vector<16x128xf32>
    %121 = arith.addf %116, %120 : vector<16x128xf32>
    %122 = vector.extract_strided_slice %3 {offsets = [6, 0], sizes = [1, 128], strides = [1, 1]} : vector<63x128xf32> to vector<1x128xf32>
    %123 = vector.extract_strided_slice %90 {offsets = [0, 96], sizes = [16, 128], strides = [1, 1]} : vector<16x226xf32> to vector<16x128xf32>
    %124 = vector.broadcast %122 : vector<1x128xf32> to vector<16x128xf32>
    %125 = arith.mulf %124, %123 : vector<16x128xf32>
    %126 = arith.addf %121, %125 : vector<16x128xf32>
    %127 = vector.extract_strided_slice %3 {offsets = [7, 0], sizes = [1, 128], strides = [1, 1]} : vector<63x128xf32> to vector<1x128xf32>
    %128 = vector.extract_strided_slice %90 {offsets = [0, 1], sizes = [16, 128], strides = [1, 1]} : vector<16x226xf32> to vector<16x128xf32>
    %129 = vector.broadcast %127 : vector<1x128xf32> to vector<16x128xf32>
    %130 = arith.mulf %129, %128 : vector<16x128xf32>
    %131 = arith.addf %126, %130 : vector<16x128xf32>
    %132 = vector.extract_strided_slice %3 {offsets = [8, 0], sizes = [1, 128], strides = [1, 1]} : vector<63x128xf32> to vector<1x128xf32>
    %133 = vector.extract_strided_slice %90 {offsets = [0, 17], sizes = [16, 128], strides = [1, 1]} : vector<16x226xf32> to vector<16x128xf32>
    %134 = vector.broadcast %132 : vector<1x128xf32> to vector<16x128xf32>
    %135 = arith.mulf %134, %133 : vector<16x128xf32>
    %136 = arith.addf %131, %135 : vector<16x128xf32>
    %137 = vector.extract_strided_slice %3 {offsets = [9, 0], sizes = [1, 128], strides = [1, 1]} : vector<63x128xf32> to vector<1x128xf32>
    %138 = vector.extract_strided_slice %90 {offsets = [0, 33], sizes = [16, 128], strides = [1, 1]} : vector<16x226xf32> to vector<16x128xf32>
    %139 = vector.broadcast %137 : vector<1x128xf32> to vector<16x128xf32>
    %140 = arith.mulf %139, %138 : vector<16x128xf32>
    %141 = arith.addf %136, %140 : vector<16x128xf32>
    %142 = vector.extract_strided_slice %3 {offsets = [10, 0], sizes = [1, 128], strides = [1, 1]} : vector<63x128xf32> to vector<1x128xf32>
    %143 = vector.extract_strided_slice %90 {offsets = [0, 49], sizes = [16, 128], strides = [1, 1]} : vector<16x226xf32> to vector<16x128xf32>
    %144 = vector.broadcast %142 : vector<1x128xf32> to vector<16x128xf32>
    %145 = arith.mulf %144, %143 : vector<16x128xf32>
    %146 = arith.addf %141, %145 : vector<16x128xf32>
    %147 = vector.extract_strided_slice %3 {offsets = [11, 0], sizes = [1, 128], strides = [1, 1]} : vector<63x128xf32> to vector<1x128xf32>
    %148 = vector.extract_strided_slice %90 {offsets = [0, 65], sizes = [16, 128], strides = [1, 1]} : vector<16x226xf32> to vector<16x128xf32>
    %149 = vector.broadcast %147 : vector<1x128xf32> to vector<16x128xf32>
    %150 = arith.mulf %149, %148 : vector<16x128xf32>
    %151 = arith.addf %146, %150 : vector<16x128xf32>
    %152 = vector.extract_strided_slice %3 {offsets = [12, 0], sizes = [1, 128], strides = [1, 1]} : vector<63x128xf32> to vector<1x128xf32>
    %153 = vector.extract_strided_slice %90 {offsets = [0, 81], sizes = [16, 128], strides = [1, 1]} : vector<16x226xf32> to vector<16x128xf32>
    %154 = vector.broadcast %152 : vector<1x128xf32> to vector<16x128xf32>
    %155 = arith.mulf %154, %153 : vector<16x128xf32>
    %156 = arith.addf %151, %155 : vector<16x128xf32>
    %157 = vector.extract_strided_slice %3 {offsets = [13, 0], sizes = [1, 128], strides = [1, 1]} : vector<63x128xf32> to vector<1x128xf32>
    %158 = vector.extract_strided_slice %90 {offsets = [0, 97], sizes = [16, 128], strides = [1, 1]} : vector<16x226xf32> to vector<16x128xf32>
    %159 = vector.broadcast %157 : vector<1x128xf32> to vector<16x128xf32>
    %160 = arith.mulf %159, %158 : vector<16x128xf32>
    %161 = arith.addf %156, %160 : vector<16x128xf32>
    %162 = vector.extract_strided_slice %3 {offsets = [14, 0], sizes = [1, 128], strides = [1, 1]} : vector<63x128xf32> to vector<1x128xf32>
    %163 = vector.extract_strided_slice %90 {offsets = [0, 2], sizes = [16, 128], strides = [1, 1]} : vector<16x226xf32> to vector<16x128xf32>
    %164 = vector.broadcast %162 : vector<1x128xf32> to vector<16x128xf32>
    %165 = arith.mulf %164, %163 : vector<16x128xf32>
    %166 = arith.addf %161, %165 : vector<16x128xf32>
    %167 = vector.extract_strided_slice %3 {offsets = [15, 0], sizes = [1, 128], strides = [1, 1]} : vector<63x128xf32> to vector<1x128xf32>
    %168 = vector.extract_strided_slice %90 {offsets = [0, 18], sizes = [16, 128], strides = [1, 1]} : vector<16x226xf32> to vector<16x128xf32>
    %169 = vector.broadcast %167 : vector<1x128xf32> to vector<16x128xf32>
    %170 = arith.mulf %169, %168 : vector<16x128xf32>
    %171 = arith.addf %166, %170 : vector<16x128xf32>
    %172 = vector.extract_strided_slice %3 {offsets = [16, 0], sizes = [1, 128], strides = [1, 1]} : vector<63x128xf32> to vector<1x128xf32>
    %173 = vector.extract_strided_slice %90 {offsets = [0, 34], sizes = [16, 128], strides = [1, 1]} : vector<16x226xf32> to vector<16x128xf32>
    %174 = vector.broadcast %172 : vector<1x128xf32> to vector<16x128xf32>
    %175 = arith.mulf %174, %173 : vector<16x128xf32>
    %176 = arith.addf %171, %175 : vector<16x128xf32>
    %177 = vector.extract_strided_slice %3 {offsets = [17, 0], sizes = [1, 128], strides = [1, 1]} : vector<63x128xf32> to vector<1x128xf32>
    %178 = vector.extract_strided_slice %90 {offsets = [0, 50], sizes = [16, 128], strides = [1, 1]} : vector<16x226xf32> to vector<16x128xf32>
    %179 = vector.broadcast %177 : vector<1x128xf32> to vector<16x128xf32>
    %180 = arith.mulf %179, %178 : vector<16x128xf32>
    %181 = arith.addf %176, %180 : vector<16x128xf32>
    %182 = vector.extract_strided_slice %3 {offsets = [18, 0], sizes = [1, 128], strides = [1, 1]} : vector<63x128xf32> to vector<1x128xf32>
    %183 = vector.extract_strided_slice %90 {offsets = [0, 66], sizes = [16, 128], strides = [1, 1]} : vector<16x226xf32> to vector<16x128xf32>
    %184 = vector.broadcast %182 : vector<1x128xf32> to vector<16x128xf32>
    %185 = arith.mulf %184, %183 : vector<16x128xf32>
    %186 = arith.addf %181, %185 : vector<16x128xf32>
    %187 = vector.extract_strided_slice %3 {offsets = [19, 0], sizes = [1, 128], strides = [1, 1]} : vector<63x128xf32> to vector<1x128xf32>
    %188 = vector.extract_strided_slice %90 {offsets = [0, 82], sizes = [16, 128], strides = [1, 1]} : vector<16x226xf32> to vector<16x128xf32>
    %189 = vector.broadcast %187 : vector<1x128xf32> to vector<16x128xf32>
    %190 = arith.mulf %189, %188 : vector<16x128xf32>
    %191 = arith.addf %186, %190 : vector<16x128xf32>
    %192 = vector.extract_strided_slice %3 {offsets = [20, 0], sizes = [1, 128], strides = [1, 1]} : vector<63x128xf32> to vector<1x128xf32>
    %193 = vector.extract_strided_slice %90 {offsets = [0, 98], sizes = [16, 128], strides = [1, 1]} : vector<16x226xf32> to vector<16x128xf32>
    %194 = vector.broadcast %192 : vector<1x128xf32> to vector<16x128xf32>
    %195 = arith.mulf %194, %193 : vector<16x128xf32>
    %196 = arith.addf %191, %195 : vector<16x128xf32>
    %197 = vector.extract_strided_slice %3 {offsets = [21, 0], sizes = [1, 128], strides = [1, 1]} : vector<63x128xf32> to vector<1x128xf32>
    %198 = vector.extract_strided_slice %91 {offsets = [0, 0], sizes = [16, 128], strides = [1, 1]} : vector<16x226xf32> to vector<16x128xf32>
    %199 = vector.broadcast %197 : vector<1x128xf32> to vector<16x128xf32>
    %200 = arith.mulf %199, %198 : vector<16x128xf32>
    %201 = arith.addf %196, %200 : vector<16x128xf32>
    %202 = vector.extract_strided_slice %3 {offsets = [22, 0], sizes = [1, 128], strides = [1, 1]} : vector<63x128xf32> to vector<1x128xf32>
    %203 = vector.extract_strided_slice %91 {offsets = [0, 16], sizes = [16, 128], strides = [1, 1]} : vector<16x226xf32> to vector<16x128xf32>
    %204 = vector.broadcast %202 : vector<1x128xf32> to vector<16x128xf32>
    %205 = arith.mulf %204, %203 : vector<16x128xf32>
    %206 = arith.addf %201, %205 : vector<16x128xf32>
    %207 = vector.extract_strided_slice %3 {offsets = [23, 0], sizes = [1, 128], strides = [1, 1]} : vector<63x128xf32> to vector<1x128xf32>
    %208 = vector.extract_strided_slice %91 {offsets = [0, 32], sizes = [16, 128], strides = [1, 1]} : vector<16x226xf32> to vector<16x128xf32>
    %209 = vector.broadcast %207 : vector<1x128xf32> to vector<16x128xf32>
    %210 = arith.mulf %209, %208 : vector<16x128xf32>
    %211 = arith.addf %206, %210 : vector<16x128xf32>
    %212 = vector.extract_strided_slice %3 {offsets = [24, 0], sizes = [1, 128], strides = [1, 1]} : vector<63x128xf32> to vector<1x128xf32>
    %213 = vector.extract_strided_slice %91 {offsets = [0, 48], sizes = [16, 128], strides = [1, 1]} : vector<16x226xf32> to vector<16x128xf32>
    %214 = vector.broadcast %212 : vector<1x128xf32> to vector<16x128xf32>
    %215 = arith.mulf %214, %213 : vector<16x128xf32>
    %216 = arith.addf %211, %215 : vector<16x128xf32>
    %217 = vector.extract_strided_slice %3 {offsets = [25, 0], sizes = [1, 128], strides = [1, 1]} : vector<63x128xf32> to vector<1x128xf32>
    %218 = vector.extract_strided_slice %91 {offsets = [0, 64], sizes = [16, 128], strides = [1, 1]} : vector<16x226xf32> to vector<16x128xf32>
    %219 = vector.broadcast %217 : vector<1x128xf32> to vector<16x128xf32>
    %220 = arith.mulf %219, %218 : vector<16x128xf32>
    %221 = arith.addf %216, %220 : vector<16x128xf32>
    %222 = vector.extract_strided_slice %3 {offsets = [26, 0], sizes = [1, 128], strides = [1, 1]} : vector<63x128xf32> to vector<1x128xf32>
    %223 = vector.extract_strided_slice %91 {offsets = [0, 80], sizes = [16, 128], strides = [1, 1]} : vector<16x226xf32> to vector<16x128xf32>
    %224 = vector.broadcast %222 : vector<1x128xf32> to vector<16x128xf32>
    %225 = arith.mulf %224, %223 : vector<16x128xf32>
    %226 = arith.addf %221, %225 : vector<16x128xf32>
    %227 = vector.extract_strided_slice %3 {offsets = [27, 0], sizes = [1, 128], strides = [1, 1]} : vector<63x128xf32> to vector<1x128xf32>
    %228 = vector.extract_strided_slice %91 {offsets = [0, 96], sizes = [16, 128], strides = [1, 1]} : vector<16x226xf32> to vector<16x128xf32>
    %229 = vector.broadcast %227 : vector<1x128xf32> to vector<16x128xf32>
    %230 = arith.mulf %229, %228 : vector<16x128xf32>
    %231 = arith.addf %226, %230 : vector<16x128xf32>
    %232 = vector.extract_strided_slice %3 {offsets = [28, 0], sizes = [1, 128], strides = [1, 1]} : vector<63x128xf32> to vector<1x128xf32>
    %233 = vector.extract_strided_slice %91 {offsets = [0, 1], sizes = [16, 128], strides = [1, 1]} : vector<16x226xf32> to vector<16x128xf32>
    %234 = vector.broadcast %232 : vector<1x128xf32> to vector<16x128xf32>
    %235 = arith.mulf %234, %233 : vector<16x128xf32>
    %236 = arith.addf %231, %235 : vector<16x128xf32>
    %237 = vector.extract_strided_slice %3 {offsets = [29, 0], sizes = [1, 128], strides = [1, 1]} : vector<63x128xf32> to vector<1x128xf32>
    %238 = vector.extract_strided_slice %91 {offsets = [0, 17], sizes = [16, 128], strides = [1, 1]} : vector<16x226xf32> to vector<16x128xf32>
    %239 = vector.broadcast %237 : vector<1x128xf32> to vector<16x128xf32>
    %240 = arith.mulf %239, %238 : vector<16x128xf32>
    %241 = arith.addf %236, %240 : vector<16x128xf32>
    %242 = vector.extract_strided_slice %3 {offsets = [30, 0], sizes = [1, 128], strides = [1, 1]} : vector<63x128xf32> to vector<1x128xf32>
    %243 = vector.extract_strided_slice %91 {offsets = [0, 33], sizes = [16, 128], strides = [1, 1]} : vector<16x226xf32> to vector<16x128xf32>
    %244 = vector.broadcast %242 : vector<1x128xf32> to vector<16x128xf32>
    %245 = arith.mulf %244, %243 : vector<16x128xf32>
    %246 = arith.addf %241, %245 : vector<16x128xf32>
    %247 = vector.extract_strided_slice %3 {offsets = [31, 0], sizes = [1, 128], strides = [1, 1]} : vector<63x128xf32> to vector<1x128xf32>
    %248 = vector.extract_strided_slice %91 {offsets = [0, 49], sizes = [16, 128], strides = [1, 1]} : vector<16x226xf32> to vector<16x128xf32>
    %249 = vector.broadcast %247 : vector<1x128xf32> to vector<16x128xf32>
    %250 = arith.mulf %249, %248 : vector<16x128xf32>
    %251 = arith.addf %246, %250 : vector<16x128xf32>
    %252 = vector.extract_strided_slice %3 {offsets = [32, 0], sizes = [1, 128], strides = [1, 1]} : vector<63x128xf32> to vector<1x128xf32>
    %253 = vector.extract_strided_slice %91 {offsets = [0, 65], sizes = [16, 128], strides = [1, 1]} : vector<16x226xf32> to vector<16x128xf32>
    %254 = vector.broadcast %252 : vector<1x128xf32> to vector<16x128xf32>
    %255 = arith.mulf %254, %253 : vector<16x128xf32>
    %256 = arith.addf %251, %255 : vector<16x128xf32>
    %257 = vector.extract_strided_slice %3 {offsets = [33, 0], sizes = [1, 128], strides = [1, 1]} : vector<63x128xf32> to vector<1x128xf32>
    %258 = vector.extract_strided_slice %91 {offsets = [0, 81], sizes = [16, 128], strides = [1, 1]} : vector<16x226xf32> to vector<16x128xf32>
    %259 = vector.broadcast %257 : vector<1x128xf32> to vector<16x128xf32>
    %260 = arith.mulf %259, %258 : vector<16x128xf32>
    %261 = arith.addf %256, %260 : vector<16x128xf32>
    %262 = vector.extract_strided_slice %3 {offsets = [34, 0], sizes = [1, 128], strides = [1, 1]} : vector<63x128xf32> to vector<1x128xf32>
    %263 = vector.extract_strided_slice %91 {offsets = [0, 97], sizes = [16, 128], strides = [1, 1]} : vector<16x226xf32> to vector<16x128xf32>
    %264 = vector.broadcast %262 : vector<1x128xf32> to vector<16x128xf32>
    %265 = arith.mulf %264, %263 : vector<16x128xf32>
    %266 = arith.addf %261, %265 : vector<16x128xf32>
    %267 = vector.extract_strided_slice %3 {offsets = [35, 0], sizes = [1, 128], strides = [1, 1]} : vector<63x128xf32> to vector<1x128xf32>
    %268 = vector.extract_strided_slice %91 {offsets = [0, 2], sizes = [16, 128], strides = [1, 1]} : vector<16x226xf32> to vector<16x128xf32>
    %269 = vector.broadcast %267 : vector<1x128xf32> to vector<16x128xf32>
    %270 = arith.mulf %269, %268 : vector<16x128xf32>
    %271 = arith.addf %266, %270 : vector<16x128xf32>
    %272 = vector.extract_strided_slice %3 {offsets = [36, 0], sizes = [1, 128], strides = [1, 1]} : vector<63x128xf32> to vector<1x128xf32>
    %273 = vector.extract_strided_slice %91 {offsets = [0, 18], sizes = [16, 128], strides = [1, 1]} : vector<16x226xf32> to vector<16x128xf32>
    %274 = vector.broadcast %272 : vector<1x128xf32> to vector<16x128xf32>
    %275 = arith.mulf %274, %273 : vector<16x128xf32>
    %276 = arith.addf %271, %275 : vector<16x128xf32>
    %277 = vector.extract_strided_slice %3 {offsets = [37, 0], sizes = [1, 128], strides = [1, 1]} : vector<63x128xf32> to vector<1x128xf32>
    %278 = vector.extract_strided_slice %91 {offsets = [0, 34], sizes = [16, 128], strides = [1, 1]} : vector<16x226xf32> to vector<16x128xf32>
    %279 = vector.broadcast %277 : vector<1x128xf32> to vector<16x128xf32>
    %280 = arith.mulf %279, %278 : vector<16x128xf32>
    %281 = arith.addf %276, %280 : vector<16x128xf32>
    %282 = vector.extract_strided_slice %3 {offsets = [38, 0], sizes = [1, 128], strides = [1, 1]} : vector<63x128xf32> to vector<1x128xf32>
    %283 = vector.extract_strided_slice %91 {offsets = [0, 50], sizes = [16, 128], strides = [1, 1]} : vector<16x226xf32> to vector<16x128xf32>
    %284 = vector.broadcast %282 : vector<1x128xf32> to vector<16x128xf32>
    %285 = arith.mulf %284, %283 : vector<16x128xf32>
    %286 = arith.addf %281, %285 : vector<16x128xf32>
    %287 = vector.extract_strided_slice %3 {offsets = [39, 0], sizes = [1, 128], strides = [1, 1]} : vector<63x128xf32> to vector<1x128xf32>
    %288 = vector.extract_strided_slice %91 {offsets = [0, 66], sizes = [16, 128], strides = [1, 1]} : vector<16x226xf32> to vector<16x128xf32>
    %289 = vector.broadcast %287 : vector<1x128xf32> to vector<16x128xf32>
    %290 = arith.mulf %289, %288 : vector<16x128xf32>
    %291 = arith.addf %286, %290 : vector<16x128xf32>
    %292 = vector.extract_strided_slice %3 {offsets = [40, 0], sizes = [1, 128], strides = [1, 1]} : vector<63x128xf32> to vector<1x128xf32>
    %293 = vector.extract_strided_slice %91 {offsets = [0, 82], sizes = [16, 128], strides = [1, 1]} : vector<16x226xf32> to vector<16x128xf32>
    %294 = vector.broadcast %292 : vector<1x128xf32> to vector<16x128xf32>
    %295 = arith.mulf %294, %293 : vector<16x128xf32>
    %296 = arith.addf %291, %295 : vector<16x128xf32>
    %297 = vector.extract_strided_slice %3 {offsets = [41, 0], sizes = [1, 128], strides = [1, 1]} : vector<63x128xf32> to vector<1x128xf32>
    %298 = vector.extract_strided_slice %91 {offsets = [0, 98], sizes = [16, 128], strides = [1, 1]} : vector<16x226xf32> to vector<16x128xf32>
    %299 = vector.broadcast %297 : vector<1x128xf32> to vector<16x128xf32>
    %300 = arith.mulf %299, %298 : vector<16x128xf32>
    %301 = arith.addf %296, %300 : vector<16x128xf32>
    %302 = vector.extract_strided_slice %3 {offsets = [42, 0], sizes = [1, 128], strides = [1, 1]} : vector<63x128xf32> to vector<1x128xf32>
    %303 = vector.extract_strided_slice %92 {offsets = [0, 0], sizes = [16, 128], strides = [1, 1]} : vector<16x226xf32> to vector<16x128xf32>
    %304 = vector.broadcast %302 : vector<1x128xf32> to vector<16x128xf32>
    %305 = arith.mulf %304, %303 : vector<16x128xf32>
    %306 = arith.addf %301, %305 : vector<16x128xf32>
    %307 = vector.extract_strided_slice %3 {offsets = [43, 0], sizes = [1, 128], strides = [1, 1]} : vector<63x128xf32> to vector<1x128xf32>
    %308 = vector.extract_strided_slice %92 {offsets = [0, 16], sizes = [16, 128], strides = [1, 1]} : vector<16x226xf32> to vector<16x128xf32>
    %309 = vector.broadcast %307 : vector<1x128xf32> to vector<16x128xf32>
    %310 = arith.mulf %309, %308 : vector<16x128xf32>
    %311 = arith.addf %306, %310 : vector<16x128xf32>
    %312 = vector.extract_strided_slice %3 {offsets = [44, 0], sizes = [1, 128], strides = [1, 1]} : vector<63x128xf32> to vector<1x128xf32>
    %313 = vector.extract_strided_slice %92 {offsets = [0, 32], sizes = [16, 128], strides = [1, 1]} : vector<16x226xf32> to vector<16x128xf32>
    %314 = vector.broadcast %312 : vector<1x128xf32> to vector<16x128xf32>
    %315 = arith.mulf %314, %313 : vector<16x128xf32>
    %316 = arith.addf %311, %315 : vector<16x128xf32>
    %317 = vector.extract_strided_slice %3 {offsets = [45, 0], sizes = [1, 128], strides = [1, 1]} : vector<63x128xf32> to vector<1x128xf32>
    %318 = vector.extract_strided_slice %92 {offsets = [0, 48], sizes = [16, 128], strides = [1, 1]} : vector<16x226xf32> to vector<16x128xf32>
    %319 = vector.broadcast %317 : vector<1x128xf32> to vector<16x128xf32>
    %320 = arith.mulf %319, %318 : vector<16x128xf32>
    %321 = arith.addf %316, %320 : vector<16x128xf32>
    %322 = vector.extract_strided_slice %3 {offsets = [46, 0], sizes = [1, 128], strides = [1, 1]} : vector<63x128xf32> to vector<1x128xf32>
    %323 = vector.extract_strided_slice %92 {offsets = [0, 64], sizes = [16, 128], strides = [1, 1]} : vector<16x226xf32> to vector<16x128xf32>
    %324 = vector.broadcast %322 : vector<1x128xf32> to vector<16x128xf32>
    %325 = arith.mulf %324, %323 : vector<16x128xf32>
    %326 = arith.addf %321, %325 : vector<16x128xf32>
    %327 = vector.extract_strided_slice %3 {offsets = [47, 0], sizes = [1, 128], strides = [1, 1]} : vector<63x128xf32> to vector<1x128xf32>
    %328 = vector.extract_strided_slice %92 {offsets = [0, 80], sizes = [16, 128], strides = [1, 1]} : vector<16x226xf32> to vector<16x128xf32>
    %329 = vector.broadcast %327 : vector<1x128xf32> to vector<16x128xf32>
    %330 = arith.mulf %329, %328 : vector<16x128xf32>
    %331 = arith.addf %326, %330 : vector<16x128xf32>
    %332 = vector.extract_strided_slice %3 {offsets = [48, 0], sizes = [1, 128], strides = [1, 1]} : vector<63x128xf32> to vector<1x128xf32>
    %333 = vector.extract_strided_slice %92 {offsets = [0, 96], sizes = [16, 128], strides = [1, 1]} : vector<16x226xf32> to vector<16x128xf32>
    %334 = vector.broadcast %332 : vector<1x128xf32> to vector<16x128xf32>
    %335 = arith.mulf %334, %333 : vector<16x128xf32>
    %336 = arith.addf %331, %335 : vector<16x128xf32>
    %337 = vector.extract_strided_slice %3 {offsets = [49, 0], sizes = [1, 128], strides = [1, 1]} : vector<63x128xf32> to vector<1x128xf32>
    %338 = vector.extract_strided_slice %92 {offsets = [0, 1], sizes = [16, 128], strides = [1, 1]} : vector<16x226xf32> to vector<16x128xf32>
    %339 = vector.broadcast %337 : vector<1x128xf32> to vector<16x128xf32>
    %340 = arith.mulf %339, %338 : vector<16x128xf32>
    %341 = arith.addf %336, %340 : vector<16x128xf32>
    %342 = vector.extract_strided_slice %3 {offsets = [50, 0], sizes = [1, 128], strides = [1, 1]} : vector<63x128xf32> to vector<1x128xf32>
    %343 = vector.extract_strided_slice %92 {offsets = [0, 17], sizes = [16, 128], strides = [1, 1]} : vector<16x226xf32> to vector<16x128xf32>
    %344 = vector.broadcast %342 : vector<1x128xf32> to vector<16x128xf32>
    %345 = arith.mulf %344, %343 : vector<16x128xf32>
    %346 = arith.addf %341, %345 : vector<16x128xf32>
    %347 = vector.extract_strided_slice %3 {offsets = [51, 0], sizes = [1, 128], strides = [1, 1]} : vector<63x128xf32> to vector<1x128xf32>
    %348 = vector.extract_strided_slice %92 {offsets = [0, 33], sizes = [16, 128], strides = [1, 1]} : vector<16x226xf32> to vector<16x128xf32>
    %349 = vector.broadcast %347 : vector<1x128xf32> to vector<16x128xf32>
    %350 = arith.mulf %349, %348 : vector<16x128xf32>
    %351 = arith.addf %346, %350 : vector<16x128xf32>
    %352 = vector.extract_strided_slice %3 {offsets = [52, 0], sizes = [1, 128], strides = [1, 1]} : vector<63x128xf32> to vector<1x128xf32>
    %353 = vector.extract_strided_slice %92 {offsets = [0, 49], sizes = [16, 128], strides = [1, 1]} : vector<16x226xf32> to vector<16x128xf32>
    %354 = vector.broadcast %352 : vector<1x128xf32> to vector<16x128xf32>
    %355 = arith.mulf %354, %353 : vector<16x128xf32>
    %356 = arith.addf %351, %355 : vector<16x128xf32>
    %357 = vector.extract_strided_slice %3 {offsets = [53, 0], sizes = [1, 128], strides = [1, 1]} : vector<63x128xf32> to vector<1x128xf32>
    %358 = vector.extract_strided_slice %92 {offsets = [0, 65], sizes = [16, 128], strides = [1, 1]} : vector<16x226xf32> to vector<16x128xf32>
    %359 = vector.broadcast %357 : vector<1x128xf32> to vector<16x128xf32>
    %360 = arith.mulf %359, %358 : vector<16x128xf32>
    %361 = arith.addf %356, %360 : vector<16x128xf32>
    %362 = vector.extract_strided_slice %3 {offsets = [54, 0], sizes = [1, 128], strides = [1, 1]} : vector<63x128xf32> to vector<1x128xf32>
    %363 = vector.extract_strided_slice %92 {offsets = [0, 81], sizes = [16, 128], strides = [1, 1]} : vector<16x226xf32> to vector<16x128xf32>
    %364 = vector.broadcast %362 : vector<1x128xf32> to vector<16x128xf32>
    %365 = arith.mulf %364, %363 : vector<16x128xf32>
    %366 = arith.addf %361, %365 : vector<16x128xf32>
    %367 = vector.extract_strided_slice %3 {offsets = [55, 0], sizes = [1, 128], strides = [1, 1]} : vector<63x128xf32> to vector<1x128xf32>
    %368 = vector.extract_strided_slice %92 {offsets = [0, 97], sizes = [16, 128], strides = [1, 1]} : vector<16x226xf32> to vector<16x128xf32>
    %369 = vector.broadcast %367 : vector<1x128xf32> to vector<16x128xf32>
    %370 = arith.mulf %369, %368 : vector<16x128xf32>
    %371 = arith.addf %366, %370 : vector<16x128xf32>
    %372 = vector.extract_strided_slice %3 {offsets = [56, 0], sizes = [1, 128], strides = [1, 1]} : vector<63x128xf32> to vector<1x128xf32>
    %373 = vector.extract_strided_slice %92 {offsets = [0, 2], sizes = [16, 128], strides = [1, 1]} : vector<16x226xf32> to vector<16x128xf32>
    %374 = vector.broadcast %372 : vector<1x128xf32> to vector<16x128xf32>
    %375 = arith.mulf %374, %373 : vector<16x128xf32>
    %376 = arith.addf %371, %375 : vector<16x128xf32>
    %377 = vector.extract_strided_slice %3 {offsets = [57, 0], sizes = [1, 128], strides = [1, 1]} : vector<63x128xf32> to vector<1x128xf32>
    %378 = vector.extract_strided_slice %92 {offsets = [0, 18], sizes = [16, 128], strides = [1, 1]} : vector<16x226xf32> to vector<16x128xf32>
    %379 = vector.broadcast %377 : vector<1x128xf32> to vector<16x128xf32>
    %380 = arith.mulf %379, %378 : vector<16x128xf32>
    %381 = arith.addf %376, %380 : vector<16x128xf32>
    %382 = vector.extract_strided_slice %3 {offsets = [58, 0], sizes = [1, 128], strides = [1, 1]} : vector<63x128xf32> to vector<1x128xf32>
    %383 = vector.extract_strided_slice %92 {offsets = [0, 34], sizes = [16, 128], strides = [1, 1]} : vector<16x226xf32> to vector<16x128xf32>
    %384 = vector.broadcast %382 : vector<1x128xf32> to vector<16x128xf32>
    %385 = arith.mulf %384, %383 : vector<16x128xf32>
    %386 = arith.addf %381, %385 : vector<16x128xf32>
    %387 = vector.extract_strided_slice %3 {offsets = [59, 0], sizes = [1, 128], strides = [1, 1]} : vector<63x128xf32> to vector<1x128xf32>
    %388 = vector.extract_strided_slice %92 {offsets = [0, 50], sizes = [16, 128], strides = [1, 1]} : vector<16x226xf32> to vector<16x128xf32>
    %389 = vector.broadcast %387 : vector<1x128xf32> to vector<16x128xf32>
    %390 = arith.mulf %389, %388 : vector<16x128xf32>
    %391 = arith.addf %386, %390 : vector<16x128xf32>
    %392 = vector.extract_strided_slice %3 {offsets = [60, 0], sizes = [1, 128], strides = [1, 1]} : vector<63x128xf32> to vector<1x128xf32>
    %393 = vector.extract_strided_slice %92 {offsets = [0, 66], sizes = [16, 128], strides = [1, 1]} : vector<16x226xf32> to vector<16x128xf32>
    %394 = vector.broadcast %392 : vector<1x128xf32> to vector<16x128xf32>
    %395 = arith.mulf %394, %393 : vector<16x128xf32>
    %396 = arith.addf %391, %395 : vector<16x128xf32>
    %397 = vector.extract_strided_slice %3 {offsets = [61, 0], sizes = [1, 128], strides = [1, 1]} : vector<63x128xf32> to vector<1x128xf32>
    %398 = vector.extract_strided_slice %92 {offsets = [0, 82], sizes = [16, 128], strides = [1, 1]} : vector<16x226xf32> to vector<16x128xf32>
    %399 = vector.broadcast %397 : vector<1x128xf32> to vector<16x128xf32>
    %400 = arith.mulf %399, %398 : vector<16x128xf32>
    %401 = arith.addf %396, %400 : vector<16x128xf32>
    %402 = vector.extract_strided_slice %3 {offsets = [62, 0], sizes = [1, 128], strides = [1, 1]} : vector<63x128xf32> to vector<1x128xf32>
    %403 = vector.extract_strided_slice %92 {offsets = [0, 98], sizes = [16, 128], strides = [1, 1]} : vector<16x226xf32> to vector<16x128xf32>
    %404 = vector.broadcast %402 : vector<1x128xf32> to vector<16x128xf32>
    %405 = arith.mulf %404, %403 : vector<16x128xf32>
    %406 = arith.addf %401, %405 : vector<16x128xf32>
    %cst_24 = arith.constant 0.000000e+00 : f32
    %407 = vector.broadcast %cst_24 : f32 to vector<16x128xf32>
    %408 = arith.maximumf %406, %407 : vector<16x128xf32>
    %c0_i32_25 = arith.constant 0 : i32
    %409 = vector.broadcast %c0_i32_25 : i32 to vector<1x128xi32>
    %410 = arith.cmpi sge, %0, %409 : vector<1x128xi32>
    %c64_i32_26 = arith.constant 64 : i32
    %411 = vector.broadcast %c64_i32_26 : i32 to vector<1x128xi32>
    %412 = arith.cmpi slt, %0, %411 : vector<1x128xi32>
    %413 = arith.andi %410, %412 : vector<1x128xi1>
    %414 = arith.extui %413 : vector<1x128xi1> to vector<1x128xi32>
    %415 = arith.sitofp %414 : vector<1x128xi32> to vector<1x128xf32>
    %cst_27 = arith.constant 3.000000e+38 : f32
    %416 = vector.shape_cast %413 : vector<1x128xi1> to vector<1x128xi1>
    %417 = vector.broadcast %416 : vector<1x128xi1> to vector<16x128xi1>
    %418 = vector.broadcast %cst_27 : f32 to vector<16x128xf32>
    %419 = arith.select %417, %408, %418 : vector<16x128xi1>, vector<16x128xf32>
    %420 = vector.shape_cast %419 : vector<16x128xf32> to vector<1x16x128xf32>
    %cst_28 = arith.constant dense<0x7F800000> : vector<1xf32>
    %421 = vector.multi_reduction <minimumf>, %420, %cst_28 [1, 2] : vector<1x16x128xf32> to vector<1xf32>
    %422 = vector.shape_cast %421 : vector<1xf32> to vector<1x1x1xf32>
    %423 = vector.extract %422[0, 0, 0] : f32 from vector<1x1x1xf32>
    %cst_29 = arith.constant 0.000000e+00 : f32
    %cst_30 = arith.constant 3.000000e+38 : f32
    %424 = arith.subf %cst_29, %cst_30 : f32
    %425 = vector.shape_cast %413 : vector<1x128xi1> to vector<1x128xi1>
    %426 = vector.broadcast %425 : vector<1x128xi1> to vector<16x128xi1>
    %427 = vector.broadcast %424 : f32 to vector<16x128xf32>
    %428 = arith.select %426, %408, %427 : vector<16x128xi1>, vector<16x128xf32>
    %429 = vector.shape_cast %428 : vector<16x128xf32> to vector<1x16x128xf32>
    %cst_31 = arith.constant dense<0xFF800000> : vector<1xf32>
    %430 = vector.multi_reduction <maximumf>, %429, %cst_31 [1, 2] : vector<1x16x128xf32> to vector<1xf32>
    %431 = vector.shape_cast %430 : vector<1xf32> to vector<1x1x1xf32>
    %432 = vector.extract %431[0, 0, 0] : f32 from vector<1x1x1xf32>
    %433 = arith.subf %432, %423 : f32
    %cst_32 = arith.constant 2.550000e+02 : f32
    %434 = arith.divf %433, %cst_32 : f32
    %cst_33 = arith.constant 9.99999993E-9 : f32
    %435 = arith.maximumf %434, %cst_33 : f32
    %cst_34 = arith.constant 1.000000e+00 : f32
    %436 = arith.divf %cst_34, %435 : f32
    %437 = vector.broadcast %423 : f32 to vector<1x128xf32>
    %438 = arith.mulf %415, %437 : vector<1x128xf32>
    %439 = vector.broadcast %436 : f32 to vector<1x128xf32>
    %440 = arith.mulf %415, %439 : vector<1x128xf32>
    %441 = vector.broadcast %435 : f32 to vector<1x128xf32>
    %442 = arith.mulf %415, %441 : vector<1x128xf32>
    %c64_i32_35 = arith.constant 64 : i32
    %443 = vector.broadcast %c64_i32_35 : i32 to vector<1x128xi32>
    %444 = arith.cmpi sge, %0, %443 : vector<1x128xi32>
    %c128_i32_36 = arith.constant 128 : i32
    %445 = vector.broadcast %c128_i32_36 : i32 to vector<1x128xi32>
    %446 = arith.cmpi slt, %0, %445 : vector<1x128xi32>
    %447 = arith.andi %444, %446 : vector<1x128xi1>
    %448 = arith.extui %447 : vector<1x128xi1> to vector<1x128xi32>
    %449 = arith.sitofp %448 : vector<1x128xi32> to vector<1x128xf32>
    %cst_37 = arith.constant 3.000000e+38 : f32
    %450 = vector.shape_cast %447 : vector<1x128xi1> to vector<1x128xi1>
    %451 = vector.broadcast %450 : vector<1x128xi1> to vector<16x128xi1>
    %452 = vector.broadcast %cst_37 : f32 to vector<16x128xf32>
    %453 = arith.select %451, %408, %452 : vector<16x128xi1>, vector<16x128xf32>
    %454 = vector.shape_cast %453 : vector<16x128xf32> to vector<1x16x128xf32>
    %cst_38 = arith.constant dense<0x7F800000> : vector<1xf32>
    %455 = vector.multi_reduction <minimumf>, %454, %cst_38 [1, 2] : vector<1x16x128xf32> to vector<1xf32>
    %456 = vector.shape_cast %455 : vector<1xf32> to vector<1x1x1xf32>
    %457 = vector.extract %456[0, 0, 0] : f32 from vector<1x1x1xf32>
    %cst_39 = arith.constant 0.000000e+00 : f32
    %cst_40 = arith.constant 3.000000e+38 : f32
    %458 = arith.subf %cst_39, %cst_40 : f32
    %459 = vector.shape_cast %447 : vector<1x128xi1> to vector<1x128xi1>
    %460 = vector.broadcast %459 : vector<1x128xi1> to vector<16x128xi1>
    %461 = vector.broadcast %458 : f32 to vector<16x128xf32>
    %462 = arith.select %460, %408, %461 : vector<16x128xi1>, vector<16x128xf32>
    %463 = vector.shape_cast %462 : vector<16x128xf32> to vector<1x16x128xf32>
    %cst_41 = arith.constant dense<0xFF800000> : vector<1xf32>
    %464 = vector.multi_reduction <maximumf>, %463, %cst_41 [1, 2] : vector<1x16x128xf32> to vector<1xf32>
    %465 = vector.shape_cast %464 : vector<1xf32> to vector<1x1x1xf32>
    %466 = vector.extract %465[0, 0, 0] : f32 from vector<1x1x1xf32>
    %467 = arith.subf %466, %457 : f32
    %cst_42 = arith.constant 2.550000e+02 : f32
    %468 = arith.divf %467, %cst_42 : f32
    %cst_43 = arith.constant 9.99999993E-9 : f32
    %469 = arith.maximumf %468, %cst_43 : f32
    %cst_44 = arith.constant 1.000000e+00 : f32
    %470 = arith.divf %cst_44, %469 : f32
    %471 = vector.broadcast %457 : f32 to vector<1x128xf32>
    %472 = arith.mulf %449, %471 : vector<1x128xf32>
    %473 = arith.addf %438, %472 : vector<1x128xf32>
    %474 = vector.broadcast %470 : f32 to vector<1x128xf32>
    %475 = arith.mulf %449, %474 : vector<1x128xf32>
    %476 = arith.addf %440, %475 : vector<1x128xf32>
    %477 = vector.broadcast %469 : f32 to vector<1x128xf32>
    %478 = arith.mulf %449, %477 : vector<1x128xf32>
    %479 = arith.addf %442, %478 : vector<1x128xf32>
    %480 = vector.broadcast %473 : vector<1x128xf32> to vector<16x128xf32>
    %481 = arith.subf %408, %480 : vector<16x128xf32>
    %482 = vector.broadcast %476 : vector<1x128xf32> to vector<16x128xf32>
    %483 = arith.mulf %481, %482 : vector<16x128xf32>
    %484 = math.roundeven %483 : vector<16x128xf32>
    %cst_45 = arith.constant 0.000000e+00 : f32
    %cst_46 = arith.constant 2.550000e+02 : f32
    %485 = vector.broadcast %cst_45 : f32 to vector<16x128xf32>
    %486 = arith.maximumf %485, %484 : vector<16x128xf32>
    %487 = vector.broadcast %cst_46 : f32 to vector<16x128xf32>
    %488 = arith.minimumf %487, %486 : vector<16x128xf32>
    %489 = vector.broadcast %479 : vector<1x128xf32> to vector<16x128xf32>
    %490 = arith.mulf %488, %489 : vector<16x128xf32>
    %491 = vector.broadcast %473 : vector<1x128xf32> to vector<16x128xf32>
    %492 = arith.addf %490, %491 : vector<16x128xf32>
    %cst_47 = arith.constant 0.000000e+00 : f32
    %493 = vector.broadcast %cst_47 : f32 to vector<16x49xf32>
    %cst_48 = arith.constant 0.000000e+00 : f32
    %494 = vector.broadcast %cst_48 : f32 to vector<1x226xf32>
    %495 = tpu.concatenate %493, %492, %493 in 1 : vector<16x49xf32>, vector<16x128xf32>, vector<16x49xf32> -> vector<16x226xf32>
    %496 = tpu.concatenate %494, %495, %494 in 0 : vector<1x226xf32>, vector<16x226xf32>, vector<1x226xf32> -> vector<18x226xf32>
    %497 = vector.extract_strided_slice %496 {offsets = [0, 0], sizes = [16, 226], strides = [1, 1]} : vector<18x226xf32> to vector<16x226xf32>
    %498 = vector.extract_strided_slice %496 {offsets = [1, 0], sizes = [16, 226], strides = [1, 1]} : vector<18x226xf32> to vector<16x226xf32>
    %499 = vector.extract_strided_slice %496 {offsets = [2, 0], sizes = [16, 226], strides = [1, 1]} : vector<18x226xf32> to vector<16x226xf32>
    %500 = vector.extract_strided_slice %4 {offsets = [0, 0], sizes = [1, 128], strides = [1, 1]} : vector<63x128xf32> to vector<1x128xf32>
    %501 = vector.extract_strided_slice %497 {offsets = [0, 0], sizes = [16, 128], strides = [1, 1]} : vector<16x226xf32> to vector<16x128xf32>
    %502 = vector.broadcast %500 : vector<1x128xf32> to vector<16x128xf32>
    %503 = arith.mulf %502, %501 : vector<16x128xf32>
    %504 = vector.extract_strided_slice %4 {offsets = [1, 0], sizes = [1, 128], strides = [1, 1]} : vector<63x128xf32> to vector<1x128xf32>
    %505 = vector.extract_strided_slice %497 {offsets = [0, 16], sizes = [16, 128], strides = [1, 1]} : vector<16x226xf32> to vector<16x128xf32>
    %506 = vector.broadcast %504 : vector<1x128xf32> to vector<16x128xf32>
    %507 = arith.mulf %506, %505 : vector<16x128xf32>
    %508 = arith.addf %503, %507 : vector<16x128xf32>
    %509 = vector.extract_strided_slice %4 {offsets = [2, 0], sizes = [1, 128], strides = [1, 1]} : vector<63x128xf32> to vector<1x128xf32>
    %510 = vector.extract_strided_slice %497 {offsets = [0, 32], sizes = [16, 128], strides = [1, 1]} : vector<16x226xf32> to vector<16x128xf32>
    %511 = vector.broadcast %509 : vector<1x128xf32> to vector<16x128xf32>
    %512 = arith.mulf %511, %510 : vector<16x128xf32>
    %513 = arith.addf %508, %512 : vector<16x128xf32>
    %514 = vector.extract_strided_slice %4 {offsets = [3, 0], sizes = [1, 128], strides = [1, 1]} : vector<63x128xf32> to vector<1x128xf32>
    %515 = vector.extract_strided_slice %497 {offsets = [0, 48], sizes = [16, 128], strides = [1, 1]} : vector<16x226xf32> to vector<16x128xf32>
    %516 = vector.broadcast %514 : vector<1x128xf32> to vector<16x128xf32>
    %517 = arith.mulf %516, %515 : vector<16x128xf32>
    %518 = arith.addf %513, %517 : vector<16x128xf32>
    %519 = vector.extract_strided_slice %4 {offsets = [4, 0], sizes = [1, 128], strides = [1, 1]} : vector<63x128xf32> to vector<1x128xf32>
    %520 = vector.extract_strided_slice %497 {offsets = [0, 64], sizes = [16, 128], strides = [1, 1]} : vector<16x226xf32> to vector<16x128xf32>
    %521 = vector.broadcast %519 : vector<1x128xf32> to vector<16x128xf32>
    %522 = arith.mulf %521, %520 : vector<16x128xf32>
    %523 = arith.addf %518, %522 : vector<16x128xf32>
    %524 = vector.extract_strided_slice %4 {offsets = [5, 0], sizes = [1, 128], strides = [1, 1]} : vector<63x128xf32> to vector<1x128xf32>
    %525 = vector.extract_strided_slice %497 {offsets = [0, 80], sizes = [16, 128], strides = [1, 1]} : vector<16x226xf32> to vector<16x128xf32>
    %526 = vector.broadcast %524 : vector<1x128xf32> to vector<16x128xf32>
    %527 = arith.mulf %526, %525 : vector<16x128xf32>
    %528 = arith.addf %523, %527 : vector<16x128xf32>
    %529 = vector.extract_strided_slice %4 {offsets = [6, 0], sizes = [1, 128], strides = [1, 1]} : vector<63x128xf32> to vector<1x128xf32>
    %530 = vector.extract_strided_slice %497 {offsets = [0, 96], sizes = [16, 128], strides = [1, 1]} : vector<16x226xf32> to vector<16x128xf32>
    %531 = vector.broadcast %529 : vector<1x128xf32> to vector<16x128xf32>
    %532 = arith.mulf %531, %530 : vector<16x128xf32>
    %533 = arith.addf %528, %532 : vector<16x128xf32>
    %534 = vector.extract_strided_slice %4 {offsets = [7, 0], sizes = [1, 128], strides = [1, 1]} : vector<63x128xf32> to vector<1x128xf32>
    %535 = vector.extract_strided_slice %497 {offsets = [0, 1], sizes = [16, 128], strides = [1, 1]} : vector<16x226xf32> to vector<16x128xf32>
    %536 = vector.broadcast %534 : vector<1x128xf32> to vector<16x128xf32>
    %537 = arith.mulf %536, %535 : vector<16x128xf32>
    %538 = arith.addf %533, %537 : vector<16x128xf32>
    %539 = vector.extract_strided_slice %4 {offsets = [8, 0], sizes = [1, 128], strides = [1, 1]} : vector<63x128xf32> to vector<1x128xf32>
    %540 = vector.extract_strided_slice %497 {offsets = [0, 17], sizes = [16, 128], strides = [1, 1]} : vector<16x226xf32> to vector<16x128xf32>
    %541 = vector.broadcast %539 : vector<1x128xf32> to vector<16x128xf32>
    %542 = arith.mulf %541, %540 : vector<16x128xf32>
    %543 = arith.addf %538, %542 : vector<16x128xf32>
    %544 = vector.extract_strided_slice %4 {offsets = [9, 0], sizes = [1, 128], strides = [1, 1]} : vector<63x128xf32> to vector<1x128xf32>
    %545 = vector.extract_strided_slice %497 {offsets = [0, 33], sizes = [16, 128], strides = [1, 1]} : vector<16x226xf32> to vector<16x128xf32>
    %546 = vector.broadcast %544 : vector<1x128xf32> to vector<16x128xf32>
    %547 = arith.mulf %546, %545 : vector<16x128xf32>
    %548 = arith.addf %543, %547 : vector<16x128xf32>
    %549 = vector.extract_strided_slice %4 {offsets = [10, 0], sizes = [1, 128], strides = [1, 1]} : vector<63x128xf32> to vector<1x128xf32>
    %550 = vector.extract_strided_slice %497 {offsets = [0, 49], sizes = [16, 128], strides = [1, 1]} : vector<16x226xf32> to vector<16x128xf32>
    %551 = vector.broadcast %549 : vector<1x128xf32> to vector<16x128xf32>
    %552 = arith.mulf %551, %550 : vector<16x128xf32>
    %553 = arith.addf %548, %552 : vector<16x128xf32>
    %554 = vector.extract_strided_slice %4 {offsets = [11, 0], sizes = [1, 128], strides = [1, 1]} : vector<63x128xf32> to vector<1x128xf32>
    %555 = vector.extract_strided_slice %497 {offsets = [0, 65], sizes = [16, 128], strides = [1, 1]} : vector<16x226xf32> to vector<16x128xf32>
    %556 = vector.broadcast %554 : vector<1x128xf32> to vector<16x128xf32>
    %557 = arith.mulf %556, %555 : vector<16x128xf32>
    %558 = arith.addf %553, %557 : vector<16x128xf32>
    %559 = vector.extract_strided_slice %4 {offsets = [12, 0], sizes = [1, 128], strides = [1, 1]} : vector<63x128xf32> to vector<1x128xf32>
    %560 = vector.extract_strided_slice %497 {offsets = [0, 81], sizes = [16, 128], strides = [1, 1]} : vector<16x226xf32> to vector<16x128xf32>
    %561 = vector.broadcast %559 : vector<1x128xf32> to vector<16x128xf32>
    %562 = arith.mulf %561, %560 : vector<16x128xf32>
    %563 = arith.addf %558, %562 : vector<16x128xf32>
    %564 = vector.extract_strided_slice %4 {offsets = [13, 0], sizes = [1, 128], strides = [1, 1]} : vector<63x128xf32> to vector<1x128xf32>
    %565 = vector.extract_strided_slice %497 {offsets = [0, 97], sizes = [16, 128], strides = [1, 1]} : vector<16x226xf32> to vector<16x128xf32>
    %566 = vector.broadcast %564 : vector<1x128xf32> to vector<16x128xf32>
    %567 = arith.mulf %566, %565 : vector<16x128xf32>
    %568 = arith.addf %563, %567 : vector<16x128xf32>
    %569 = vector.extract_strided_slice %4 {offsets = [14, 0], sizes = [1, 128], strides = [1, 1]} : vector<63x128xf32> to vector<1x128xf32>
    %570 = vector.extract_strided_slice %497 {offsets = [0, 2], sizes = [16, 128], strides = [1, 1]} : vector<16x226xf32> to vector<16x128xf32>
    %571 = vector.broadcast %569 : vector<1x128xf32> to vector<16x128xf32>
    %572 = arith.mulf %571, %570 : vector<16x128xf32>
    %573 = arith.addf %568, %572 : vector<16x128xf32>
    %574 = vector.extract_strided_slice %4 {offsets = [15, 0], sizes = [1, 128], strides = [1, 1]} : vector<63x128xf32> to vector<1x128xf32>
    %575 = vector.extract_strided_slice %497 {offsets = [0, 18], sizes = [16, 128], strides = [1, 1]} : vector<16x226xf32> to vector<16x128xf32>
    %576 = vector.broadcast %574 : vector<1x128xf32> to vector<16x128xf32>
    %577 = arith.mulf %576, %575 : vector<16x128xf32>
    %578 = arith.addf %573, %577 : vector<16x128xf32>
    %579 = vector.extract_strided_slice %4 {offsets = [16, 0], sizes = [1, 128], strides = [1, 1]} : vector<63x128xf32> to vector<1x128xf32>
    %580 = vector.extract_strided_slice %497 {offsets = [0, 34], sizes = [16, 128], strides = [1, 1]} : vector<16x226xf32> to vector<16x128xf32>
    %581 = vector.broadcast %579 : vector<1x128xf32> to vector<16x128xf32>
    %582 = arith.mulf %581, %580 : vector<16x128xf32>
    %583 = arith.addf %578, %582 : vector<16x128xf32>
    %584 = vector.extract_strided_slice %4 {offsets = [17, 0], sizes = [1, 128], strides = [1, 1]} : vector<63x128xf32> to vector<1x128xf32>
    %585 = vector.extract_strided_slice %497 {offsets = [0, 50], sizes = [16, 128], strides = [1, 1]} : vector<16x226xf32> to vector<16x128xf32>
    %586 = vector.broadcast %584 : vector<1x128xf32> to vector<16x128xf32>
    %587 = arith.mulf %586, %585 : vector<16x128xf32>
    %588 = arith.addf %583, %587 : vector<16x128xf32>
    %589 = vector.extract_strided_slice %4 {offsets = [18, 0], sizes = [1, 128], strides = [1, 1]} : vector<63x128xf32> to vector<1x128xf32>
    %590 = vector.extract_strided_slice %497 {offsets = [0, 66], sizes = [16, 128], strides = [1, 1]} : vector<16x226xf32> to vector<16x128xf32>
    %591 = vector.broadcast %589 : vector<1x128xf32> to vector<16x128xf32>
    %592 = arith.mulf %591, %590 : vector<16x128xf32>
    %593 = arith.addf %588, %592 : vector<16x128xf32>
    %594 = vector.extract_strided_slice %4 {offsets = [19, 0], sizes = [1, 128], strides = [1, 1]} : vector<63x128xf32> to vector<1x128xf32>
    %595 = vector.extract_strided_slice %497 {offsets = [0, 82], sizes = [16, 128], strides = [1, 1]} : vector<16x226xf32> to vector<16x128xf32>
    %596 = vector.broadcast %594 : vector<1x128xf32> to vector<16x128xf32>
    %597 = arith.mulf %596, %595 : vector<16x128xf32>
    %598 = arith.addf %593, %597 : vector<16x128xf32>
    %599 = vector.extract_strided_slice %4 {offsets = [20, 0], sizes = [1, 128], strides = [1, 1]} : vector<63x128xf32> to vector<1x128xf32>
    %600 = vector.extract_strided_slice %497 {offsets = [0, 98], sizes = [16, 128], strides = [1, 1]} : vector<16x226xf32> to vector<16x128xf32>
    %601 = vector.broadcast %599 : vector<1x128xf32> to vector<16x128xf32>
    %602 = arith.mulf %601, %600 : vector<16x128xf32>
    %603 = arith.addf %598, %602 : vector<16x128xf32>
    %604 = vector.extract_strided_slice %4 {offsets = [21, 0], sizes = [1, 128], strides = [1, 1]} : vector<63x128xf32> to vector<1x128xf32>
    %605 = vector.extract_strided_slice %498 {offsets = [0, 0], sizes = [16, 128], strides = [1, 1]} : vector<16x226xf32> to vector<16x128xf32>
    %606 = vector.broadcast %604 : vector<1x128xf32> to vector<16x128xf32>
    %607 = arith.mulf %606, %605 : vector<16x128xf32>
    %608 = arith.addf %603, %607 : vector<16x128xf32>
    %609 = vector.extract_strided_slice %4 {offsets = [22, 0], sizes = [1, 128], strides = [1, 1]} : vector<63x128xf32> to vector<1x128xf32>
    %610 = vector.extract_strided_slice %498 {offsets = [0, 16], sizes = [16, 128], strides = [1, 1]} : vector<16x226xf32> to vector<16x128xf32>
    %611 = vector.broadcast %609 : vector<1x128xf32> to vector<16x128xf32>
    %612 = arith.mulf %611, %610 : vector<16x128xf32>
    %613 = arith.addf %608, %612 : vector<16x128xf32>
    %614 = vector.extract_strided_slice %4 {offsets = [23, 0], sizes = [1, 128], strides = [1, 1]} : vector<63x128xf32> to vector<1x128xf32>
    %615 = vector.extract_strided_slice %498 {offsets = [0, 32], sizes = [16, 128], strides = [1, 1]} : vector<16x226xf32> to vector<16x128xf32>
    %616 = vector.broadcast %614 : vector<1x128xf32> to vector<16x128xf32>
    %617 = arith.mulf %616, %615 : vector<16x128xf32>
    %618 = arith.addf %613, %617 : vector<16x128xf32>
    %619 = vector.extract_strided_slice %4 {offsets = [24, 0], sizes = [1, 128], strides = [1, 1]} : vector<63x128xf32> to vector<1x128xf32>
    %620 = vector.extract_strided_slice %498 {offsets = [0, 48], sizes = [16, 128], strides = [1, 1]} : vector<16x226xf32> to vector<16x128xf32>
    %621 = vector.broadcast %619 : vector<1x128xf32> to vector<16x128xf32>
    %622 = arith.mulf %621, %620 : vector<16x128xf32>
    %623 = arith.addf %618, %622 : vector<16x128xf32>
    %624 = vector.extract_strided_slice %4 {offsets = [25, 0], sizes = [1, 128], strides = [1, 1]} : vector<63x128xf32> to vector<1x128xf32>
    %625 = vector.extract_strided_slice %498 {offsets = [0, 64], sizes = [16, 128], strides = [1, 1]} : vector<16x226xf32> to vector<16x128xf32>
    %626 = vector.broadcast %624 : vector<1x128xf32> to vector<16x128xf32>
    %627 = arith.mulf %626, %625 : vector<16x128xf32>
    %628 = arith.addf %623, %627 : vector<16x128xf32>
    %629 = vector.extract_strided_slice %4 {offsets = [26, 0], sizes = [1, 128], strides = [1, 1]} : vector<63x128xf32> to vector<1x128xf32>
    %630 = vector.extract_strided_slice %498 {offsets = [0, 80], sizes = [16, 128], strides = [1, 1]} : vector<16x226xf32> to vector<16x128xf32>
    %631 = vector.broadcast %629 : vector<1x128xf32> to vector<16x128xf32>
    %632 = arith.mulf %631, %630 : vector<16x128xf32>
    %633 = arith.addf %628, %632 : vector<16x128xf32>
    %634 = vector.extract_strided_slice %4 {offsets = [27, 0], sizes = [1, 128], strides = [1, 1]} : vector<63x128xf32> to vector<1x128xf32>
    %635 = vector.extract_strided_slice %498 {offsets = [0, 96], sizes = [16, 128], strides = [1, 1]} : vector<16x226xf32> to vector<16x128xf32>
    %636 = vector.broadcast %634 : vector<1x128xf32> to vector<16x128xf32>
    %637 = arith.mulf %636, %635 : vector<16x128xf32>
    %638 = arith.addf %633, %637 : vector<16x128xf32>
    %639 = vector.extract_strided_slice %4 {offsets = [28, 0], sizes = [1, 128], strides = [1, 1]} : vector<63x128xf32> to vector<1x128xf32>
    %640 = vector.extract_strided_slice %498 {offsets = [0, 1], sizes = [16, 128], strides = [1, 1]} : vector<16x226xf32> to vector<16x128xf32>
    %641 = vector.broadcast %639 : vector<1x128xf32> to vector<16x128xf32>
    %642 = arith.mulf %641, %640 : vector<16x128xf32>
    %643 = arith.addf %638, %642 : vector<16x128xf32>
    %644 = vector.extract_strided_slice %4 {offsets = [29, 0], sizes = [1, 128], strides = [1, 1]} : vector<63x128xf32> to vector<1x128xf32>
    %645 = vector.extract_strided_slice %498 {offsets = [0, 17], sizes = [16, 128], strides = [1, 1]} : vector<16x226xf32> to vector<16x128xf32>
    %646 = vector.broadcast %644 : vector<1x128xf32> to vector<16x128xf32>
    %647 = arith.mulf %646, %645 : vector<16x128xf32>
    %648 = arith.addf %643, %647 : vector<16x128xf32>
    %649 = vector.extract_strided_slice %4 {offsets = [30, 0], sizes = [1, 128], strides = [1, 1]} : vector<63x128xf32> to vector<1x128xf32>
    %650 = vector.extract_strided_slice %498 {offsets = [0, 33], sizes = [16, 128], strides = [1, 1]} : vector<16x226xf32> to vector<16x128xf32>
    %651 = vector.broadcast %649 : vector<1x128xf32> to vector<16x128xf32>
    %652 = arith.mulf %651, %650 : vector<16x128xf32>
    %653 = arith.addf %648, %652 : vector<16x128xf32>
    %654 = vector.extract_strided_slice %4 {offsets = [31, 0], sizes = [1, 128], strides = [1, 1]} : vector<63x128xf32> to vector<1x128xf32>
    %655 = vector.extract_strided_slice %498 {offsets = [0, 49], sizes = [16, 128], strides = [1, 1]} : vector<16x226xf32> to vector<16x128xf32>
    %656 = vector.broadcast %654 : vector<1x128xf32> to vector<16x128xf32>
    %657 = arith.mulf %656, %655 : vector<16x128xf32>
    %658 = arith.addf %653, %657 : vector<16x128xf32>
    %659 = vector.extract_strided_slice %4 {offsets = [32, 0], sizes = [1, 128], strides = [1, 1]} : vector<63x128xf32> to vector<1x128xf32>
    %660 = vector.extract_strided_slice %498 {offsets = [0, 65], sizes = [16, 128], strides = [1, 1]} : vector<16x226xf32> to vector<16x128xf32>
    %661 = vector.broadcast %659 : vector<1x128xf32> to vector<16x128xf32>
    %662 = arith.mulf %661, %660 : vector<16x128xf32>
    %663 = arith.addf %658, %662 : vector<16x128xf32>
    %664 = vector.extract_strided_slice %4 {offsets = [33, 0], sizes = [1, 128], strides = [1, 1]} : vector<63x128xf32> to vector<1x128xf32>
    %665 = vector.extract_strided_slice %498 {offsets = [0, 81], sizes = [16, 128], strides = [1, 1]} : vector<16x226xf32> to vector<16x128xf32>
    %666 = vector.broadcast %664 : vector<1x128xf32> to vector<16x128xf32>
    %667 = arith.mulf %666, %665 : vector<16x128xf32>
    %668 = arith.addf %663, %667 : vector<16x128xf32>
    %669 = vector.extract_strided_slice %4 {offsets = [34, 0], sizes = [1, 128], strides = [1, 1]} : vector<63x128xf32> to vector<1x128xf32>
    %670 = vector.extract_strided_slice %498 {offsets = [0, 97], sizes = [16, 128], strides = [1, 1]} : vector<16x226xf32> to vector<16x128xf32>
    %671 = vector.broadcast %669 : vector<1x128xf32> to vector<16x128xf32>
    %672 = arith.mulf %671, %670 : vector<16x128xf32>
    %673 = arith.addf %668, %672 : vector<16x128xf32>
    %674 = vector.extract_strided_slice %4 {offsets = [35, 0], sizes = [1, 128], strides = [1, 1]} : vector<63x128xf32> to vector<1x128xf32>
    %675 = vector.extract_strided_slice %498 {offsets = [0, 2], sizes = [16, 128], strides = [1, 1]} : vector<16x226xf32> to vector<16x128xf32>
    %676 = vector.broadcast %674 : vector<1x128xf32> to vector<16x128xf32>
    %677 = arith.mulf %676, %675 : vector<16x128xf32>
    %678 = arith.addf %673, %677 : vector<16x128xf32>
    %679 = vector.extract_strided_slice %4 {offsets = [36, 0], sizes = [1, 128], strides = [1, 1]} : vector<63x128xf32> to vector<1x128xf32>
    %680 = vector.extract_strided_slice %498 {offsets = [0, 18], sizes = [16, 128], strides = [1, 1]} : vector<16x226xf32> to vector<16x128xf32>
    %681 = vector.broadcast %679 : vector<1x128xf32> to vector<16x128xf32>
    %682 = arith.mulf %681, %680 : vector<16x128xf32>
    %683 = arith.addf %678, %682 : vector<16x128xf32>
    %684 = vector.extract_strided_slice %4 {offsets = [37, 0], sizes = [1, 128], strides = [1, 1]} : vector<63x128xf32> to vector<1x128xf32>
    %685 = vector.extract_strided_slice %498 {offsets = [0, 34], sizes = [16, 128], strides = [1, 1]} : vector<16x226xf32> to vector<16x128xf32>
    %686 = vector.broadcast %684 : vector<1x128xf32> to vector<16x128xf32>
    %687 = arith.mulf %686, %685 : vector<16x128xf32>
    %688 = arith.addf %683, %687 : vector<16x128xf32>
    %689 = vector.extract_strided_slice %4 {offsets = [38, 0], sizes = [1, 128], strides = [1, 1]} : vector<63x128xf32> to vector<1x128xf32>
    %690 = vector.extract_strided_slice %498 {offsets = [0, 50], sizes = [16, 128], strides = [1, 1]} : vector<16x226xf32> to vector<16x128xf32>
    %691 = vector.broadcast %689 : vector<1x128xf32> to vector<16x128xf32>
    %692 = arith.mulf %691, %690 : vector<16x128xf32>
    %693 = arith.addf %688, %692 : vector<16x128xf32>
    %694 = vector.extract_strided_slice %4 {offsets = [39, 0], sizes = [1, 128], strides = [1, 1]} : vector<63x128xf32> to vector<1x128xf32>
    %695 = vector.extract_strided_slice %498 {offsets = [0, 66], sizes = [16, 128], strides = [1, 1]} : vector<16x226xf32> to vector<16x128xf32>
    %696 = vector.broadcast %694 : vector<1x128xf32> to vector<16x128xf32>
    %697 = arith.mulf %696, %695 : vector<16x128xf32>
    %698 = arith.addf %693, %697 : vector<16x128xf32>
    %699 = vector.extract_strided_slice %4 {offsets = [40, 0], sizes = [1, 128], strides = [1, 1]} : vector<63x128xf32> to vector<1x128xf32>
    %700 = vector.extract_strided_slice %498 {offsets = [0, 82], sizes = [16, 128], strides = [1, 1]} : vector<16x226xf32> to vector<16x128xf32>
    %701 = vector.broadcast %699 : vector<1x128xf32> to vector<16x128xf32>
    %702 = arith.mulf %701, %700 : vector<16x128xf32>
    %703 = arith.addf %698, %702 : vector<16x128xf32>
    %704 = vector.extract_strided_slice %4 {offsets = [41, 0], sizes = [1, 128], strides = [1, 1]} : vector<63x128xf32> to vector<1x128xf32>
    %705 = vector.extract_strided_slice %498 {offsets = [0, 98], sizes = [16, 128], strides = [1, 1]} : vector<16x226xf32> to vector<16x128xf32>
    %706 = vector.broadcast %704 : vector<1x128xf32> to vector<16x128xf32>
    %707 = arith.mulf %706, %705 : vector<16x128xf32>
    %708 = arith.addf %703, %707 : vector<16x128xf32>
    %709 = vector.extract_strided_slice %4 {offsets = [42, 0], sizes = [1, 128], strides = [1, 1]} : vector<63x128xf32> to vector<1x128xf32>
    %710 = vector.extract_strided_slice %499 {offsets = [0, 0], sizes = [16, 128], strides = [1, 1]} : vector<16x226xf32> to vector<16x128xf32>
    %711 = vector.broadcast %709 : vector<1x128xf32> to vector<16x128xf32>
    %712 = arith.mulf %711, %710 : vector<16x128xf32>
    %713 = arith.addf %708, %712 : vector<16x128xf32>
    %714 = vector.extract_strided_slice %4 {offsets = [43, 0], sizes = [1, 128], strides = [1, 1]} : vector<63x128xf32> to vector<1x128xf32>
    %715 = vector.extract_strided_slice %499 {offsets = [0, 16], sizes = [16, 128], strides = [1, 1]} : vector<16x226xf32> to vector<16x128xf32>
    %716 = vector.broadcast %714 : vector<1x128xf32> to vector<16x128xf32>
    %717 = arith.mulf %716, %715 : vector<16x128xf32>
    %718 = arith.addf %713, %717 : vector<16x128xf32>
    %719 = vector.extract_strided_slice %4 {offsets = [44, 0], sizes = [1, 128], strides = [1, 1]} : vector<63x128xf32> to vector<1x128xf32>
    %720 = vector.extract_strided_slice %499 {offsets = [0, 32], sizes = [16, 128], strides = [1, 1]} : vector<16x226xf32> to vector<16x128xf32>
    %721 = vector.broadcast %719 : vector<1x128xf32> to vector<16x128xf32>
    %722 = arith.mulf %721, %720 : vector<16x128xf32>
    %723 = arith.addf %718, %722 : vector<16x128xf32>
    %724 = vector.extract_strided_slice %4 {offsets = [45, 0], sizes = [1, 128], strides = [1, 1]} : vector<63x128xf32> to vector<1x128xf32>
    %725 = vector.extract_strided_slice %499 {offsets = [0, 48], sizes = [16, 128], strides = [1, 1]} : vector<16x226xf32> to vector<16x128xf32>
    %726 = vector.broadcast %724 : vector<1x128xf32> to vector<16x128xf32>
    %727 = arith.mulf %726, %725 : vector<16x128xf32>
    %728 = arith.addf %723, %727 : vector<16x128xf32>
    %729 = vector.extract_strided_slice %4 {offsets = [46, 0], sizes = [1, 128], strides = [1, 1]} : vector<63x128xf32> to vector<1x128xf32>
    %730 = vector.extract_strided_slice %499 {offsets = [0, 64], sizes = [16, 128], strides = [1, 1]} : vector<16x226xf32> to vector<16x128xf32>
    %731 = vector.broadcast %729 : vector<1x128xf32> to vector<16x128xf32>
    %732 = arith.mulf %731, %730 : vector<16x128xf32>
    %733 = arith.addf %728, %732 : vector<16x128xf32>
    %734 = vector.extract_strided_slice %4 {offsets = [47, 0], sizes = [1, 128], strides = [1, 1]} : vector<63x128xf32> to vector<1x128xf32>
    %735 = vector.extract_strided_slice %499 {offsets = [0, 80], sizes = [16, 128], strides = [1, 1]} : vector<16x226xf32> to vector<16x128xf32>
    %736 = vector.broadcast %734 : vector<1x128xf32> to vector<16x128xf32>
    %737 = arith.mulf %736, %735 : vector<16x128xf32>
    %738 = arith.addf %733, %737 : vector<16x128xf32>
    %739 = vector.extract_strided_slice %4 {offsets = [48, 0], sizes = [1, 128], strides = [1, 1]} : vector<63x128xf32> to vector<1x128xf32>
    %740 = vector.extract_strided_slice %499 {offsets = [0, 96], sizes = [16, 128], strides = [1, 1]} : vector<16x226xf32> to vector<16x128xf32>
    %741 = vector.broadcast %739 : vector<1x128xf32> to vector<16x128xf32>
    %742 = arith.mulf %741, %740 : vector<16x128xf32>
    %743 = arith.addf %738, %742 : vector<16x128xf32>
    %744 = vector.extract_strided_slice %4 {offsets = [49, 0], sizes = [1, 128], strides = [1, 1]} : vector<63x128xf32> to vector<1x128xf32>
    %745 = vector.extract_strided_slice %499 {offsets = [0, 1], sizes = [16, 128], strides = [1, 1]} : vector<16x226xf32> to vector<16x128xf32>
    %746 = vector.broadcast %744 : vector<1x128xf32> to vector<16x128xf32>
    %747 = arith.mulf %746, %745 : vector<16x128xf32>
    %748 = arith.addf %743, %747 : vector<16x128xf32>
    %749 = vector.extract_strided_slice %4 {offsets = [50, 0], sizes = [1, 128], strides = [1, 1]} : vector<63x128xf32> to vector<1x128xf32>
    %750 = vector.extract_strided_slice %499 {offsets = [0, 17], sizes = [16, 128], strides = [1, 1]} : vector<16x226xf32> to vector<16x128xf32>
    %751 = vector.broadcast %749 : vector<1x128xf32> to vector<16x128xf32>
    %752 = arith.mulf %751, %750 : vector<16x128xf32>
    %753 = arith.addf %748, %752 : vector<16x128xf32>
    %754 = vector.extract_strided_slice %4 {offsets = [51, 0], sizes = [1, 128], strides = [1, 1]} : vector<63x128xf32> to vector<1x128xf32>
    %755 = vector.extract_strided_slice %499 {offsets = [0, 33], sizes = [16, 128], strides = [1, 1]} : vector<16x226xf32> to vector<16x128xf32>
    %756 = vector.broadcast %754 : vector<1x128xf32> to vector<16x128xf32>
    %757 = arith.mulf %756, %755 : vector<16x128xf32>
    %758 = arith.addf %753, %757 : vector<16x128xf32>
    %759 = vector.extract_strided_slice %4 {offsets = [52, 0], sizes = [1, 128], strides = [1, 1]} : vector<63x128xf32> to vector<1x128xf32>
    %760 = vector.extract_strided_slice %499 {offsets = [0, 49], sizes = [16, 128], strides = [1, 1]} : vector<16x226xf32> to vector<16x128xf32>
    %761 = vector.broadcast %759 : vector<1x128xf32> to vector<16x128xf32>
    %762 = arith.mulf %761, %760 : vector<16x128xf32>
    %763 = arith.addf %758, %762 : vector<16x128xf32>
    %764 = vector.extract_strided_slice %4 {offsets = [53, 0], sizes = [1, 128], strides = [1, 1]} : vector<63x128xf32> to vector<1x128xf32>
    %765 = vector.extract_strided_slice %499 {offsets = [0, 65], sizes = [16, 128], strides = [1, 1]} : vector<16x226xf32> to vector<16x128xf32>
    %766 = vector.broadcast %764 : vector<1x128xf32> to vector<16x128xf32>
    %767 = arith.mulf %766, %765 : vector<16x128xf32>
    %768 = arith.addf %763, %767 : vector<16x128xf32>
    %769 = vector.extract_strided_slice %4 {offsets = [54, 0], sizes = [1, 128], strides = [1, 1]} : vector<63x128xf32> to vector<1x128xf32>
    %770 = vector.extract_strided_slice %499 {offsets = [0, 81], sizes = [16, 128], strides = [1, 1]} : vector<16x226xf32> to vector<16x128xf32>
    %771 = vector.broadcast %769 : vector<1x128xf32> to vector<16x128xf32>
    %772 = arith.mulf %771, %770 : vector<16x128xf32>
    %773 = arith.addf %768, %772 : vector<16x128xf32>
    %774 = vector.extract_strided_slice %4 {offsets = [55, 0], sizes = [1, 128], strides = [1, 1]} : vector<63x128xf32> to vector<1x128xf32>
    %775 = vector.extract_strided_slice %499 {offsets = [0, 97], sizes = [16, 128], strides = [1, 1]} : vector<16x226xf32> to vector<16x128xf32>
    %776 = vector.broadcast %774 : vector<1x128xf32> to vector<16x128xf32>
    %777 = arith.mulf %776, %775 : vector<16x128xf32>
    %778 = arith.addf %773, %777 : vector<16x128xf32>
    %779 = vector.extract_strided_slice %4 {offsets = [56, 0], sizes = [1, 128], strides = [1, 1]} : vector<63x128xf32> to vector<1x128xf32>
    %780 = vector.extract_strided_slice %499 {offsets = [0, 2], sizes = [16, 128], strides = [1, 1]} : vector<16x226xf32> to vector<16x128xf32>
    %781 = vector.broadcast %779 : vector<1x128xf32> to vector<16x128xf32>
    %782 = arith.mulf %781, %780 : vector<16x128xf32>
    %783 = arith.addf %778, %782 : vector<16x128xf32>
    %784 = vector.extract_strided_slice %4 {offsets = [57, 0], sizes = [1, 128], strides = [1, 1]} : vector<63x128xf32> to vector<1x128xf32>
    %785 = vector.extract_strided_slice %499 {offsets = [0, 18], sizes = [16, 128], strides = [1, 1]} : vector<16x226xf32> to vector<16x128xf32>
    %786 = vector.broadcast %784 : vector<1x128xf32> to vector<16x128xf32>
    %787 = arith.mulf %786, %785 : vector<16x128xf32>
    %788 = arith.addf %783, %787 : vector<16x128xf32>
    %789 = vector.extract_strided_slice %4 {offsets = [58, 0], sizes = [1, 128], strides = [1, 1]} : vector<63x128xf32> to vector<1x128xf32>
    %790 = vector.extract_strided_slice %499 {offsets = [0, 34], sizes = [16, 128], strides = [1, 1]} : vector<16x226xf32> to vector<16x128xf32>
    %791 = vector.broadcast %789 : vector<1x128xf32> to vector<16x128xf32>
    %792 = arith.mulf %791, %790 : vector<16x128xf32>
    %793 = arith.addf %788, %792 : vector<16x128xf32>
    %794 = vector.extract_strided_slice %4 {offsets = [59, 0], sizes = [1, 128], strides = [1, 1]} : vector<63x128xf32> to vector<1x128xf32>
    %795 = vector.extract_strided_slice %499 {offsets = [0, 50], sizes = [16, 128], strides = [1, 1]} : vector<16x226xf32> to vector<16x128xf32>
    %796 = vector.broadcast %794 : vector<1x128xf32> to vector<16x128xf32>
    %797 = arith.mulf %796, %795 : vector<16x128xf32>
    %798 = arith.addf %793, %797 : vector<16x128xf32>
    %799 = vector.extract_strided_slice %4 {offsets = [60, 0], sizes = [1, 128], strides = [1, 1]} : vector<63x128xf32> to vector<1x128xf32>
    %800 = vector.extract_strided_slice %499 {offsets = [0, 66], sizes = [16, 128], strides = [1, 1]} : vector<16x226xf32> to vector<16x128xf32>
    %801 = vector.broadcast %799 : vector<1x128xf32> to vector<16x128xf32>
    %802 = arith.mulf %801, %800 : vector<16x128xf32>
    %803 = arith.addf %798, %802 : vector<16x128xf32>
    %804 = vector.extract_strided_slice %4 {offsets = [61, 0], sizes = [1, 128], strides = [1, 1]} : vector<63x128xf32> to vector<1x128xf32>
    %805 = vector.extract_strided_slice %499 {offsets = [0, 82], sizes = [16, 128], strides = [1, 1]} : vector<16x226xf32> to vector<16x128xf32>
    %806 = vector.broadcast %804 : vector<1x128xf32> to vector<16x128xf32>
    %807 = arith.mulf %806, %805 : vector<16x128xf32>
    %808 = arith.addf %803, %807 : vector<16x128xf32>
    %809 = vector.extract_strided_slice %4 {offsets = [62, 0], sizes = [1, 128], strides = [1, 1]} : vector<63x128xf32> to vector<1x128xf32>
    %810 = vector.extract_strided_slice %499 {offsets = [0, 98], sizes = [16, 128], strides = [1, 1]} : vector<16x226xf32> to vector<16x128xf32>
    %811 = vector.broadcast %809 : vector<1x128xf32> to vector<16x128xf32>
    %812 = arith.mulf %811, %810 : vector<16x128xf32>
    %813 = arith.addf %808, %812 : vector<16x128xf32>
    %c0_i32_49 = arith.constant 0 : i32
    %814 = vector.broadcast %c0_i32_49 : i32 to vector<1x128xi32>
    %815 = arith.cmpi sge, %0, %814 : vector<1x128xi32>
    %c64_i32_50 = arith.constant 64 : i32
    %816 = vector.broadcast %c64_i32_50 : i32 to vector<1x128xi32>
    %817 = arith.cmpi slt, %0, %816 : vector<1x128xi32>
    %818 = arith.andi %815, %817 : vector<1x128xi1>
    %819 = arith.extui %818 : vector<1x128xi1> to vector<1x128xi32>
    %820 = arith.sitofp %819 : vector<1x128xi32> to vector<1x128xf32>
    %cst_51 = arith.constant 3.000000e+38 : f32
    %821 = vector.shape_cast %818 : vector<1x128xi1> to vector<1x128xi1>
    %822 = vector.broadcast %821 : vector<1x128xi1> to vector<16x128xi1>
    %823 = vector.broadcast %cst_51 : f32 to vector<16x128xf32>
    %824 = arith.select %822, %813, %823 : vector<16x128xi1>, vector<16x128xf32>
    %825 = vector.shape_cast %824 : vector<16x128xf32> to vector<1x16x128xf32>
    %cst_52 = arith.constant dense<0x7F800000> : vector<1xf32>
    %826 = vector.multi_reduction <minimumf>, %825, %cst_52 [1, 2] : vector<1x16x128xf32> to vector<1xf32>
    %827 = vector.shape_cast %826 : vector<1xf32> to vector<1x1x1xf32>
    %828 = vector.extract %827[0, 0, 0] : f32 from vector<1x1x1xf32>
    %cst_53 = arith.constant 0.000000e+00 : f32
    %cst_54 = arith.constant 3.000000e+38 : f32
    %829 = arith.subf %cst_53, %cst_54 : f32
    %830 = vector.shape_cast %818 : vector<1x128xi1> to vector<1x128xi1>
    %831 = vector.broadcast %830 : vector<1x128xi1> to vector<16x128xi1>
    %832 = vector.broadcast %829 : f32 to vector<16x128xf32>
    %833 = arith.select %831, %813, %832 : vector<16x128xi1>, vector<16x128xf32>
    %834 = vector.shape_cast %833 : vector<16x128xf32> to vector<1x16x128xf32>
    %cst_55 = arith.constant dense<0xFF800000> : vector<1xf32>
    %835 = vector.multi_reduction <maximumf>, %834, %cst_55 [1, 2] : vector<1x16x128xf32> to vector<1xf32>
    %836 = vector.shape_cast %835 : vector<1xf32> to vector<1x1x1xf32>
    %837 = vector.extract %836[0, 0, 0] : f32 from vector<1x1x1xf32>
    %838 = arith.subf %837, %828 : f32
    %cst_56 = arith.constant 2.550000e+02 : f32
    %839 = arith.divf %838, %cst_56 : f32
    %cst_57 = arith.constant 9.99999993E-9 : f32
    %840 = arith.maximumf %839, %cst_57 : f32
    %cst_58 = arith.constant 1.000000e+00 : f32
    %841 = arith.divf %cst_58, %840 : f32
    %842 = vector.broadcast %828 : f32 to vector<1x128xf32>
    %843 = arith.mulf %820, %842 : vector<1x128xf32>
    %844 = vector.broadcast %841 : f32 to vector<1x128xf32>
    %845 = arith.mulf %820, %844 : vector<1x128xf32>
    %846 = vector.broadcast %840 : f32 to vector<1x128xf32>
    %847 = arith.mulf %820, %846 : vector<1x128xf32>
    %c64_i32_59 = arith.constant 64 : i32
    %848 = vector.broadcast %c64_i32_59 : i32 to vector<1x128xi32>
    %849 = arith.cmpi sge, %0, %848 : vector<1x128xi32>
    %c128_i32_60 = arith.constant 128 : i32
    %850 = vector.broadcast %c128_i32_60 : i32 to vector<1x128xi32>
    %851 = arith.cmpi slt, %0, %850 : vector<1x128xi32>
    %852 = arith.andi %849, %851 : vector<1x128xi1>
    %853 = arith.extui %852 : vector<1x128xi1> to vector<1x128xi32>
    %854 = arith.sitofp %853 : vector<1x128xi32> to vector<1x128xf32>
    %cst_61 = arith.constant 3.000000e+38 : f32
    %855 = vector.shape_cast %852 : vector<1x128xi1> to vector<1x128xi1>
    %856 = vector.broadcast %855 : vector<1x128xi1> to vector<16x128xi1>
    %857 = vector.broadcast %cst_61 : f32 to vector<16x128xf32>
    %858 = arith.select %856, %813, %857 : vector<16x128xi1>, vector<16x128xf32>
    %859 = vector.shape_cast %858 : vector<16x128xf32> to vector<1x16x128xf32>
    %cst_62 = arith.constant dense<0x7F800000> : vector<1xf32>
    %860 = vector.multi_reduction <minimumf>, %859, %cst_62 [1, 2] : vector<1x16x128xf32> to vector<1xf32>
    %861 = vector.shape_cast %860 : vector<1xf32> to vector<1x1x1xf32>
    %862 = vector.extract %861[0, 0, 0] : f32 from vector<1x1x1xf32>
    %cst_63 = arith.constant 0.000000e+00 : f32
    %cst_64 = arith.constant 3.000000e+38 : f32
    %863 = arith.subf %cst_63, %cst_64 : f32
    %864 = vector.shape_cast %852 : vector<1x128xi1> to vector<1x128xi1>
    %865 = vector.broadcast %864 : vector<1x128xi1> to vector<16x128xi1>
    %866 = vector.broadcast %863 : f32 to vector<16x128xf32>
    %867 = arith.select %865, %813, %866 : vector<16x128xi1>, vector<16x128xf32>
    %868 = vector.shape_cast %867 : vector<16x128xf32> to vector<1x16x128xf32>
    %cst_65 = arith.constant dense<0xFF800000> : vector<1xf32>
    %869 = vector.multi_reduction <maximumf>, %868, %cst_65 [1, 2] : vector<1x16x128xf32> to vector<1xf32>
    %870 = vector.shape_cast %869 : vector<1xf32> to vector<1x1x1xf32>
    %871 = vector.extract %870[0, 0, 0] : f32 from vector<1x1x1xf32>
    %872 = arith.subf %871, %862 : f32
    %cst_66 = arith.constant 2.550000e+02 : f32
    %873 = arith.divf %872, %cst_66 : f32
    %cst_67 = arith.constant 9.99999993E-9 : f32
    %874 = arith.maximumf %873, %cst_67 : f32
    %cst_68 = arith.constant 1.000000e+00 : f32
    %875 = arith.divf %cst_68, %874 : f32
    %876 = vector.broadcast %862 : f32 to vector<1x128xf32>
    %877 = arith.mulf %854, %876 : vector<1x128xf32>
    %878 = arith.addf %843, %877 : vector<1x128xf32>
    %879 = vector.broadcast %875 : f32 to vector<1x128xf32>
    %880 = arith.mulf %854, %879 : vector<1x128xf32>
    %881 = arith.addf %845, %880 : vector<1x128xf32>
    %882 = vector.broadcast %874 : f32 to vector<1x128xf32>
    %883 = arith.mulf %854, %882 : vector<1x128xf32>
    %884 = arith.addf %847, %883 : vector<1x128xf32>
    %885 = vector.broadcast %878 : vector<1x128xf32> to vector<16x128xf32>
    %886 = arith.subf %813, %885 : vector<16x128xf32>
    %887 = vector.broadcast %881 : vector<1x128xf32> to vector<16x128xf32>
    %888 = arith.mulf %886, %887 : vector<16x128xf32>
    %889 = math.roundeven %888 : vector<16x128xf32>
    %cst_69 = arith.constant 0.000000e+00 : f32
    %cst_70 = arith.constant 2.550000e+02 : f32
    %890 = vector.broadcast %cst_69 : f32 to vector<16x128xf32>
    %891 = arith.maximumf %890, %889 : vector<16x128xf32>
    %892 = vector.broadcast %cst_70 : f32 to vector<16x128xf32>
    %893 = arith.minimumf %892, %891 : vector<16x128xf32>
    %894 = vector.broadcast %884 : vector<1x128xf32> to vector<16x128xf32>
    %895 = arith.mulf %893, %894 : vector<16x128xf32>
    %896 = vector.broadcast %878 : vector<1x128xf32> to vector<16x128xf32>
    %897 = arith.addf %895, %896 : vector<16x128xf32>
    %898 = arith.addf %897, %89 : vector<16x128xf32>
    %c0_71 = arith.constant 0 : index
    %c0_72 = arith.constant 0 : index
    %c0_73 = arith.constant 0 : index
    %899 = vector.load %arg4[%c0_71, %c0_72, %c0_73] : memref<1x16x128xf32, #tpu.memory_space<vmem>>, vector<1x16x128xf32>
    %900 = vector.shape_cast %899 : vector<1x16x128xf32> to vector<16x128xf32>
    %901 = vector.shape_cast %898 : vector<16x128xf32> to vector<1x16x128xf32>
    tpu.vector_store %arg4[%c0_71, %c0_72, %c0_73], %901 {strides = array<i32>} : memref<1x16x128xf32, #tpu.memory_space<vmem>>, vector<1x16x128xf32>,
    return
  }
  func.func @transform_0(%arg0: i32) -> (i32, i32, i32) {
    %c0_i32 = arith.constant 0 : i32
    %c0_i32_0 = arith.constant 0 : i32
    %c0_i32_1 = arith.constant 0 : i32
    return %arg0, %c0_i32, %c0_i32_0 : i32, i32, i32
  }
  func.func @transform_1(%arg0: i32) -> (i32, i32) {
    %c0_i32 = arith.constant 0 : i32
    %c0_i32_0 = arith.constant 0 : i32
    %c0_i32_1 = arith.constant 0 : i32
    return %c0_i32, %c0_i32_0 : i32, i32
  }
  func.func @transform_2(%arg0: i32) -> (i32, i32) {
    %c0_i32 = arith.constant 0 : i32
    %c0_i32_0 = arith.constant 0 : i32
    %c0_i32_1 = arith.constant 0 : i32
    return %c0_i32, %c0_i32_0 : i32, i32
  }
  func.func @transform_3(%arg0: i32) -> (i32, i32, i32) {
    %c0_i32 = arith.constant 0 : i32
    %c0_i32_0 = arith.constant 0 : i32
    %c0_i32_1 = arith.constant 0 : i32
    return %arg0, %c0_i32, %c0_i32_0 : i32, i32, i32
  }
}

</mosaic_0001>

<bundles_post_ra>
// kernel: tpu_custom_call.1
= control target key start
LH: loop header
LB: loop body
LE: loop exit
PB: predicated region body
PF: predicated region fallthrough
CT: control target
= control target key end

     0   :  { %8 = vsyncpa [#allocation3], 0  ;;  %s6401_s0 = inlined_call_operand.vmem [shape: f32[1,18,226], index: 0, kind: input, shape index: {}]   ;;  %s6402_s1 = inlined_call_operand.vmem [shape: f32[63,128], index: 1, kind: input, shape index: {}]   ;;  %s6403_s2 = inlined_call_operand.hbm [shape: f32[63,128], index: 2, kind: input, shape index: {}]   ;;  %s6404_s3 = inlined_call_operand.hbm [shape: f32[1,16,128], index: 3, kind: output, shape index: {}]  }
   0x1   :  { %9 = vsyncpa [#allocation4], 0  ;;  %s3238_s12 = smov [#allocation2]  }
   0x2   :  { %s19_s13 = sshll.u32 %s3238_s12, 4  ;;  %s20_s13 = int_to_ptr.vmem [resolvable:$true] %s19_s13 }
   0x3   :  { %s3202_s14 = scalar_lea.vmem %s20_s13, 1024  ;;  %p3207_p1 = scmp.lt.s32.totalorder %s20_s13, %s20_s13 }
   0x4   :  { %p3203_p0 = scmp.ne.s32.totalorder %s20_s13, %s3202_s14  ;;  %p3208_p2 = scmp.lt.s32.totalorder %s3202_s14, %s3202_s14 }
   0x6   :  { %p3209_p3 = por %p3208_p2, %p3207_p1 }
   0x8   :  { %p3210_p4 = pnand %p3209_p3, %p3203_p0 }
   0xa   :  { %3213 = shalt.err (!%p3210_p4)
}
   0xb   :  { %s6409_s15 = smov 128   ;;  %s6410_s16 = smov 8  }
   0xc   :  { %25 = dma.hbm_to_vmem [thread:$0]  %s6403_s2, 1024, %s20_s13, [#allocation3], %s6409_s15, %s6409_s15, %s6410_s16  }
   0xd   :  { %3234 = dma.done.wait [#allocation3], 1024  }
   0xe   :  { %3235 = vsyncadd [#allocation3], 4294966272  ;;  %v3294_v0 = vld [vmem:[%s6401_s0 + $0x8] sm:$0xff]  ;;  %v3299_v1 = vld [vmem:[%s6401_s0] sm:$0xff]  ;;  %vm6432_vm0 = vcmask 1046528   ;;  %s3241_s25 = smov 112   ;;  %v6405_v17 = vlaneseq }
   0xf   :  { %v3304_v2 = vld [vmem:[%s6401_s0 + $0x10] sm:$0xff]  ;;  %240 = vrot.lane.b32.xlu1 %v3294_v0, %s3241_s25  ;;  %v66_v3 = vrot.slane %v3299_v1, 1  ;;  %v3313_v5 = vld [vmem:[%s6401_s0 + $0x20] sm:$0x3]  ;;  %v3318_v6 = vld [vmem:[%s6401_s0 + $0x18] sm:$0xff]  ;;  %v69_v7 = vrot.slane %v3294_v0, 1 }
  0x10   :  { %v67_v4 = vrot.slane %v3304_v2, 1  ;;  %v72_v8 = vrot.slane %v3313_v5, 1  ;;  %v70_v9 = vrot.slane %v3318_v6, 1  ;;  %v3326_v10 = vld [vmem:[%s6401_s0 + $0x28] sm:$0x3]  ;;  %s3242_s4 = smov 79  }
  0x11   :  { %v74_v12 = vrot.slane %v3326_v10, 1  ;;  %s3243_s5 = smov 96   ;;  %s3244_s6 = smov 80   ;;  %v3420_v18 = vand.u32 127, %v6405_v17  ;;  %vm6425_vm1 = vcmask 646144   ;;  %vm6426_vm4 = vcmask 1045504  }
  0x12   :  { %v3329_v11 = vsel %vm6432_vm0, %v66_v3, %v67_v4  ;;  %v3335_v13 = vsel %vm6432_vm0, %v67_v4, %v72_v8  ;;  %v3340_v14 = vsel %vm6432_vm0, %v69_v7, %v70_v9  ;;  %s3245_s7 = smov 64   ;;  %s3246_s8 = smov 48   ;;  %vm246_vm5 = vcmask 916480  }
  0x13   :  { %76 = vrot.lane.b32.xlu0 %v3329_v11, %s3242_s4  ;;  %80 = vrot.lane.b32.xlu1 %v3335_v13, %s3242_s4  ;;  %v3343_v15 = vsel %vm6432_vm0, %v70_v9, %v74_v12  ;;  %s3247_s9 = smov 32   ;;  %s3248_s10 = smov 127   ;;  %6446 = vst [vmem:[#allocation8_spill] sm:$0xff] %v3420_v18  ;;  %vm6424_vm2 = vcmp.lt.s32.totalorder %v3420_v18, 64  ;;  %vm6423_vm3 = vcmp.ge.s32.totalorder %v3420_v18, 64  ;;  %vm267_vm6 = vcmask 785408  }
  0x14   :  { %s3249_s11 = smov 111   ;;  %s3250_s12 = smov 95   ;;  %vm288_vm7 = vcmask 654336   ;;  %vm309_vm8 = vcmask 523264   ;;  %vm330_vm9 = vcmask 392192   ;;  %vm351_vm10 = vcmask 261120  }
  0x15   :  { %s3251_s13 = smov 63   ;;  %s3252_s14 = smov 47   ;;  %vm372_vm11 = vcmask 1039360   ;;  %vm6435_vm12 = vcmask 908288   ;;  %vm6433_vm13 = vcmask 777216   ;;  %vm6434_vm14 = vcmask 515072  }
  0x16   :  { %s3253_s17 = smov 31   ;;  %s3254_s18 = smov 126   ;;  %vm6427_vm15 = vcmask 384000  }
  0x17   :  { %78 = vrot.lane.b32.xlu0 %v3340_v14, %s3242_s4  ;;  %82 = vrot.lane.b32.xlu1 %v3343_v15, %s3242_s4  ;;  %s3255_s19 = smov 110   ;;  %s3256_s20 = smov 94  }
  0x18   :  { %s3257_s21 = smov 78   ;;  %s3258_s22 = smov 62  }
  0x19   :  { %s3259_s23 = smov 46   ;;  %s6411_s24 = smov 30  }
  0x1a   :  { %s3261_s29 = smov 1e-08  }
  0x1b   :  { %238 = vrot.lane.b32.xlu0 %v3299_v1, %s3241_s25  ;;  %242 = vrot.lane.b32.xlu1 %v3304_v2, %s3241_s25 }
  0x1f   :  { %244 = vrot.lane.b32.xlu0 %v3318_v6, %s3241_s25  ;;  %259 = vrot.lane.b32.xlu1 %v3299_v1, %s3243_s5 }
  0x23   :  { %261 = vrot.lane.b32.xlu0 %v3294_v0, %s3243_s5  ;;  %263 = vrot.lane.b32.xlu1 %v3304_v2, %s3243_s5 }
  0x27   :  { %265 = vrot.lane.b32.xlu0 %v3318_v6, %s3243_s5  ;;  %280 = vrot.lane.b32.xlu1 %v3299_v1, %s3244_s6 }
  0x2b   :  { %282 = vrot.lane.b32.xlu0 %v3294_v0, %s3244_s6  ;;  %284 = vrot.lane.b32.xlu1 %v3304_v2, %s3244_s6 }
  0x2f   :  { %286 = vrot.lane.b32.xlu0 %v3318_v6, %s3244_s6  ;;  %301 = vrot.lane.b32.xlu1 %v3299_v1, %s3245_s7 }
  0x33   :  { %303 = vrot.lane.b32.xlu0 %v3294_v0, %s3245_s7  ;;  %305 = vrot.lane.b32.xlu1 %v3304_v2, %s3245_s7 }
  0x37   :  { %307 = vrot.lane.b32.xlu0 %v3318_v6, %s3245_s7  ;;  %322 = vrot.lane.b32.xlu1 %v3299_v1, %s3246_s8 }
  0x3b   :  { %324 = vrot.lane.b32.xlu0 %v3294_v0, %s3246_s8  ;;  %326 = vrot.lane.b32.xlu1 %v3304_v2, %s3246_s8 }
  0x3f   :  { %328 = vrot.lane.b32.xlu0 %v3318_v6, %s3246_s8  ;;  %343 = vrot.lane.b32.xlu1 %v3299_v1, %s3247_s9 }
  0x43   :  { %345 = vrot.lane.b32.xlu0 %v3294_v0, %s3247_s9  ;;  %347 = vrot.lane.b32.xlu1 %v3304_v2, %s3247_s9 }
  0x47   :  { %349 = vrot.lane.b32.xlu0 %v3318_v6, %s3247_s9  ;;  %364 = vrot.lane.b32.xlu1 %v3299_v1, %s3248_s10 }
  0x4b   :  { %366 = vrot.lane.b32.xlu0 %v3294_v0, %s3248_s10  ;;  %368 = vrot.lane.b32.xlu1 %v3304_v2, %s3248_s10 }
  0x4f   :  { %370 = vrot.lane.b32.xlu0 %v3318_v6, %s3248_s10  ;;  %385 = vrot.lane.b32.xlu1 %v3299_v1, %s3249_s11 }
  0x53   :  { %387 = vrot.lane.b32.xlu0 %v3294_v0, %s3249_s11  ;;  %389 = vrot.lane.b32.xlu1 %v3304_v2, %s3249_s11 }
  0x57   :  { %391 = vrot.lane.b32.xlu0 %v3318_v6, %s3249_s11  ;;  %406 = vrot.lane.b32.xlu1 %v3299_v1, %s3250_s12 }
  0x5b   :  { %408 = vrot.lane.b32.xlu0 %v3294_v0, %s3250_s12  ;;  %410 = vrot.lane.b32.xlu1 %v3304_v2, %s3250_s12 }
  0x81   :  { %v3417_v16 = vpop.permute.xlu1 %240 }
  0x85   :  { %v77_v19 = vpop.permute.xlu0 %76  ;;  %v81_v20 = vpop.permute.xlu1 %80 }
  0x89   :  { %v79_v21 = vpop.permute.xlu0 %78  ;;  %v83_v23 = vpop.permute.xlu1 %82 }
  0x8a   :  { %v3424_v22 = vsel %vm6425_vm1, %v77_v19, %v79_v21  ;;  %v3427_v24 = vsel %vm6425_vm1, %v81_v20, %v83_v23 }
  0x8b   :  { %6447 = vst [vmem:[#allocation9_spill] sm:$0xff] %v3424_v22  ;;  %6448 = vst [vmem:[#allocation10_spill] sm:$0xff] %v3427_v24  ;;  %v101_v25 = vsel %vm6424_vm2, %v3424_v22, -3e+38  ;;  %v89_v26 = vsel %vm6424_vm2, %v3424_v22, 3e+38 }
  0x8c   :  { %v102_v27 = vsel %vm6424_vm2, %v3427_v24, -3e+38  ;;  %v90_v28 = vsel %vm6424_vm2, %v3427_v24, 3e+38  ;;  %v133_v31 = vsel %vm6423_vm3, %v3424_v22, 3e+38 }
  0x8d   :  { %v103_v29 = vmax.f32 %v101_v25, %v102_v27  ;;  %v91_v30 = vmin.f32 %v89_v26, %v90_v28  ;;  %v134_v32 = vsel %vm6423_vm3, %v3427_v24, 3e+38  ;;  %v145_v34 = vsel %vm6423_vm3, %v3424_v22, -3e+38  ;;  %v3468_v37 = vpop.permute.xlu0 %238  ;;  %v3474_v38 = vpop.permute.xlu1 %242 }
  0x8e   :  { %v135_v33 = vmin.f32 %v133_v31, %v134_v32  ;;  %v146_v35 = vsel %vm6423_vm3, %v3427_v24, -3e+38 }
  0x8f   :  { %104 = vmax.xlane.f32.xlu1 %v103_v29  ;;  %92 = vmin.xlane.f32.xlu0 %v91_v30  ;;  %v147_v36 = vmax.f32 %v145_v34, %v146_v35 }
  0x91   :  { %v3480_v39 = vpop.permute.xlu0 %244  ;;  %v3482_v40 = vpop.permute.xlu1 %259 }
  0x93   :  { %136 = vmin.xlane.f32.xlu0 %v135_v33 }
  0x95   :  { %v3488_v41 = vpop.permute.xlu0 %261  ;;  %v3494_v42 = vpop.permute.xlu1 %263 }
  0x97   :  { %148 = vmax.xlane.f32.xlu0 %v147_v36 }
  0x99   :  { %v3500_v43 = vpop.permute.xlu0 %265  ;;  %v3502_v44 = vpop.permute.xlu1 %280 }
  0x9d   :  { %v3508_v45 = vpop.permute.xlu0 %282  ;;  %v3514_v46 = vpop.permute.xlu1 %284 }
  0xa0   :  { %427 = vrot.lane.b32.xlu1 %v3299_v1, %s3242_s4 }
  0xa1   :  { %v3520_v47 = vpop.permute.xlu0 %286  ;;  %v3522_v48 = vpop.permute.xlu1 %301 }
  0xa4   :  { %431 = vrot.lane.b32.xlu1 %v3304_v2, %s3242_s4 }
  0xa5   :  { %v3528_v49 = vpop.permute.xlu0 %303  ;;  %v3534_v50 = vpop.permute.xlu1 %305 }
  0xa8   :  { %447 = vrot.lane.b32.xlu1 %v3299_v1, %s3251_s13 }
  0xa9   :  { %v3540_v51 = vpop.permute.xlu0 %307  ;;  %v3542_v52 = vpop.permute.xlu1 %322 }
  0xac   :  { %451 = vrot.lane.b32.xlu1 %v3304_v2, %s3251_s13 }
  0xad   :  { %412 = vrot.lane.b32.xlu0 %v3318_v6, %s3250_s12  ;;  %v3548_v53 = vpop.permute.xlu0 %324  ;;  %v3554_v54 = vpop.permute.xlu1 %326 }
  0xb0   :  { %468 = vrot.lane.b32.xlu1 %v3299_v1, %s3252_s14 }
  0xb1   :  { %429 = vrot.lane.b32.xlu0 %v3294_v0, %s3242_s4  ;;  %v3560_v55 = vpop.permute.xlu0 %328  ;;  %v3562_v56 = vpop.permute.xlu1 %343 }
  0xb4   :  { %472 = vrot.lane.b32.xlu1 %v3304_v2, %s3252_s14 }
  0xb5   :  { %433 = vrot.lane.b32.xlu0 %v3318_v6, %s3242_s4  ;;  %v3568_v57 = vpop.permute.xlu0 %345  ;;  %v3574_v58 = vpop.permute.xlu1 %347 }
  0xb8   :  { %489 = vrot.lane.b32.xlu1 %v3299_v1, %s3253_s17 }
  0xb9   :  { %449 = vrot.lane.b32.xlu0 %v3294_v0, %s3251_s13  ;;  %v3580_v59 = vpop.permute.xlu0 %349  ;;  %v3582_v60 = vpop.permute.xlu1 %364 }
  0xbc   :  { %493 = vrot.lane.b32.xlu1 %v3304_v2, %s3253_s17 }
  0xbd   :  { %453 = vrot.lane.b32.xlu0 %v3318_v6, %s3251_s13  ;;  %v3588_v61 = vpop.permute.xlu0 %366  ;;  %v3594_v62 = vpop.permute.xlu1 %368 }
  0xc0   :  { %510 = vrot.lane.b32.xlu1 %v3299_v1, %s3254_s18 }
  0xc1   :  { %470 = vrot.lane.b32.xlu0 %v3294_v0, %s3252_s14  ;;  %v3600_v63 = vpop.permute.xlu0 %370  ;;  %v3602_v3 = vpop.permute.xlu1 %385 }
  0xc4   :  { %514 = vrot.lane.b32.xlu1 %v3304_v2, %s3254_s18 }
  0xc5   :  { %474 = vrot.lane.b32.xlu0 %v3318_v6, %s3252_s14  ;;  %v3608_v4 = vpop.permute.xlu0 %387  ;;  %v3614_v7 = vpop.permute.xlu1 %389 }
  0xc8   :  { %531 = vrot.lane.b32.xlu1 %v3299_v1, %s3255_s19 }
  0xc9   :  { %491 = vrot.lane.b32.xlu0 %v3294_v0, %s3253_s17  ;;  %v3620_v8 = vpop.permute.xlu0 %391  ;;  %v3622_v9 = vpop.permute.xlu1 %406 }
  0xcc   :  { %535 = vrot.lane.b32.xlu1 %v3304_v2, %s3255_s19 }
  0xcd   :  { %495 = vrot.lane.b32.xlu0 %v3318_v6, %s3253_s17  ;;  %v3628_v12 = vpop.permute.xlu0 %408  ;;  %v3630_v19 = vpop.permute.xlu1 %410 }
  0xd0   :  { %552 = vrot.lane.b32.xlu1 %v3299_v1, %s3256_s20 }
  0xd1   :  { %512 = vrot.lane.b32.xlu0 %v3294_v0, %s3254_s18 }
  0xd4   :  { %556 = vrot.lane.b32.xlu1 %v3304_v2, %s3256_s20 }
  0xd5   :  { %516 = vrot.lane.b32.xlu0 %v3318_v6, %s3254_s18 }
  0xd8   :  { %573 = vrot.lane.b32.xlu1 %v3299_v1, %s3257_s21 }
  0xd9   :  { %533 = vrot.lane.b32.xlu0 %v3294_v0, %s3255_s19 }
  0xdc   :  { %577 = vrot.lane.b32.xlu1 %v3304_v2, %s3257_s21 }
  0xdd   :  { %537 = vrot.lane.b32.xlu0 %v3318_v6, %s3255_s19 }
  0xe0   :  { %594 = vrot.lane.b32.xlu1 %v3299_v1, %s3258_s22 }
  0xe1   :  { %554 = vrot.lane.b32.xlu0 %v3294_v0, %s3256_s20 }
  0xe4   :  { %598 = vrot.lane.b32.xlu1 %v3304_v2, %s3258_s22 }
  0xe5   :  { %558 = vrot.lane.b32.xlu0 %v3318_v6, %s3256_s20 }
  0xe8   :  { %615 = vrot.lane.b32.xlu1 %v3299_v1, %s3259_s23 }
  0xe9   :  { %575 = vrot.lane.b32.xlu0 %v3294_v0, %s3257_s21 }
  0xec   :  { %619 = vrot.lane.b32.xlu1 %v3304_v2, %s3259_s23 }
  0xed   :  { %579 = vrot.lane.b32.xlu0 %v3318_v6, %s3257_s21 }
  0xf0   :  { %636 = vrot.lane.b32.xlu1 %v3299_v1, %s6411_s24 }
  0xf1   :  { %596 = vrot.lane.b32.xlu0 %v3294_v0, %s3258_s22 }
  0xf4   :  { %640 = vrot.lane.b32.xlu1 %v3304_v2, %s6411_s24 }
  0xf5   :  { %600 = vrot.lane.b32.xlu0 %v3318_v6, %s3258_s22 }
  0xf8   :  { %676 = vrot.lane.b32.xlu1 %v3329_v11, %s3241_s25 }
  0xf9   :  { %617 = vrot.lane.b32.xlu0 %v3294_v0, %s3259_s23 }
  0xfc   :  { %680 = vrot.lane.b32.xlu1 %v3335_v13, %s3241_s25 }
  0xfd   :  { %621 = vrot.lane.b32.xlu0 %v3318_v6, %s3259_s23 }
 0x100   :  { %696 = vrot.lane.b32.xlu1 %v3329_v11, %s3243_s5 }
 0x101   :  { %638 = vrot.lane.b32.xlu0 %v3294_v0, %s6411_s24 }
 0x104   :  { %700 = vrot.lane.b32.xlu1 %v3335_v13, %s3243_s5 }
 0x105   :  { %642 = vrot.lane.b32.xlu0 %v3318_v6, %s6411_s24 }
 0x108   :  { %716 = vrot.lane.b32.xlu1 %v3329_v11, %s3244_s6 }
 0x109   :  { %678 = vrot.lane.b32.xlu0 %v3340_v14, %s3241_s25 }
 0x10c   :  { %720 = vrot.lane.b32.xlu1 %v3335_v13, %s3244_s6 }
 0x10d   :  { %682 = vrot.lane.b32.xlu0 %v3343_v15, %s3241_s25 }
 0x110   :  { %736 = vrot.lane.b32.xlu1 %v3329_v11, %s3245_s7 }
 0x111   :  { %698 = vrot.lane.b32.xlu0 %v3340_v14, %s3243_s5 }
 0x114   :  { %740 = vrot.lane.b32.xlu1 %v3335_v13, %s3245_s7 }
 0x115   :  { %702 = vrot.lane.b32.xlu0 %v3343_v15, %s3243_s5 }
 0x118   :  { %756 = vrot.lane.b32.xlu1 %v3329_v11, %s3246_s8  ;;  %v105_v20 = vpop.xlane.xlu1 %104  ;;  %v93_v21 = vpop.xlane.xlu0 %92 }
 0x119   :  { %v106_v23 = vrot.slane %v105_v20, 4  ;;  %v94_v25 = vrot.slane %v93_v21, 4  ;;  %718 = vrot.lane.b32.xlu0 %v3340_v14, %s3244_s6 }
 0x11b   :  { %v107_v26 = vmax.f32 %v105_v20, %v106_v23  ;;  %v95_v27 = vmin.f32 %v93_v21, %v94_v25 }
 0x11c   :  { %760 = vrot.lane.b32.xlu1 %v3335_v13, %s3246_s8  ;;  %v3642_v28 = vpop.permute.xlu1 %427  ;;  %v3644_v29 = vpop.xlane.xlu0 %136 }
 0x11d   :  { %722 = vrot.lane.b32.xlu0 %v3343_v15, %s3244_s6  ;;  %v96_v30 = vrot.slane %v95_v27, 2  ;;  %v108_v31 = vrot.slane %v107_v26, 2 }
 0x11f   :  { %v97_v32 = vmin.f32 %v95_v27, %v96_v30  ;;  %v109_v33 = vmax.f32 %v107_v26, %v108_v31 }
 0x120   :  { %776 = vrot.lane.b32.xlu1 %v3329_v11, %s3247_s9  ;;  %v3650_v34 = vpop.permute.xlu1 %431  ;;  %v3652_v35 = vpop.xlane.xlu0 %148 }
 0x121   :  { %v98_v36 = vrot.slane %v97_v32, 1  ;;  %v110_v20 = vrot.slane %v109_v33, 1  ;;  %738 = vrot.lane.b32.xlu0 %v3340_v14, %s3245_s7 }
 0x123   :  { %v99_v21 = vmin.f32 %v97_v32, %v98_v36  ;;  %v111_v23 = vmax.f32 %v109_v33, %v110_v20 }
 0x124   :  { %780 = vrot.lane.b32.xlu1 %v3335_v13, %s3247_s9  ;;  %v3658_v25 = vpop.permute.xlu1 %447  ;;  %v3660_v26 = vpop.permute.xlu0 %412 }
 0x125   :  { %3030 = vpush %v99_v21  ;;  %742 = vrot.lane.b32.xlu0 %v3343_v15, %s3245_s7 }
 0x126   :  { %3032 = vpush %v111_v23 }
 0x128   :  { %796 = vrot.lane.b32.xlu1 %v3329_v11, %s3248_s10  ;;  %v3666_v27 = vpop.permute.xlu1 %451  ;;  %v3668_v30 = vpop.permute.xlu0 %429 }
 0x129   :  { %6449 = vst [vmem:[#allocation11_spill] sm:$0xff] %v3666_v27  ;;  %758 = vrot.lane.b32.xlu0 %v3340_v14, %s3246_s8 }
 0x12c   :  { %800 = vrot.lane.b32.xlu1 %v3335_v13, %s3248_s10  ;;  %v3674_v31 = vpop.permute.xlu1 %468  ;;  %v3676_v32 = vpop.permute.xlu0 %433 }
 0x12d   :  { %6450 = vst [vmem:[#allocation12_spill] sm:$0xff] %v3674_v31  ;;  %762 = vrot.lane.b32.xlu0 %v3343_v15, %s3246_s8 }
 0x130   :  { %816 = vrot.lane.b32.xlu1 %v3329_v11, %s3249_s11  ;;  %v3682_v33 = vpop.permute.xlu1 %472  ;;  %v3684_v36 = vpop.permute.xlu0 %449 }
 0x131   :  { %6451 = vst [vmem:[#allocation13_spill] sm:$0xff] %v3682_v33  ;;  %778 = vrot.lane.b32.xlu0 %v3340_v14, %s3247_s9 }
 0x134   :  { %820 = vrot.lane.b32.xlu1 %v3335_v13, %s3249_s11  ;;  %v3690_v20 = vpop.permute.xlu1 %489  ;;  %v3692_v21 = vpop.permute.xlu0 %453 }
 0x135   :  { %6452 = vst [vmem:[#allocation14_spill] sm:$0xff] %v3690_v20  ;;  %6453 = vst [vmem:[#allocation15_spill] sm:$0xff] %v3692_v21  ;;  %782 = vrot.lane.b32.xlu0 %v3343_v15, %s3247_s9 }
 0x138   :  { %836 = vrot.lane.b32.xlu1 %v3329_v11, %s3250_s12  ;;  %v3698_v23 = vpop.permute.xlu1 %493  ;;  %v3700_v17 = vpop.permute.xlu0 %470 }
 0x139   :  { %6454 = vst [vmem:[#allocation16_spill] sm:$0xff] %v3698_v23  ;;  %6455 = vst [vmem:[#allocation17_spill] sm:$0xff] %v3700_v17  ;;  %798 = vrot.lane.b32.xlu0 %v3340_v14, %s3248_s10 }
 0x13c   :  { %840 = vrot.lane.b32.xlu1 %v3335_v13, %s3250_s12  ;;  %v3706_v24 = vpop.permute.xlu1 %510  ;;  %v3708_v22 = vpop.permute.xlu0 %474 }
 0x13d   :  { %6456 = vst [vmem:[#allocation18_spill] sm:$0xff] %v3706_v24  ;;  %6457 = vst [vmem:[#allocation19_spill] sm:$0xff] %v3708_v22  ;;  %802 = vrot.lane.b32.xlu0 %v3343_v15, %s3248_s10 }
 0x140   :  { %864 = vrot.lane.b32.xlu1 %v3329_v11, %s3251_s13  ;;  %v3714_v33 = vpop.permute.xlu1 %514  ;;  %v3716_v23 = vpop.permute.xlu0 %491 }
 0x141   :  { %6458 = vst [vmem:[#allocation20_spill] sm:$0xff] %v3714_v33  ;;  %6459 = vst [vmem:[#allocation21_spill] sm:$0xff] %v3716_v23  ;;  %818 = vrot.lane.b32.xlu0 %v3340_v14, %s3249_s11 }
 0x144   :  { %868 = vrot.lane.b32.xlu1 %v3335_v13, %s3251_s13  ;;  %v3722_v20 = vpop.permute.xlu1 %531  ;;  %v3724_v24 = vpop.permute.xlu0 %495 }
 0x145   :  { %6460 = vst [vmem:[#allocation22_spill] sm:$0xff] %v3722_v20  ;;  %6461 = vst [vmem:[#allocation23_spill] sm:$0xff] %v3724_v24  ;;  %822 = vrot.lane.b32.xlu0 %v3343_v15, %s3249_s11 }
 0x148   :  { %884 = vrot.lane.b32.xlu1 %v3329_v11, %s3252_s14  ;;  %v3730_v22 = vpop.permute.xlu1 %535  ;;  %v3732_v33 = vpop.permute.xlu0 %512 }
 0x149   :  { %6462 = vst [vmem:[#allocation24_spill] sm:$0xff] %v3730_v22  ;;  %6463 = vst [vmem:[#allocation25_spill] sm:$0xff] %v3732_v33  ;;  %838 = vrot.lane.b32.xlu0 %v3340_v14, %s3250_s12 }
 0x14c   :  { %888 = vrot.lane.b32.xlu1 %v3335_v13, %s3252_s14  ;;  %v3738_v23 = vpop.permute.xlu1 %552  ;;  %v3740_v20 = vpop.permute.xlu0 %516 }
 0x14d   :  { %6464 = vst [vmem:[#allocation26_spill] sm:$0xff] %v3738_v23  ;;  %6465 = vst [vmem:[#allocation27_spill] sm:$0xff] %v3740_v20  ;;  %842 = vrot.lane.b32.xlu0 %v3343_v15, %s3250_s12  ;;  %v150_v20 = vrot.slane %v3652_v35, 4 }
 0x14f   :  { %v151_v27 = vmax.f32 %v3652_v35, %v150_v20 }
 0x150   :  { %904 = vrot.lane.b32.xlu1 %v3329_v11, %s3253_s17  ;;  %v3746_v24 = vpop.permute.xlu1 %556  ;;  %v3748_v22 = vpop.permute.xlu0 %533 }
 0x151   :  { %6466 = vst [vmem:[#allocation28_spill] sm:$0xff] %v3746_v24  ;;  %6467 = vst [vmem:[#allocation29_spill] sm:$0xff] %v3748_v22  ;;  %866 = vrot.lane.b32.xlu0 %v3340_v14, %s3251_s13  ;;  %v138_v24 = vrot.slane %v3644_v29, 4  ;;  %v152_v20 = vrot.slane %v151_v27, 2 }
 0x154   :  { %908 = vrot.lane.b32.xlu1 %v3335_v13, %s3253_s17  ;;  %v3754_v33 = vpop.permute.xlu1 %573  ;;  %v3756_v23 = vpop.permute.xlu0 %537 }
 0x155   :  { %6468 = vst [vmem:[#allocation30_spill] sm:$0xff] %v3754_v33  ;;  %6469 = vst [vmem:[#allocation31_spill] sm:$0xff] %v3756_v23  ;;  %870 = vrot.lane.b32.xlu0 %v3343_v15, %s3251_s13  ;;  %v139_v23 = vmin.f32 %v3644_v29, %v138_v24 }
 0x156   :  { %s3760_s2 = spop %3030 }
 0x157   :  { %s3033_s26 = spop %3032  ;;  %v140_v24 = vrot.slane %v139_v23, 2 }
 0x158   :  { %s113_s27 = ssub.f32 %s3033_s26, %s3760_s2  ;;  %924 = vrot.lane.b32.xlu1 %v3329_v11, %s3254_s18  ;;  %v3767_v22 = vpop.permute.xlu1 %577  ;;  %v3769_v33 = vpop.permute.xlu0 %554 }
 0x159   :  { %6470 = vst [vmem:[#allocation32_spill] sm:$0xff] %v3767_v22  ;;  %6471 = vst [vmem:[#allocation33_spill] sm:$0xff] %v3769_v33  ;;  %886 = vrot.lane.b32.xlu0 %v3340_v14, %s3252_s14 }
 0x15a   :  { %s116_s28 = smul.f32 0.003921569, %s113_s27 }
 0x15c   :  { %s3776_s30 = smax.f32 %s3261_s29, %s116_s28  ;;  %928 = vrot.lane.b32.xlu1 %v3335_v13, %s3254_s18  ;;  %v3780_v22 = vpop.permute.xlu1 %594  ;;  %v3782_v33 = vpop.permute.xlu0 %558 }
 0x15d   :  { %6472 = vst [vmem:[#allocation34_spill] sm:$0xff] %v3780_v22  ;;  %6473 = vst [vmem:[#allocation35_spill] sm:$0xff] %v3782_v33  ;;  %v6408_v21 = vstv %s3776_s30  ;;  %890 = vrot.lane.b32.xlu0 %v3343_v15, %s3252_s14  ;;  %v141_v22 = vmin.f32 %v139_v23, %v140_v24 }
 0x15e   :  { %3173 = vrcp.f32 %v6408_v21  ;;  %v153_v21 = vmax.f32 %v151_v27, %v152_v20 }
 0x15f   :  { %v142_v17 = vrot.slane %v141_v22, 1 }
 0x160   :  { %944 = vrot.lane.b32.xlu1 %v3329_v11, %s3255_s19  ;;  %v3791_v29 = vpop.permute.xlu1 %598  ;;  %v3793_v35 = vpop.permute.xlu0 %575  ;;  %v154_v23 = vrot.slane %v153_v21, 1 }
 0x161   :  { %6474 = vst [vmem:[#allocation36_spill] sm:$0xff] %v3791_v29  ;;  %6475 = vst [vmem:[#allocation37_spill] sm:$0xff] %v3793_v35  ;;  %906 = vrot.lane.b32.xlu0 %v3340_v14, %s3253_s17 }
 0x164   :  { %948 = vrot.lane.b32.xlu1 %v3335_v13, %s3255_s19  ;;  %v3799_v33 = vpop.permute.xlu1 %615  ;;  %v3801_v31 = vpop.permute.xlu0 %579 }
 0x165   :  { %6476 = vst [vmem:[#allocation38_spill] sm:$0xff] %v3799_v33  ;;  %6477 = vst [vmem:[#allocation39_spill] sm:$0xff] %v3801_v31  ;;  %910 = vrot.lane.b32.xlu0 %v3343_v15, %s3253_s17  ;;  %v143_v33 = vmin.f32 %v141_v22, %v142_v17  ;;  %v155_v31 = vmax.f32 %v153_v21, %v154_v23 }
 0x168   :  { %964 = vrot.lane.b32.xlu1 %v3329_v11, %s3256_s20  ;;  %v3807_v29 = vpop.permute.xlu1 %619  ;;  %v3809_v35 = vpop.permute.xlu0 %596 }
 0x169   :  { %6478 = vst [vmem:[#allocation40_spill] sm:$0xff] %v3807_v29  ;;  %926 = vrot.lane.b32.xlu0 %v3340_v14, %s3254_s18 }
 0x16b   :  { %v3174_v24 = vpop.eup %3173 }
 0x16c   :  { %3034 = vpush %v3174_v24  ;;  %968 = vrot.lane.b32.xlu1 %v3335_v13, %s3256_s20  ;;  %v3815_v27 = vpop.permute.xlu1 %636  ;;  %v3817_v20 = vpop.permute.xlu0 %600 }
 0x16d   :  { %6479 = vst [vmem:[#allocation41_spill] sm:$0xff] %v3815_v27  ;;  %6480 = vst [vmem:[#allocation42_spill] sm:$0xff] %v3817_v20  ;;  %930 = vrot.lane.b32.xlu0 %v3343_v15, %s3254_s18 }
 0x16e   :  { %3036 = vpush %v143_v33 }
 0x16f   :  { %3038 = vpush %v155_v31 }
 0x170   :  { %984 = vrot.lane.b32.xlu1 %v3329_v11, %s3257_s21  ;;  %v3823_v29 = vpop.permute.xlu1 %640  ;;  %v3825_v17 = vpop.permute.xlu0 %617 }
 0x171   :  { %6481 = vst [vmem:[#allocation43_spill] sm:$0xff] %v3823_v29  ;;  %946 = vrot.lane.b32.xlu0 %v3340_v14, %s3255_s19 }
 0x174   :  { %988 = vrot.lane.b32.xlu1 %v3335_v13, %s3257_s21  ;;  %v3831_v22 = vpop.permute.xlu1 %676  ;;  %v3833_v33 = vpop.permute.xlu0 %621 }
 0x175   :  { %6482 = vst [vmem:[#allocation44_spill] sm:$0xff] %v3831_v22  ;;  %6483 = vst [vmem:[#allocation45_spill] sm:$0xff] %v3833_v33  ;;  %950 = vrot.lane.b32.xlu0 %v3343_v15, %s3255_s19  ;;  %v1085_v33 = vrot.slane %v3304_v2, 2 }
 0x178   :  { %1004 = vrot.lane.b32.xlu1 %v3329_v11, %s3258_s22  ;;  %v3839_v31 = vpop.permute.xlu1 %680  ;;  %v3841_v21 = vpop.permute.xlu0 %638 }
 0x179   :  { %6484 = vst [vmem:[#allocation46_spill] sm:$0xff] %v3839_v31  ;;  %6485 = vst [vmem:[#allocation47_spill] sm:$0xff] %v3841_v21  ;;  %966 = vrot.lane.b32.xlu0 %v3340_v14, %s3256_s20 }
 0x17c   :  { %1008 = vrot.lane.b32.xlu1 %v3335_v13, %s3258_s22  ;;  %v3847_v23 = vpop.permute.xlu1 %696  ;;  %v3849_v24 = vpop.permute.xlu0 %642 }
 0x17d   :  { %6486 = vst [vmem:[#allocation48_spill] sm:$0xff] %v3847_v23  ;;  %6487 = vst [vmem:[#allocation49_spill] sm:$0xff] %v3849_v24  ;;  %970 = vrot.lane.b32.xlu0 %v3343_v15, %s3256_s20 }
 0x180   :  { %1024 = vrot.lane.b32.xlu1 %v3329_v11, %s3259_s23  ;;  %v3855_v22 = vpop.permute.xlu1 %700  ;;  %v3857_v31 = vpop.permute.xlu0 %678 }
 0x181   :  { %6488 = vst [vmem:[#allocation50_spill] sm:$0xff] %v3855_v22  ;;  %6489 = vst [vmem:[#allocation51_spill] sm:$0xff] %v3857_v31  ;;  %986 = vrot.lane.b32.xlu0 %v3340_v14, %s3257_s21  ;;  %v1084_v31 = vrot.slane %v3299_v1, 2 }
 0x184   :  { %1028 = vrot.lane.b32.xlu1 %v3335_v13, %s3259_s23  ;;  %v3863_v29 = vpop.permute.xlu1 %716  ;;  %v3865_v23 = vpop.permute.xlu0 %682 }
 0x185   :  { %6490 = vst [vmem:[#allocation52_spill] sm:$0xff] %v3863_v29  ;;  %6491 = vst [vmem:[#allocation53_spill] sm:$0xff] %v3865_v23  ;;  %990 = vrot.lane.b32.xlu0 %v3343_v15, %s3257_s21 }
 0x188   :  { %1044 = vrot.lane.b32.xlu1 %v3329_v11, %s6411_s24  ;;  %v3871_v24 = vpop.permute.xlu1 %720  ;;  %v3873_v22 = vpop.permute.xlu0 %698  ;;  %v3886_v11 = vsel %vm6426_vm4, %v1084_v31, %v1085_v33 }
 0x189   :  { %6492 = vst [vmem:[#allocation54_spill] sm:$0xff] %v3871_v24  ;;  %6493 = vst [vmem:[#allocation55_spill] sm:$0xff] %v3873_v22  ;;  %1006 = vrot.lane.b32.xlu0 %v3340_v14, %s3258_s22  ;;  %v1090_v24 = vrot.slane %v3313_v5, 2 }
 0x18c   :  { %1048 = vrot.lane.b32.xlu1 %v3335_v13, %s6411_s24  ;;  %v3881_v29 = vpop.permute.xlu1 %736  ;;  %v3883_v23 = vpop.permute.xlu0 %702  ;;  %v3898_v13 = vsel %vm6426_vm4, %v1085_v33, %v1090_v24  ;;  %v1087_v24 = vrot.slane %v3294_v0, 2  ;;  %v1092_v0 = vrot.slane %v3326_v10, 2 }
 0x18d   :  { %6494 = vst [vmem:[#allocation56_spill] sm:$0xff] %v3881_v29  ;;  %6495 = vst [vmem:[#allocation57_spill] sm:$0xff] %v3883_v23  ;;  %1010 = vrot.lane.b32.xlu0 %v3343_v15, %s3258_s22 }
 0x190   :  { %1094 = vrot.lane.b32.xlu1 %v3886_v11, %s3241_s25  ;;  %v3893_v1 = vpop.permute.xlu1 %740  ;;  %v3895_v2 = vpop.permute.xlu0 %718 }
 0x191   :  { %6496 = vst [vmem:[#allocation58_spill] sm:$0xff] %v3893_v1  ;;  %6497 = vst [vmem:[#allocation59_spill] sm:$0xff] %v3895_v2  ;;  %1026 = vrot.lane.b32.xlu0 %v3340_v14, %s3259_s23  ;;  %v1088_v1 = vrot.slane %v3318_v6, 2 }
 0x194   :  { %1098 = vrot.lane.b32.xlu1 %v3898_v13, %s3241_s25  ;;  %v3904_v31 = vpop.permute.xlu1 %756  ;;  %v3906_v29 = vpop.permute.xlu0 %722 }
 0x195   :  { %6498 = vst [vmem:[#allocation60_spill] sm:$0xff] %v3904_v31  ;;  %6499 = vst [vmem:[#allocation61_spill] sm:$0xff] %v3906_v29  ;;  %1030 = vrot.lane.b32.xlu0 %v3343_v15, %s3259_s23 }
 0x198   :  { %1114 = vrot.lane.b32.xlu1 %v3886_v11, %s3243_s5  ;;  %v3912_v5 = vpop.permute.xlu1 %760  ;;  %v3914_v33 = vpop.permute.xlu0 %738 }
 0x199   :  { %6500 = vst [vmem:[#allocation62_spill] sm:$0xff] %v3912_v5  ;;  %6501 = vst [vmem:[#allocation63_spill] sm:$0xff] %v3914_v33  ;;  %1046 = vrot.lane.b32.xlu0 %v3340_v14, %s6411_s24  ;;  %v3933_v14 = vsel %vm6426_vm4, %v1087_v24, %v1088_v1 }
 0x19c   :  { %1118 = vrot.lane.b32.xlu1 %v3898_v13, %s3243_s5  ;;  %v3922_v31 = vpop.permute.xlu1 %776  ;;  %v3924_v29 = vpop.permute.xlu0 %742 }
 0x19d   :  { %6502 = vst [vmem:[#allocation64_spill] sm:$0xff] %v3922_v31  ;;  %6503 = vst [vmem:[#allocation65_spill] sm:$0xff] %v3924_v29  ;;  %s3926_s26 = spop %3034  ;;  %1050 = vrot.lane.b32.xlu0 %v3343_v15, %s6411_s24  ;;  %v3946_v15 = vsel %vm6426_vm4, %v1088_v1, %v1092_v0  ;;  %v6510_v29 = vstv %s3776_s30  ;;  %vm560_vm4 = vcmask 769024  }
 0x19f   :  { %s3930_s27 = spop %3036 }
 0x1a0   :  { %s3039_s28 = spop %3038  ;;  %1134 = vrot.lane.b32.xlu1 %v3886_v11, %s3244_s6  ;;  %v3939_v6 = vpop.permute.xlu1 %780  ;;  %v3941_v5 = vpop.permute.xlu0 %758 }
 0x1a1   :  { %s157_s15 = ssub.f32 %s3039_s28, %s3930_s27  ;;  %6504 = vst [vmem:[#allocation66_spill] sm:$0xff] %v3939_v6  ;;  %6505 = vst [vmem:[#allocation67_spill] sm:$0xff] %v3941_v5  ;;  %1096 = vrot.lane.b32.xlu0 %v3933_v14, %s3241_s25  ;;  %v3262_v6 = vmov 0.0  }
 0x1a2   :  { %v3957_v31 = vsel %vm6424_vm2, 1.0, %v3262_v6  ;;  %v3961_v1 = vsel %vm6423_vm3, 1.0, %v3262_v6  ;;  %v165_v6 = vstv %s3930_s27  ;;  %vm6428_vm3 = vcmask 252928  }
 0x1a3   :  { %s160_s16 = smul.f32 0.003921569, %s157_s15  ;;  %6508 = vst [vmem:[#allocation70_spill] sm:$0xff] %v3957_v31  ;;  %6509 = vst [vmem:[#allocation71_spill] sm:$0xff] %v3961_v1  ;;  %v126_v5 = vmul.f32 %v3957_v31, %v6510_v29  ;;  %s3263_s15 = smov 49   ;;  %vm6429_vm2 = vcmask 1031168  }
 0x1a4   :  { %1138 = vrot.lane.b32.xlu1 %v3898_v13, %s3244_s6  ;;  %v3951_v10 = vpop.permute.xlu1 %796  ;;  %v3953_v24 = vpop.permute.xlu0 %762 }
 0x1a5   :  { %s161_s24 = smax.f32 %s3261_s29, %s160_s16  ;;  %6506 = vst [vmem:[#allocation68_spill] sm:$0xff] %v3951_v10  ;;  %6507 = vst [vmem:[#allocation69_spill] sm:$0xff] %v3953_v24  ;;  %1100 = vrot.lane.b32.xlu0 %v3946_v15, %s3241_s25 }
 0x1a6   :  { %v162_v0 = vstv %s161_s24 }
 0x1a7   :  { %3175 = vrcp.f32 %v162_v0  ;;  %v172_v10 = vmul.f32 %v3961_v1, %v162_v0 }
 0x1a8   :  { %1154 = vrot.lane.b32.xlu1 %v3886_v11, %s3245_s7  ;;  %v3973_v33 = vpop.permute.xlu1 %800  ;;  %v3975_v18 = vpop.permute.xlu0 %778 }
 0x1a9   :  { %v3969_v24 = vadd.f32 %v172_v10, %v126_v5  ;;  %6512 = vst [vmem:[#allocation73_spill] sm:$0xff] %v3973_v33  ;;  %6513 = vst [vmem:[#allocation74_spill] sm:$0xff] %v3975_v18  ;;  %1116 = vrot.lane.b32.xlu0 %v3933_v14, %s3243_s5  ;;  %v121_v5 = vstv %s3760_s2  ;;  %v166_v10 = vmul.f32 %v3961_v1, %v165_v6  ;;  %s6581_s2 = smov 30  }
 0x1aa   :  { %v122_v0 = vmul.f32 %v3957_v31, %v121_v5 }
 0x1ab   :  { %6511 = vst [vmem:[#allocation72_spill] sm:$0xff] %v3969_v24 }
 0x1ac   :  { %1158 = vrot.lane.b32.xlu1 %v3898_v13, %s3245_s7  ;;  %v3982_v29 = vpop.permute.xlu1 %816  ;;  %v3984_v23 = vpop.permute.xlu0 %782 }
 0x1ad   :  { %6514 = vst [vmem:[#allocation75_spill] sm:$0xff] %v3982_v29  ;;  %6515 = vst [vmem:[#allocation76_spill] sm:$0xff] %v3984_v23  ;;  %1120 = vrot.lane.b32.xlu0 %v3946_v15, %s3243_s5  ;;  %v167_v29 = vadd.f32 %v166_v10, %v122_v0 }
 0x1b0   :  { %1174 = vrot.lane.b32.xlu1 %v3886_v11, %s3246_s8  ;;  %v3993_v24 = vpop.permute.xlu1 %820  ;;  %v3995_v33 = vpop.permute.xlu0 %798 }
 0x1b1   :  { %6516 = vst [vmem:[#allocation77_spill] sm:$0xff] %v3993_v24  ;;  %6517 = vst [vmem:[#allocation78_spill] sm:$0xff] %v3995_v33  ;;  %1136 = vrot.lane.b32.xlu0 %v3933_v14, %s3244_s6 }
 0x1b4   :  { %v3176_v23 = vpop.eup %3175  ;;  %v3999_v18 = vpop.permute.xlu1 %836  ;;  %175 = vrot.lane.b32.xlu1 %v167_v29, %s3263_s15 }
 0x1b5   :  { %3040 = vpush %v3176_v23  ;;  %6518 = vst [vmem:[#allocation79_spill] sm:$0xff] %v3999_v18  ;;  %v4002_v6 = vpop.permute.xlu0 %802  ;;  %1140 = vrot.lane.b32.xlu0 %v3946_v15, %s3244_s6  ;;  %v4238_v18 = vld [vmem:[%s6402_s1] sm:$0xff] }
 0x1b6   :  { %6519 = vst [vmem:[#allocation80_spill] sm:$0xff] %v4002_v6 }
 0x1b8   :  { %v4006_v5 = vpop.permute.xlu1 %840  ;;  %1178 = vrot.lane.b32.xlu1 %v3898_v13, %s3246_s8 }
 0x1b9   :  { %6520 = vst [vmem:[#allocation81_spill] sm:$0xff] %v4006_v5  ;;  %v4008_v31 = vpop.permute.xlu0 %818  ;;  %1156 = vrot.lane.b32.xlu0 %v3933_v14, %s3245_s7 }
 0x1ba   :  { %6521 = vst [vmem:[#allocation82_spill] sm:$0xff] %v4008_v31 }
 0x1bc   :  { %v4014_v23 = vpop.permute.xlu1 %864  ;;  %1194 = vrot.lane.b32.xlu1 %v3886_v11, %s3247_s9 }
 0x1bd   :  { %6522 = vst [vmem:[#allocation83_spill] sm:$0xff] %v4014_v23  ;;  %v4016_v10 = vpop.permute.xlu0 %822  ;;  %1160 = vrot.lane.b32.xlu0 %v3946_v15, %s3245_s7 }
 0x1be   :  { %6523 = vst [vmem:[#allocation84_spill] sm:$0xff] %v4016_v10 }
 0x1c0   :  { %v4022_v29 = vpop.permute.xlu1 %868  ;;  %1198 = vrot.lane.b32.xlu1 %v3898_v13, %s3247_s9 }
 0x1c1   :  { %6524 = vst [vmem:[#allocation85_spill] sm:$0xff] %v4022_v29  ;;  %v4024_v0 = vpop.permute.xlu0 %838  ;;  %1176 = vrot.lane.b32.xlu0 %v3933_v14, %s3246_s8 }
 0x1c2   :  { %6525 = vst [vmem:[#allocation86_spill] sm:$0xff] %v4024_v0  ;;  %v248_v0 = vsel %vm246_vm5, %v3474_v38, %v3480_v39  ;;  %v247_v38 = vsel %vm246_vm5, %v3468_v37, %v3417_v16  ;;  %v4271_v39 = vld [vmem:[%s6401_s0 + $0x10] sm:$0xff]  ;;  %v269_v16 = vsel %vm267_vm6, %v3494_v42, %v3500_v43  ;;  %v4286_v37 = vld [vmem:[%s6401_s0] sm:$0xff] }
 0x1c3   :  { %6582 = vst [vmem:[#allocation141_spill] sm:$0xff] %v4271_v39  ;;  %6583 = vst [vmem:[#allocation142_spill] sm:$0xff] %v4286_v37 }
 0x1c4   :  { %v4030_v1 = vpop.permute.xlu1 %884  ;;  %1214 = vrot.lane.b32.xlu1 %v3886_v11, %s3248_s10 }
 0x1c5   :  { %6526 = vst [vmem:[#allocation87_spill] sm:$0xff] %v4030_v1  ;;  %v4032_v23 = vpop.permute.xlu0 %842  ;;  %1180 = vrot.lane.b32.xlu0 %v3946_v15, %s3246_s8 }
 0x1c6   :  { %6527 = vst [vmem:[#allocation88_spill] sm:$0xff] %v4032_v23 }
 0x1c8   :  { %v4038_v5 = vpop.permute.xlu1 %888  ;;  %1218 = vrot.lane.b32.xlu1 %v3898_v13, %s3248_s10 }
 0x1c9   :  { %6528 = vst [vmem:[#allocation89_spill] sm:$0xff] %v4038_v5  ;;  %v4040_v29 = vpop.permute.xlu0 %866  ;;  %1196 = vrot.lane.b32.xlu0 %v3933_v14, %s3247_s9 }
 0x1ca   :  { %6529 = vst [vmem:[#allocation90_spill] sm:$0xff] %v4040_v29 }
 0x1cc   :  { %v4046_v24 = vpop.permute.xlu1 %904  ;;  %1234 = vrot.lane.b32.xlu1 %v3886_v11, %s3249_s11 }
 0x1cd   :  { %6530 = vst [vmem:[#allocation91_spill] sm:$0xff] %v4046_v24  ;;  %v4048_v1 = vpop.permute.xlu0 %870  ;;  %1200 = vrot.lane.b32.xlu0 %v3946_v15, %s3247_s9 }
 0x1ce   :  { %6531 = vst [vmem:[#allocation92_spill] sm:$0xff] %v4048_v1 }
 0x1d0   :  { %v4054_v23 = vpop.permute.xlu1 %908  ;;  %1238 = vrot.lane.b32.xlu1 %v3898_v13, %s3249_s11 }
 0x1d1   :  { %6532 = vst [vmem:[#allocation93_spill] sm:$0xff] %v4054_v23  ;;  %v4056_v5 = vpop.permute.xlu0 %886  ;;  %1216 = vrot.lane.b32.xlu0 %v3933_v14, %s3248_s10 }
 0x1d2   :  { %6533 = vst [vmem:[#allocation94_spill] sm:$0xff] %v4056_v5 }
 0x1d4   :  { %v4062_v29 = vpop.permute.xlu1 %924  ;;  %1254 = vrot.lane.b32.xlu1 %v3886_v11, %s3250_s12 }
 0x1d5   :  { %6534 = vst [vmem:[#allocation95_spill] sm:$0xff] %v4062_v29  ;;  %v4064_v24 = vpop.permute.xlu0 %890  ;;  %1220 = vrot.lane.b32.xlu0 %v3946_v15, %s3248_s10 }
 0x1d6   :  { %6535 = vst [vmem:[#allocation96_spill] sm:$0xff] %v4064_v24 }
 0x1d8   :  { %v4070_v1 = vpop.permute.xlu1 %928  ;;  %1258 = vrot.lane.b32.xlu1 %v3898_v13, %s3250_s12 }
 0x1d9   :  { %6536 = vst [vmem:[#allocation97_spill] sm:$0xff] %v4070_v1  ;;  %v4072_v23 = vpop.permute.xlu0 %906  ;;  %1236 = vrot.lane.b32.xlu0 %v3933_v14, %s3249_s11 }
 0x1da   :  { %6537 = vst [vmem:[#allocation98_spill] sm:$0xff] %v4072_v23 }
 0x1dc   :  { %v4078_v5 = vpop.permute.xlu1 %944  ;;  %1274 = vrot.lane.b32.xlu1 %v3886_v11, %s3242_s4 }
 0x1dd   :  { %6538 = vst [vmem:[#allocation99_spill] sm:$0xff] %v4078_v5  ;;  %v4080_v29 = vpop.permute.xlu0 %910  ;;  %1240 = vrot.lane.b32.xlu0 %v3946_v15, %s3249_s11 }
 0x1de   :  { %6539 = vst [vmem:[#allocation100_spill] sm:$0xff] %v4080_v29 }
 0x1e0   :  { %v4086_v24 = vpop.permute.xlu1 %948  ;;  %1278 = vrot.lane.b32.xlu1 %v3898_v13, %s3242_s4 }
 0x1e1   :  { %6540 = vst [vmem:[#allocation101_spill] sm:$0xff] %v4086_v24  ;;  %v4088_v1 = vpop.permute.xlu0 %926  ;;  %1256 = vrot.lane.b32.xlu0 %v3933_v14, %s3250_s12 }
 0x1e2   :  { %6541 = vst [vmem:[#allocation102_spill] sm:$0xff] %v4088_v1 }
 0x1e4   :  { %v4094_v23 = vpop.permute.xlu1 %964  ;;  %1294 = vrot.lane.b32.xlu1 %v3886_v11, %s3251_s13 }
 0x1e5   :  { %6542 = vst [vmem:[#allocation103_spill] sm:$0xff] %v4094_v23  ;;  %v4096_v5 = vpop.permute.xlu0 %930  ;;  %1260 = vrot.lane.b32.xlu0 %v3946_v15, %s3250_s12 }
 0x1e6   :  { %6543 = vst [vmem:[#allocation104_spill] sm:$0xff] %v4096_v5 }
 0x1e8   :  { %v4102_v29 = vpop.permute.xlu1 %968  ;;  %1298 = vrot.lane.b32.xlu1 %v3898_v13, %s3251_s13 }
 0x1e9   :  { %6544 = vst [vmem:[#allocation105_spill] sm:$0xff] %v4102_v29  ;;  %v4104_v24 = vpop.permute.xlu0 %946  ;;  %1276 = vrot.lane.b32.xlu0 %v3933_v14, %s3242_s4 }
 0x1ea   :  { %6545 = vst [vmem:[#allocation106_spill] sm:$0xff] %v4104_v24 }
 0x1ec   :  { %v4110_v1 = vpop.permute.xlu1 %984  ;;  %1314 = vrot.lane.b32.xlu1 %v3886_v11, %s3252_s14 }
 0x1ed   :  { %6546 = vst [vmem:[#allocation107_spill] sm:$0xff] %v4110_v1  ;;  %v4112_v23 = vpop.permute.xlu0 %950  ;;  %1280 = vrot.lane.b32.xlu0 %v3946_v15, %s3242_s4 }
 0x1ee   :  { %6547 = vst [vmem:[#allocation108_spill] sm:$0xff] %v4112_v23 }
 0x1f0   :  { %v4118_v5 = vpop.permute.xlu1 %988  ;;  %1318 = vrot.lane.b32.xlu1 %v3898_v13, %s3252_s14 }
 0x1f1   :  { %6548 = vst [vmem:[#allocation109_spill] sm:$0xff] %v4118_v5  ;;  %v4120_v29 = vpop.permute.xlu0 %966  ;;  %1296 = vrot.lane.b32.xlu0 %v3933_v14, %s3251_s13 }
 0x1f2   :  { %6549 = vst [vmem:[#allocation110_spill] sm:$0xff] %v4120_v29 }
 0x1f4   :  { %v4126_v24 = vpop.permute.xlu1 %1004  ;;  %1334 = vrot.lane.b32.xlu1 %v3886_v11, %s3253_s17 }
 0x1f5   :  { %6550 = vst [vmem:[#allocation111_spill] sm:$0xff] %v4126_v24  ;;  %v4128_v1 = vpop.permute.xlu0 %970  ;;  %1300 = vrot.lane.b32.xlu0 %v3946_v15, %s3251_s13 }
 0x1f6   :  { %6551 = vst [vmem:[#allocation112_spill] sm:$0xff] %v4128_v1 }
 0x1f8   :  { %v4134_v23 = vpop.permute.xlu1 %1008  ;;  %1338 = vrot.lane.b32.xlu1 %v3898_v13, %s3253_s17 }
 0x1f9   :  { %6552 = vst [vmem:[#allocation113_spill] sm:$0xff] %v4134_v23  ;;  %v4136_v5 = vpop.permute.xlu0 %986  ;;  %1316 = vrot.lane.b32.xlu0 %v3933_v14, %s3252_s14 }
 0x1fa   :  { %6553 = vst [vmem:[#allocation114_spill] sm:$0xff] %v4136_v5 }
 0x1fc   :  { %v4142_v29 = vpop.permute.xlu1 %1024  ;;  %1354 = vrot.lane.b32.xlu1 %v3886_v11, %s3254_s18 }
 0x1fd   :  { %6554 = vst [vmem:[#allocation115_spill] sm:$0xff] %v4142_v29  ;;  %v4144_v24 = vpop.permute.xlu0 %990  ;;  %1320 = vrot.lane.b32.xlu0 %v3946_v15, %s3252_s14 }
 0x1fe   :  { %6555 = vst [vmem:[#allocation116_spill] sm:$0xff] %v4144_v24 }
 0x200   :  { %v4150_v1 = vpop.permute.xlu1 %1028  ;;  %1358 = vrot.lane.b32.xlu1 %v3898_v13, %s3254_s18 }
 0x201   :  { %6556 = vst [vmem:[#allocation117_spill] sm:$0xff] %v4150_v1  ;;  %v4152_v23 = vpop.permute.xlu0 %1006  ;;  %1336 = vrot.lane.b32.xlu0 %v3933_v14, %s3253_s17 }
 0x202   :  { %6557 = vst [vmem:[#allocation118_spill] sm:$0xff] %v4152_v23 }
 0x204   :  { %v4158_v5 = vpop.permute.xlu1 %1044  ;;  %1374 = vrot.lane.b32.xlu1 %v3886_v11, %s3255_s19 }
 0x205   :  { %6558 = vst [vmem:[#allocation119_spill] sm:$0xff] %v4158_v5  ;;  %v4160_v29 = vpop.permute.xlu0 %1010  ;;  %1340 = vrot.lane.b32.xlu0 %v3946_v15, %s3253_s17 }
 0x206   :  { %6559 = vst [vmem:[#allocation120_spill] sm:$0xff] %v4160_v29 }
 0x208   :  { %v4166_v24 = vpop.permute.xlu1 %1048  ;;  %1378 = vrot.lane.b32.xlu1 %v3898_v13, %s3255_s19 }
 0x209   :  { %6560 = vst [vmem:[#allocation121_spill] sm:$0xff] %v4166_v24  ;;  %v4168_v1 = vpop.permute.xlu0 %1026  ;;  %1356 = vrot.lane.b32.xlu0 %v3933_v14, %s3254_s18 }
 0x20a   :  { %6561 = vst [vmem:[#allocation122_spill] sm:$0xff] %v4168_v1 }
 0x20c   :  { %v4174_v23 = vpop.permute.xlu1 %1094  ;;  %1394 = vrot.lane.b32.xlu1 %v3886_v11, %s3256_s20 }
 0x20d   :  { %6562 = vst [vmem:[#allocation123_spill] sm:$0xff] %v4174_v23  ;;  %v4176_v5 = vpop.permute.xlu0 %1030  ;;  %1360 = vrot.lane.b32.xlu0 %v3946_v15, %s3254_s18 }
 0x20e   :  { %6563 = vst [vmem:[#allocation124_spill] sm:$0xff] %v4176_v5 }
 0x210   :  { %v4182_v29 = vpop.permute.xlu1 %1098  ;;  %1398 = vrot.lane.b32.xlu1 %v3898_v13, %s3256_s20 }
 0x211   :  { %6564 = vst [vmem:[#allocation125_spill] sm:$0xff] %v4182_v29  ;;  %v4184_v24 = vpop.permute.xlu0 %1046  ;;  %1376 = vrot.lane.b32.xlu0 %v3933_v14, %s3255_s19 }
 0x212   :  { %6565 = vst [vmem:[#allocation126_spill] sm:$0xff] %v4184_v24 }
 0x214   :  { %v4190_v1 = vpop.permute.xlu1 %1114  ;;  %1414 = vrot.lane.b32.xlu1 %v3886_v11, %s3257_s21 }
 0x215   :  { %6566 = vst [vmem:[#allocation127_spill] sm:$0xff] %v4190_v1  ;;  %v4192_v23 = vpop.permute.xlu0 %1050  ;;  %1380 = vrot.lane.b32.xlu0 %v3946_v15, %s3255_s19 }
 0x216   :  { %6567 = vst [vmem:[#allocation128_spill] sm:$0xff] %v4192_v23 }
 0x218   :  { %v4198_v5 = vpop.permute.xlu1 %1118  ;;  %1418 = vrot.lane.b32.xlu1 %v3898_v13, %s3257_s21 }
 0x219   :  { %6568 = vst [vmem:[#allocation129_spill] sm:$0xff] %v4198_v5  ;;  %v4200_v29 = vpop.permute.xlu0 %1096  ;;  %1396 = vrot.lane.b32.xlu0 %v3933_v14, %s3256_s20 }
 0x21a   :  { %6569 = vst [vmem:[#allocation130_spill] sm:$0xff] %v4200_v29 }
 0x21c   :  { %v4206_v24 = vpop.permute.xlu1 %1134  ;;  %1434 = vrot.lane.b32.xlu1 %v3886_v11, %s3258_s22 }
 0x21d   :  { %6570 = vst [vmem:[#allocation131_spill] sm:$0xff] %v4206_v24  ;;  %v4208_v1 = vpop.permute.xlu0 %1100  ;;  %1400 = vrot.lane.b32.xlu0 %v3946_v15, %s3256_s20 }
 0x21e   :  { %6571 = vst [vmem:[#allocation132_spill] sm:$0xff] %v4208_v1  ;;  %v6576_v1 = vlaneseq }
 0x220   :  { %v4214_v23 = vpop.permute.xlu1 %1138  ;;  %1438 = vrot.lane.b32.xlu1 %v3898_v13, %s3258_s22  ;;  %v229_v10 = vshrl.u32 %v6576_v1, 7 }
 0x221   :  { %6572 = vst [vmem:[#allocation133_spill] sm:$0xff] %v4214_v23  ;;  %v4216_v5 = vpop.permute.xlu0 %1116  ;;  %1416 = vrot.lane.b32.xlu0 %v3933_v14, %s3257_s21 }
 0x222   :  { %6573 = vst [vmem:[#allocation134_spill] sm:$0xff] %v4216_v5  ;;  %v4231_v23 = vsub.s32 0, %v229_v10  ;;  %v4233_v5 = vsub.s32 1, %v229_v10  ;;  %v4248_v1 = vsub.s32 2, %v229_v10  ;;  %v4292_v21 = vsub.s32 5, %v229_v10 }
 0x223   :  { %v4302_v20 = vsub.s32 6, %v229_v10 }
 0x224   :  { %v4222_v29 = vpop.permute.xlu1 %1154  ;;  %1454 = vrot.lane.b32.xlu1 %v3886_v11, %s3259_s23  ;;  %v231_v6 = vrot.slane %v4238_v18, %v4231_v23 }
 0x225   :  { %6574 = vst [vmem:[#allocation135_spill] sm:$0xff] %v4222_v29  ;;  %v4224_v24 = vpop.permute.xlu0 %1120  ;;  %1420 = vrot.lane.b32.xlu0 %v3946_v15, %s3257_s21 }
 0x226   :  { %6575 = vst [vmem:[#allocation136_spill] sm:$0xff] %v4224_v24  ;;  %v233_v2 = vmul.f32 %v4271_v39, %v231_v6 }
 0x228   :  { %v4240_v29 = vpop.permute.xlu1 %1158  ;;  %1458 = vrot.lane.b32.xlu1 %v3898_v13, %s3259_s23 }
 0x229   :  { %6577 = vst [vmem:[#allocation137_spill] sm:$0xff] %v4240_v29  ;;  %v4242_v24 = vpop.permute.xlu0 %1136  ;;  %1436 = vrot.lane.b32.xlu0 %v3933_v14, %s3258_s22  ;;  %v237_v29 = vrot.slane %v4238_v18, %v4233_v5 }
 0x22a   :  { %6578 = vst [vmem:[#allocation138_spill] sm:$0xff] %v4242_v24  ;;  %v4257_v24 = vsub.s32 3, %v229_v10 }
 0x22b   :  { %v252_v22 = vmul.f32 %v248_v0, %v237_v29  ;;  %v232_v0 = vmul.f32 %v4286_v37, %v231_v6  ;;  %v251_v27 = vmul.f32 %v247_v38, %v237_v29  ;;  %v290_v29 = vsel %vm288_vm7, %v3514_v46, %v3520_v47 }
 0x22c   :  { %v4259_v31 = vpop.permute.xlu1 %1174  ;;  %1474 = vrot.lane.b32.xlu1 %v3886_v11, %s6581_s2  ;;  %v258_v11 = vrot.slane %v4238_v18, %v4248_v1  ;;  %v279_v39 = vrot.slane %v4238_v18, %v4257_v24 }
 0x22d   :  { %6579 = vst [vmem:[#allocation139_spill] sm:$0xff] %v4259_v31  ;;  %v4261_v33 = vpop.permute.xlu0 %1140  ;;  %1440 = vrot.lane.b32.xlu0 %v3946_v15, %s3258_s22  ;;  %v4276_v31 = vsub.s32 4, %v229_v10  ;;  %v254_v6 = vadd.f32 %v252_v22, %v233_v2  ;;  %v310_v22 = vsel %vm309_vm8, %v3522_v48, %v3528_v49  ;;  %v253_v2 = vadd.f32 %v251_v27, %v232_v0 }
 0x22e   :  { %6580 = vst [vmem:[#allocation140_spill] sm:$0xff] %v4261_v33  ;;  %v268_v33 = vsel %vm267_vm6, %v3482_v40, %v3488_v41  ;;  %v273_v37 = vmul.f32 %v269_v16, %v258_v11  ;;  %v289_v40 = vsel %vm288_vm7, %v3502_v44, %v3508_v45  ;;  %v321_v45 = vrot.slane %v4238_v18, %v4292_v21 }
 0x22f   :  { %v272_v41 = vmul.f32 %v268_v33, %v258_v11  ;;  %v300_v38 = vrot.slane %v4238_v18, %v4276_v31  ;;  %v293_v44 = vmul.f32 %v289_v40, %v279_v39  ;;  %v294_v47 = vmul.f32 %v290_v29, %v279_v39  ;;  %v4338_v39 = vld [vmem:[%s6402_s1 + $0x8] sm:$0xff] }
 0x230   :  { %v4296_v42 = vpop.permute.xlu1 %175  ;;  %1478 = vrot.lane.b32.xlu1 %v3898_v13, %s6581_s2  ;;  %v4314_v13 = vsub.s32 7, %v229_v10  ;;  %v275_v46 = vadd.f32 %v273_v37, %v254_v6  ;;  %v331_v10 = vsel %vm330_vm9, %v3542_v52, %v3548_v53  ;;  %v342_v16 = vrot.slane %v4238_v18, %v4302_v20 }
 0x231   :  { %6584 = vst [vmem:[#allocation143_spill] sm:$0xff] %v4296_v42  ;;  %v4298_v43 = vpop.permute.xlu0 %1156  ;;  %1456 = vrot.lane.b32.xlu0 %v3933_v14, %s3259_s23  ;;  %v274_v48 = vadd.f32 %v272_v41, %v253_v2  ;;  %v314_v49 = vmul.f32 %v310_v22, %v300_v38  ;;  %v311_v27 = vsel %vm309_vm8, %v3534_v50, %v3540_v51 }
 0x232   :  { %v352_v52 = vsel %vm351_vm10, %v3562_v56, %v3568_v57  ;;  %v363_v53 = vrot.slane %v4238_v18, %v4314_v13  ;;  %v335_v0 = vmul.f32 %v331_v10, %v321_v45  ;;  %v332_v6 = vsel %vm330_vm9, %v3554_v54, %v3560_v55 }
 0x233   :  { %v295_v37 = vadd.f32 %v293_v44, %v274_v48  ;;  %v296_v40 = vadd.f32 %v294_v47, %v275_v46  ;;  %v315_v41 = vmul.f32 %v311_v27, %v300_v38  ;;  %v373_v56 = vsel %vm372_vm11, %v3582_v60, %v3588_v61 }
 0x234   :  { %v4323_v11 = vpop.permute.xlu1 %1178  ;;  %v384_v18 = vrot.slane %v4338_v39, %v4231_v23  ;;  %v356_v29 = vmul.f32 %v352_v52, %v342_v16  ;;  %v353_v54 = vsel %vm351_vm10, %v3574_v58, %v3580_v59  ;;  %v336_v55 = vmul.f32 %v332_v6, %v321_v45  ;;  %v6585_v6 = vld [vmem:[#allocation17_spill] sm:$0xff] }
 0x235   :  { %v4321_v33 = vpop.permute.xlu0 %1160  ;;  %1460 = vrot.lane.b32.xlu0 %v3946_v15, %s3259_s23  ;;  %v316_v57 = vadd.f32 %v314_v49, %v295_v37  ;;  %v394_v38 = vsel %vm6435_vm12, %v3602_v3, %v3608_v4  ;;  %v377_v60 = vmul.f32 %v373_v56, %v363_v53  ;;  %v374_v61 = vsel %vm372_vm11, %v3594_v62, %v3600_v63  ;;  %v4414_v56 = vld [vmem:[%s6402_s1 + $0x10] sm:$0xff] }
 0x236   :  { %v317_v58 = vadd.f32 %v315_v41, %v296_v40  ;;  %v357_v59 = vmul.f32 %v353_v54, %v342_v16  ;;  %v415_v45 = vsel %vm6433_vm13, %v3622_v9, %v3628_v12  ;;  %v426_v3 = vrot.slane %v4338_v39, %v4248_v1  ;;  %v6586_v40 = vld [vmem:[#allocation12_spill] sm:$0xff] }
 0x237   :  { %v337_v22 = vadd.f32 %v335_v0, %v316_v57  ;;  %v398_v63 = vmul.f32 %v394_v38, %v384_v18  ;;  %v395_v4 = vsel %vm6435_vm12, %v3614_v7, %v3620_v8  ;;  %v378_v47 = vmul.f32 %v374_v61, %v363_v53  ;;  %v6590_v38 = vld [vmem:[#allocation14_spill] sm:$0xff] }
 0x238   :  { %v4350_v51 = vpop.permute.xlu1 %1194  ;;  %v338_v46 = vadd.f32 %v336_v55, %v317_v58  ;;  %v435_v10 = vsel %vm6425_vm1, %v3642_v28, %v3668_v30  ;;  %v446_v9 = vrot.slane %v4338_v39, %v4257_v24  ;;  %v399_v8 = vmul.f32 %v395_v4, %v384_v18  ;;  %v6589_v55 = vld [vmem:[#allocation21_spill] sm:$0xff]  ;;  %v6594_v4 = vld [vmem:[#allocation18_spill] sm:$0xff] }
 0x239   :  { %v4348_v50 = vpop.permute.xlu0 %1176  ;;  %1476 = vrot.lane.b32.xlu0 %v3933_v14, %s6581_s2  ;;  %v405_v14 = vrot.slane %v4338_v39, %v4233_v5  ;;  %v358_v62 = vadd.f32 %v356_v29, %v337_v22  ;;  %v416_v27 = vsel %vm6433_vm13, %v3630_v19, %v3660_v26  ;;  %v456_v28 = vsel %vm6434_vm14, %v3658_v25, %v3684_v36  ;;  %v6588_v29 = vld [vmem:[#allocation11_spill] sm:$0xff] }
 0x23a   :  { %v359_v7 = vadd.f32 %v357_v59, %v338_v46  ;;  %v439_v52 = vmul.f32 %v435_v10, %v426_v3  ;;  %v488_v53 = vrot.slane %v4338_v39, %v4292_v21  ;;  %v436_v0 = vsel %vm6425_vm1, %v3650_v34, %v3676_v32  ;;  %v6587_v32 = vld [vmem:[#allocation15_spill] sm:$0xff] }
 0x23b   :  { %v379_v12 = vadd.f32 %v377_v60, %v358_v62  ;;  %v419_v16 = vmul.f32 %v415_v45, %v405_v14  ;;  %v477_v41 = vsel %vm6427_vm15, %v6586_v40, %v6585_v6  ;;  %v509_v19 = vrot.slane %v4338_v39, %v4302_v20  ;;  %v6591_v59 = vld [vmem:[#allocation19_spill] sm:$0xff]  ;;  %v6592_v45 = vld [vmem:[#allocation13_spill] sm:$0xff] }
 0x23c   :  { %v4372_v44 = vpop.permute.xlu1 %1198  ;;  %v380_v37 = vadd.f32 %v378_v47, %v359_v7  ;;  %v420_v25 = vmul.f32 %v416_v27, %v405_v14  ;;  %v460_v36 = vmul.f32 %v456_v28, %v446_v9  ;;  %v457_v54 = vsel %vm6434_vm14, %v6588_v29, %v6587_v32  ;;  %v6596_v27 = vld [vmem:[#allocation16_spill] sm:$0xff]  ;;  %v6602_v32 = vld [vmem:[#allocation26_spill] sm:$0xff] }
 0x23d   :  { %v4370_v2 = vpop.permute.xlu0 %1180  ;;  %1480 = vrot.lane.b32.xlu0 %v3946_v15, %s6581_s2  ;;  %v467_v15 = vrot.slane %v4338_v39, %v4276_v31  ;;  %v400_v30 = vadd.f32 %v398_v63, %v379_v12  ;;  %v498_v22 = vsel %vm6428_vm3, %v6590_v38, %v6589_v55  ;;  %v530_v60 = vrot.slane %v4338_v39, %v4314_v13  ;;  %v6593_v63 = vld [vmem:[#allocation25_spill] sm:$0xff] }
 0x23e   :  { %v401_v34 = vadd.f32 %v399_v8, %v380_v37  ;;  %v440_v14 = vmul.f32 %v436_v0, %v426_v3  ;;  %vm6430_vm1 = vcmask 900096   ;;  %v478_v62 = vsel %vm6427_vm15, %v6592_v45, %v6591_v59  ;;  %v6595_v8 = vld [vmem:[#allocation23_spill] sm:$0xff]  ;;  %v6604_v59 = vld [vmem:[#allocation24_spill] sm:$0xff] }
 0x23f   :  { %v421_v26 = vadd.f32 %v419_v16, %v400_v30  ;;  %v481_v58 = vmul.f32 %v477_v41, %v467_v15  ;;  %v519_v46 = vsel %vm6429_vm2, %v6594_v4, %v6593_v63  ;;  %v551_v47 = vrot.slane %v4414_v56, %v4231_v23  ;;  %v6597_v30 = vld [vmem:[#allocation29_spill] sm:$0xff]  ;;  %v6606_v63 = vld [vmem:[#allocation30_spill] sm:$0xff] }
 0x240   :  { %v4393_v49 = vpop.permute.xlu1 %1214  ;;  %v422_v10 = vadd.f32 %v420_v25, %v401_v34  ;;  %v461_v16 = vmul.f32 %v457_v54, %v446_v9  ;;  %v502_v39 = vmul.f32 %v498_v22, %v488_v53  ;;  %v499_v28 = vsel %vm6428_vm3, %v6596_v27, %v6595_v8  ;;  %v6600_v25 = vld [vmem:[#allocation20_spill] sm:$0xff]  ;;  %v6601_v34 = vld [vmem:[#allocation33_spill] sm:$0xff] }
 0x241   :  { %v4391_v48 = vpop.permute.xlu0 %1196  ;;  %v441_v61 = vadd.f32 %v439_v52, %v421_v26  ;;  %v6598_v52 = vld [vmem:[#allocation22_spill] sm:$0xff]  ;;  %v572_v0 = vrot.slane %v4414_v56, %v4233_v5  ;;  %vm581_vm15 = vcmask 637952   ;;  %v482_v9 = vmul.f32 %v478_v62, %v467_v15  ;;  %v6599_v26 = vld [vmem:[#allocation27_spill] sm:$0xff]  ;;  %v6605_v62 = vld [vmem:[#allocation37_spill] sm:$0xff] }
 0x242   :  { %v540_v37 = vsel %vm6430_vm1, %v6598_v52, %v6597_v30  ;;  %v442_v6 = vadd.f32 %v440_v14, %v422_v10  ;;  %v523_v41 = vmul.f32 %v519_v46, %v509_v19  ;;  %v561_v29 = vsel %vm560_vm4, %v6602_v32, %v6601_v34  ;;  %v6608_v8 = vld [vmem:[#allocation28_spill] sm:$0xff]  ;;  %v6612_v34 = vld [vmem:[#allocation38_spill] sm:$0xff] }
 0x243   :  { %v462_v12 = vadd.f32 %v460_v36, %v441_v61  ;;  %v520_v36 = vsel %vm6429_vm2, %v6600_v25, %v6599_v26  ;;  %v593_v54 = vrot.slane %v4414_v56, %v4248_v1  ;;  %vm602_vm3 = vcmask 506880   ;;  %v6611_v25 = vld [vmem:[#allocation32_spill] sm:$0xff] }
 0x244   :  { %v4418_v57 = vpop.permute.xlu1 %1218  ;;  %v463_v55 = vadd.f32 %v461_v16, %v442_v6  ;;  %v503_v22 = vmul.f32 %v499_v28, %v488_v53  ;;  %v544_v61 = vmul.f32 %v540_v37, %v530_v60  ;;  %v582_v4 = vsel %vm581_vm15, %v6606_v63, %v6605_v62  ;;  %v6609_v28 = vld [vmem:[#allocation34_spill] sm:$0xff]  ;;  %v6616_v62 = vld [vmem:[#allocation141_spill] sm:$0xff] }
 0x245   :  { %v4416_v18 = vpop.permute.xlu0 %1200  ;;  %v483_v40 = vadd.f32 %v481_v58, %v462_v12  ;;  %v6603_v58 = vld [vmem:[#allocation31_spill] sm:$0xff]  ;;  %v614_v46 = vrot.slane %v4414_v56, %v4257_v24  ;;  %vm623_vm2 = vcmask 375808   ;;  %v524_v53 = vmul.f32 %v520_v36, %v509_v19 }
 0x246   :  { %v541_v45 = vsel %vm6430_vm1, %v6604_v59, %v6603_v58  ;;  %v484_v10 = vadd.f32 %v482_v9, %v463_v55  ;;  %v565_v16 = vmul.f32 %v561_v29, %v551_v47  ;;  %v603_v30 = vsel %vm602_vm3, %v6609_v28, %v3809_v35  ;;  %v6615_v59 = vld [vmem:[#allocation142_spill] sm:$0xff] }
 0x247   :  { %v504_v38 = vadd.f32 %v502_v39, %v483_v40  ;;  %v6607_v39 = vld [vmem:[#allocation35_spill] sm:$0xff]  ;;  %vm6436_vm1 = vcmask 244736   ;;  %v656_v52 = vrot.slane %v4414_v56, %v4292_v21  ;;  %v545_v40 = vmul.f32 %v541_v45, %v530_v60 }
 0x248   :  { %v4438_v3 = vpop.permute.xlu1 %1234  ;;  %v562_v27 = vsel %vm560_vm4, %v6608_v8, %v6607_v39  ;;  %v505_v37 = vadd.f32 %v503_v22, %v484_v10  ;;  %v586_v26 = vmul.f32 %v582_v4, %v572_v0  ;;  %v624_v35 = vsel %vm623_vm2, %v6612_v34, %v3825_v17  ;;  %v6613_v22 = vld [vmem:[#allocation42_spill] sm:$0xff]  ;;  %v6617_v4 = vld [vmem:[#allocation47_spill] sm:$0xff]  ;;  %v6618_v10 = vld [vmem:[#allocation41_spill] sm:$0xff] }
 0x249   :  { %v4436_v7 = vpop.permute.xlu0 %1216  ;;  %v525_v12 = vadd.f32 %v523_v41, %v504_v38  ;;  %v6610_v41 = vld [vmem:[#allocation39_spill] sm:$0xff]  ;;  %v635_v32 = vrot.slane %v4414_v56, %v4276_v31  ;;  %v566_v38 = vmul.f32 %v562_v27, %v551_v47  ;;  %v607_v60 = vmul.f32 %v603_v30, %v593_v54  ;;  %v6621_v27 = vld [vmem:[#allocation40_spill] sm:$0xff] }
 0x24a   :  { %v583_v36 = vsel %vm581_vm15, %v6611_v25, %v6610_v41  ;;  %v526_v29 = vadd.f32 %v524_v53, %v505_v37  ;;  %v657_v45 = vmul.f32 %v6615_v59, %v656_v52  ;;  %v658_v63 = vmul.f32 %v6616_v62, %v656_v52 }
 0x24b   :  { %v546_v6 = vadd.f32 %v544_v61, %v525_v12  ;;  %v6614_v61 = vld [vmem:[#allocation36_spill] sm:$0xff]  ;;  %v645_v12 = vsel %vm6436_vm1, %v6618_v10, %v6617_v4  ;;  %v587_v8 = vmul.f32 %v583_v36, %v572_v0  ;;  %v628_v28 = vmul.f32 %v624_v35, %v614_v46  ;;  %v6623_v36 = vld [vmem:[#allocation43_spill] sm:$0xff] }
 0x24c   :  { %v4458_v15 = vpop.permute.xlu1 %1238  ;;  %v604_v58 = vsel %vm602_vm3, %v6614_v61, %v6613_v22  ;;  %v547_v17 = vadd.f32 %v545_v40, %v526_v29  ;;  %v649_v25 = vmul.f32 %v645_v12, %v635_v32  ;;  %v663_v34 = vrot.slane %v657_v45, 1  ;;  %v4506_v40 = vld [vmem:[%s6401_s0 + $0x20] sm:$0x3]  ;;  %v6626_v45 = vld [vmem:[#allocation44_spill] sm:$0xff] }
 0x24d   :  { %v4456_v14 = vpop.permute.xlu0 %1220  ;;  %v567_v55 = vadd.f32 %v565_v16, %v546_v6  ;;  %v6620_v16 = vld [vmem:[#allocation45_spill] sm:$0xff]  ;;  %v608_v41 = vmul.f32 %v604_v58, %v593_v54  ;;  %v664_v22 = vrot.slane %v658_v63, 1  ;;  %v659_v0 = vmul.f32 %v4506_v40, %v656_v52  ;;  %v6625_v58 = vld [vmem:[#allocation51_spill] sm:$0xff] }
 0x24e   :  { %v625_v30 = vsel %vm623_vm2, %v6621_v27, %v6620_v16  ;;  %v568_v37 = vadd.f32 %v566_v38, %v547_v17  ;;  %v675_v54 = vrot.slane %v4414_v56, %v4302_v20  ;;  %v684_v63 = vsel %vm246_vm5, %v6626_v45, %v6625_v58  ;;  %v6635_v58 = vld [vmem:[#allocation57_spill] sm:$0xff]  ;;  %v6636_v45 = vld [vmem:[#allocation50_spill] sm:$0xff] }
 0x24f   :  { %v588_v39 = vadd.f32 %v586_v26, %v567_v55  ;;  %v6622_v26 = vld [vmem:[#allocation49_spill] sm:$0xff]  ;;  %v629_v61 = vmul.f32 %v625_v30, %v614_v46  ;;  %v695_v12 = vrot.slane %v4414_v56, %v4314_v13  ;;  %v665_v17 = vsel %vm6432_vm0, %v663_v34, %v664_v22  ;;  %v6634_v34 = vld [vmem:[#allocation52_spill] sm:$0xff] }
 0x250   :  { %v4478_v19 = vpop.permute.xlu1 %1254  ;;  %v646_v35 = vsel %vm6436_vm1, %v6623_v36, %v6622_v26  ;;  %v589_v29 = vadd.f32 %v587_v8, %v568_v37  ;;  %v4526_v46 = vld [vmem:[%s6402_s1 + $0x18] sm:$0xff]  ;;  %v6627_v8 = vld [vmem:[#allocation55_spill] sm:$0xff]  ;;  %v688_v30 = vmul.f32 %v684_v63, %v675_v54  ;;  %v705_v63 = vsel %vm267_vm6, %v6636_v45, %v6635_v58  ;;  %v6645_v45 = vld [vmem:[#allocation58_spill] sm:$0xff] }
 0x251   :  { %v4476_v9 = vpop.permute.xlu0 %1236  ;;  %v609_v6 = vadd.f32 %v607_v60, %v588_v39  ;;  %v650_v10 = vmul.f32 %v646_v35, %v635_v32  ;;  %v666_v39 = vrot.slane %v659_v0, 1  ;;  %v715_v32 = vrot.slane %v4526_v46, %v4231_v23  ;;  %v6633_v26 = vld [vmem:[#allocation59_spill] sm:$0xff]  ;;  %v6644_v58 = vld [vmem:[#allocation65_spill] sm:$0xff] }
 0x252   :  { %v610_v4 = vadd.f32 %v608_v41, %v589_v29  ;;  %v6632_v41 = vld [vmem:[#allocation46_spill] sm:$0xff]  ;;  %v724_v0 = vsel %vm288_vm7, %v6634_v34, %v6633_v26  ;;  %v6643_v26 = vld [vmem:[#allocation60_spill] sm:$0xff] }
 0x253   :  { %v630_v55 = vadd.f32 %v628_v28, %v609_v6  ;;  %v6628_v28 = vld [vmem:[#allocation48_spill] sm:$0xff]  ;;  %v6631_v6 = vld [vmem:[#allocation53_spill] sm:$0xff]  ;;  %v728_v42 = vmul.f32 %v724_v0, %v715_v32  ;;  %v709_v0 = vmul.f32 %v705_v63, %v695_v12  ;;  %v6652_v63 = vld [vmem:[#allocation78_spill] sm:$0xff] }
 0x254   :  { %v4498_v47 = vpop.permute.xlu1 %1258  ;;  %v704_v16 = vsel %vm267_vm6, %v6628_v28, %v6627_v8  ;;  %v631_v27 = vadd.f32 %v629_v61, %v610_v4  ;;  %v667_v61 = vsel %vm6432_vm0, %v664_v22, %v666_v39  ;;  %v6637_v4 = vld [vmem:[#allocation63_spill] sm:$0xff]  ;;  %v6638_v8 = vld [vmem:[#allocation56_spill] sm:$0xff]  ;;  %v6641_v22 = vld [vmem:[#allocation54_spill] sm:$0xff]  ;;  %vm6676_vm0 = vcmask 384000  }
 0x255   :  { %v4496_v53 = vpop.permute.xlu0 %1240  ;;  %6619 = vst [vmem:[#allocation17_spill] sm:$0xff] %v4498_v47  ;;  %v651_v52 = vadd.f32 %v649_v25, %v630_v55  ;;  %v685_v25 = vsel %vm246_vm5, %v6632_v41, %v6631_v6  ;;  %v708_v29 = vmul.f32 %v704_v16, %v695_v12  ;;  %v735_v55 = vrot.slane %v4526_v46, %v4233_v5  ;;  %v6640_v16 = vld [vmem:[#allocation61_spill] sm:$0xff] }
 0x256   :  { %v652_v35 = vadd.f32 %v650_v10, %v631_v27  ;;  %v744_v28 = vsel %vm309_vm8, %v6638_v8, %v6637_v4  ;;  %v689_v41 = vmul.f32 %v685_v25, %v675_v54  ;;  %v725_v39 = vsel %vm288_vm7, %v6641_v22, %v6640_v16  ;;  %v6642_v27 = vld [vmem:[#allocation67_spill] sm:$0xff]  ;;  %v6646_v8 = vld [vmem:[#allocation74_spill] sm:$0xff]  ;;  %v6650_v12 = vld [vmem:[#allocation69_spill] sm:$0xff] }
 0x257   :  { %v670_v36 = vadd.f32 %v665_v17, %v651_v52  ;;  %v755_v52 = vrot.slane %v4526_v46, %v4248_v1  ;;  %v764_v34 = vsel %vm330_vm9, %v6643_v26, %v6642_v27  ;;  %v745_v4 = vsel %vm309_vm8, %v6645_v45, %v6644_v58  ;;  %v6657_v45 = vld [vmem:[#allocation75_spill] sm:$0xff] }
 0x258   :  { %v4516_v60 = vpop.permute.xlu1 %1274  ;;  %v671_v54 = vadd.f32 %v667_v61, %v652_v35  ;;  %v795_v16 = vrot.slane %v4526_v46, %v4276_v31  ;;  %v729_v26 = vmul.f32 %v725_v39, %v715_v32  ;;  %v6654_v39 = vld [vmem:[#allocation76_spill] sm:$0xff] }
 0x259   :  { %v4514_v38 = vpop.permute.xlu0 %1256  ;;  %6624 = vst [vmem:[#allocation12_spill] sm:$0xff] %v4516_v60  ;;  %v690_v6 = vadd.f32 %v688_v30, %v670_v36  ;;  %v775_v30 = vrot.slane %v4526_v46, %v4257_v24  ;;  %v748_v36 = vmul.f32 %v744_v28, %v735_v55  ;;  %v768_v47 = vmul.f32 %v764_v34, %v755_v52  ;;  %v6653_v28 = vld [vmem:[#allocation68_spill] sm:$0xff]  ;;  %v6655_v34 = vld [vmem:[#allocation66_spill] sm:$0xff] }
 0x25a   :  { %v691_v22 = vadd.f32 %v689_v41, %v671_v54  ;;  %v785_v54 = vsel %vm351_vm10, %v6655_v34, %v6654_v39 }
 0x25b   :  { %v710_v25 = vadd.f32 %v708_v29, %v690_v6  ;;  %v6651_v29 = vld [vmem:[#allocation62_spill] sm:$0xff]  ;;  %v804_v6 = vsel %vm372_vm11, %v6653_v28, %v6652_v63 }
 0x25c   :  { %v4536_v56 = vpop.permute.xlu1 %1278  ;;  %v765_v61 = vsel %vm330_vm9, %v6651_v29, %v6650_v12  ;;  %v711_v58 = vadd.f32 %v709_v0, %v691_v22  ;;  %v835_v12 = vrot.slane %v4526_v46, %v4302_v20  ;;  %v6663_v22 = vld [vmem:[#allocation79_spill] sm:$0xff] }
 0x25d   :  { %v4534_v37 = vpop.permute.xlu0 %1260  ;;  %6630 = vst [vmem:[#allocation11_spill] sm:$0xff] %v4536_v56  ;;  %v6647_v56 = vld [vmem:[#allocation64_spill] sm:$0xff]  ;;  %v730_v27 = vadd.f32 %v728_v42, %v710_v25  ;;  %v749_v42 = vmul.f32 %v745_v4, %v735_v55  ;;  %v6656_v25 = vld [vmem:[#allocation82_spill] sm:$0xff]  ;;  %v769_v28 = vmul.f32 %v765_v61, %v755_v52 }
 0x25e   :  { %6629 = vst [vmem:[#allocation15_spill] sm:$0xff] %v4534_v37  ;;  %v731_v29 = vadd.f32 %v729_v26, %v711_v58  ;;  %v6660_v55 = vld [vmem:[#allocation80_spill] sm:$0xff]  ;;  %v6662_v4 = vld [vmem:[#allocation86_spill] sm:$0xff] }
 0x25f   :  { %v750_v41 = vadd.f32 %v748_v36, %v730_v27  ;;  %v844_v27 = vsel %vm6433_vm13, %v6663_v22, %v6662_v4  ;;  %v6664_v26 = vld [vmem:[#allocation84_spill] sm:$0xff]  ;;  %v41_v61 = vld [vmem:[%s6402_s1 + $0x20] sm:$0xff] }
 0x260   :  { %v4557_v17 = vpop.permute.xlu1 %1294  ;;  %v751_v39 = vadd.f32 %v749_v42, %v731_v29  ;;  %v6668_v42 = vld [vmem:[#allocation88_spill] sm:$0xff]  ;;  %v863_v4 = vrot.slane %v41_v61, %v4231_v23 }
 0x261   :  { %v4555_v10 = vpop.permute.xlu0 %1276  ;;  %6639 = vst [vmem:[#allocation21_spill] sm:$0xff] %v4557_v17  ;;  %v784_v17 = vsel %vm351_vm10, %v6647_v56, %v6646_v8  ;;  %v815_v56 = vrot.slane %v4526_v46, %v4292_v21  ;;  %v824_v8 = vsel %vm6435_vm12, %v6657_v45, %v6656_v25  ;;  %v770_v63 = vadd.f32 %v768_v47, %v750_v41  ;;  %v6665_v47 = vld [vmem:[#allocation77_spill] sm:$0xff] }
 0x262   :  { %v788_v32 = vmul.f32 %v784_v17, %v775_v30  ;;  %v6661_v17 = vld [vmem:[#allocation73_spill] sm:$0xff]  ;;  %v789_v25 = vmul.f32 %v785_v54, %v775_v30  ;;  %v825_v52 = vsel %vm6435_vm12, %v6665_v47, %v6664_v26  ;;  %v855_v30 = vrot.slane %v4526_v46, %v4314_v13  ;;  %v6674_v26 = vld [vmem:[#allocation94_spill] sm:$0xff]  ;;  %v6675_v47 = vld [vmem:[#allocation87_spill] sm:$0xff] }
 0x263   :  { %v805_v36 = vsel %vm372_vm11, %v6661_v17, %v6660_v55  ;;  %v828_v45 = vmul.f32 %v824_v8, %v815_v56  ;;  %v848_v55 = vmul.f32 %v844_v27, %v835_v12  ;;  %vm6695_vm12 = vcmask 900096  }
 0x264   :  { %v4577_v35 = vpop.permute.xlu1 %1298  ;;  %v790_v34 = vadd.f32 %v788_v32, %v770_v63  ;;  %v809_v41 = vmul.f32 %v805_v36, %v795_v16  ;;  %v6669_v32 = vld [vmem:[#allocation81_spill] sm:$0xff]  ;;  %v829_v63 = vmul.f32 %v825_v52, %v815_v56 }
 0x265   :  { %v4575_v37 = vpop.permute.xlu0 %1280  ;;  %6649 = vst [vmem:[#allocation19_spill] sm:$0xff] %v4577_v35  ;;  %v808_v35 = vmul.f32 %v804_v6, %v795_v16  ;;  %v771_v6 = vadd.f32 %v769_v28, %v751_v39  ;;  %v845_v54 = vsel %vm6433_vm13, %v6669_v32, %v6668_v42  ;;  %v6670_v28 = vld [vmem:[#allocation90_spill] sm:$0xff]  ;;  %v883_v39 = vrot.slane %v41_v61, %v4233_v5  ;;  %v6677_v56 = vld [vmem:[#allocation9_spill] sm:$0xff]  ;;  %v6678_v42 = vld [vmem:[#allocation92_spill] sm:$0xff] }
 0x266   :  { %6648 = vst [vmem:[#allocation14_spill] sm:$0xff] %v4575_v37  ;;  %v849_v27 = vmul.f32 %v845_v54, %v835_v12  ;;  %v6681_v32 = vld [vmem:[#allocation91_spill] sm:$0xff]  ;;  %vm6682_vm13 = vcmask 252928  }
 0x267   :  { %v810_v58 = vadd.f32 %v808_v35, %v790_v34  ;;  %v791_v8 = vadd.f32 %v789_v25, %v771_v6  ;;  %v6671_v35 = vld [vmem:[#allocation83_spill] sm:$0xff]  ;;  %v892_v25 = vsel %vm6676_vm0, %v6675_v47, %v6674_v26 }
 0x268   :  { %v4597_v0 = vpop.permute.xlu1 %1314  ;;  %v872_v16 = vsel %vm6434_vm14, %v6671_v35, %v6670_v28  ;;  %v896_v28 = vmul.f32 %v892_v25, %v883_v39  ;;  %v923_v35 = vrot.slane %v41_v61, %v4257_v24  ;;  %v943_v25 = vrot.slane %v41_v61, %v4276_v31 }
 0x269   :  { %v4595_v37 = vpop.permute.xlu0 %1296  ;;  %6659 = vst [vmem:[#allocation25_spill] sm:$0xff] %v4597_v0  ;;  %v830_v29 = vadd.f32 %v828_v45, %v810_v58  ;;  %v811_v36 = vadd.f32 %v809_v41, %v791_v8  ;;  %v856_v45 = vmul.f32 %v855_v30, %v6677_v56  ;;  %v876_v6 = vmul.f32 %v872_v16, %v863_v4  ;;  %v6679_v41 = vld [vmem:[#allocation85_spill] sm:$0xff] }
 0x26a   :  { %6658 = vst [vmem:[#allocation13_spill] sm:$0xff] %v4595_v37  ;;  %v903_v58 = vrot.slane %v41_v61, %v4248_v1  ;;  %v873_v12 = vsel %vm6434_vm14, %v6679_v41, %v6678_v42  ;;  %v6687_v56 = vld [vmem:[#allocation89_spill] sm:$0xff]  ;;  %v6688_v42 = vld [vmem:[#allocation102_spill] sm:$0xff]  ;;  %v6689_v41 = vld [vmem:[#allocation95_spill] sm:$0xff]  ;;  %vm6690_vm14 = vcmask 1031168  }
 0x26b   :  { %v850_v22 = vadd.f32 %v848_v55, %v830_v29  ;;  %v831_v52 = vadd.f32 %v829_v63, %v811_v36  ;;  %v6680_v55 = vld [vmem:[#allocation98_spill] sm:$0xff]  ;;  %v6686_v36 = vld [vmem:[#allocation96_spill] sm:$0xff] }
 0x26c   :  { %v4613_v0 = vpop.permute.xlu1 %1318  ;;  %v912_v54 = vsel %vm6682_vm13, %v6681_v32, %v6680_v55  ;;  %v6685_v63 = vld [vmem:[#allocation10_spill] sm:$0xff] }
 0x26d   :  { %v4611_v17 = vpop.permute.xlu0 %1300  ;;  %6667 = vst [vmem:[#allocation23_spill] sm:$0xff] %v4613_v0  ;;  %v858_v8 = vadd.f32 %v856_v45, %v850_v22  ;;  %v851_v29 = vadd.f32 %v849_v27, %v831_v52  ;;  %v857_v16 = vmul.f32 %v855_v30, %v6685_v63  ;;  %v893_v0 = vsel %vm6676_vm0, %v6687_v56, %v6686_v36  ;;  %v6691_v45 = vld [vmem:[#allocation100_spill] sm:$0xff]  ;;  %v6692_v52 = vld [vmem:[#allocation93_spill] sm:$0xff] }
 0x26e   :  { %6666 = vst [vmem:[#allocation18_spill] sm:$0xff] %v4611_v17  ;;  %v877_v22 = vmul.f32 %v873_v12, %v863_v4  ;;  %v916_v27 = vmul.f32 %v912_v54, %v903_v58  ;;  %v913_v32 = vsel %vm6682_vm13, %v6692_v52, %v6691_v45  ;;  %v963_v63 = vrot.slane %v41_v61, %v4292_v21  ;;  %v6699_v12 = vld [vmem:[#allocation97_spill] sm:$0xff] }
 0x26f   :  { %v878_v55 = vadd.f32 %v876_v6, %v858_v8  ;;  %v859_v36 = vadd.f32 %v857_v16, %v851_v29  ;;  %v897_v17 = vmul.f32 %v893_v0, %v883_v39  ;;  %v6698_v6 = vld [vmem:[#allocation104_spill] sm:$0xff]  ;;  %v6700_v8 = vld [vmem:[#allocation110_spill] sm:$0xff]  ;;  %v917_v29 = vmul.f32 %v913_v32, %v903_v58  ;;  %v4674_v0 = vld [vmem:[%s6402_s1 + $0x28] sm:$0xff] }
 0x270   :  { %v4627_v46 = vpop.permute.xlu1 %1334  ;;  %v933_v54 = vsel %vm6690_vm14, %v6699_v12, %v6698_v6  ;;  %v6702_v39 = vld [vmem:[#allocation108_spill] sm:$0xff]  ;;  %v6705_v6 = vld [vmem:[#allocation107_spill] sm:$0xff]  ;;  %vm6728_vm0 = vcmask 1045504  }
 0x271   :  { %v4625_v34 = vpop.permute.xlu0 %1316  ;;  %6673 = vst [vmem:[#allocation29_spill] sm:$0xff] %v4627_v46  ;;  %v932_v46 = vsel %vm6690_vm14, %v6689_v41, %v6688_v42  ;;  %v898_v56 = vadd.f32 %v896_v28, %v878_v55  ;;  %v6701_v41 = vld [vmem:[#allocation103_spill] sm:$0xff]  ;;  %v6704_v55 = vld [vmem:[#allocation114_spill] sm:$0xff]  ;;  %vm6735_vm13 = vmmov %vm6728_vm0  ;;  %vm6743_vm14 = vcmask 908288  }
 0x272   :  { %6672 = vst [vmem:[#allocation16_spill] sm:$0xff] %v4625_v34  ;;  %v936_v34 = vmul.f32 %v932_v46, %v923_v35  ;;  %v972_v45 = vsel %vm560_vm4, %v6701_v41, %v6700_v8  ;;  %v6703_v46 = vld [vmem:[#allocation101_spill] sm:$0xff]  ;;  %v992_v12 = vsel %vm581_vm15, %v6705_v6, %v6704_v55  ;;  %v1003_v8 = vrot.slane %v41_v61, %v4314_v13  ;;  %v6714_v6 = vld [vmem:[#allocation122_spill] sm:$0xff] }
 0x273   :  { %v918_v52 = vadd.f32 %v916_v27, %v898_v56  ;;  %v953_v16 = vsel %vm6695_vm12, %v6703_v46, %v6702_v39  ;;  %v937_v27 = vmul.f32 %v933_v54, %v923_v35  ;;  %v976_v58 = vmul.f32 %v972_v45, %v963_v63  ;;  %v6709_v56 = vld [vmem:[#allocation105_spill] sm:$0xff]  ;;  %v6711_v39 = vld [vmem:[#allocation111_spill] sm:$0xff]  ;;  %v6712_v45 = vld [vmem:[#allocation116_spill] sm:$0xff] }
 0x274   :  { %v4643_v47 = vpop.permute.xlu1 %1338  ;;  %v1023_v55 = vrot.slane %v4674_v0, %v4231_v23  ;;  %v957_v35 = vmul.f32 %v953_v16, %v943_v25 }
 0x275   :  { %v4641_v26 = vpop.permute.xlu0 %1320  ;;  %6684 = vst [vmem:[#allocation27_spill] sm:$0xff] %v4643_v47  ;;  %v6693_v47 = vld [vmem:[#allocation106_spill] sm:$0xff] }
 0x276   :  { %6683 = vst [vmem:[#allocation22_spill] sm:$0xff] %v4641_v26  ;;  %v6694_v26 = vld [vmem:[#allocation99_spill] sm:$0xff] }
 0x277   :  { %v952_v30 = vsel %vm6695_vm12, %v6694_v26, %v6693_v47  ;;  %v983_v26 = vrot.slane %v41_v61, %v4302_v20  ;;  %v879_v47 = vadd.f32 %v877_v22, %v859_v36  ;;  %v938_v22 = vadd.f32 %v936_v34, %v918_v52  ;;  %v6708_v36 = vld [vmem:[#allocation112_spill] sm:$0xff] }
 0x278   :  { %v4662_v4 = vpop.permute.xlu1 %1354  ;;  %v956_v28 = vmul.f32 %v952_v30, %v943_v25  ;;  %v1063_v61 = vrot.slane %v4674_v0, %v4248_v1  ;;  %v6718_v25 = vld [vmem:[#allocation120_spill] sm:$0xff]  ;;  %vm6744_vm12 = vcmask 777216  }
 0x279   :  { %v4660_v42 = vpop.permute.xlu0 %1336  ;;  %6697 = vst [vmem:[#allocation33_spill] sm:$0xff] %v4662_v4  ;;  %v899_v41 = vadd.f32 %v897_v17, %v879_v47  ;;  %v973_v4 = vsel %vm560_vm4, %v6709_v56, %v6708_v36  ;;  %v996_v54 = vmul.f32 %v992_v12, %v983_v26  ;;  %v6713_v47 = vld [vmem:[#allocation109_spill] sm:$0xff]  ;;  %v6715_v36 = vld [vmem:[#allocation115_spill] sm:$0xff]  ;;  %v6720_v12 = vld [vmem:[#allocation126_spill] sm:$0xff] }
 0x27a   :  { %6696 = vst [vmem:[#allocation20_spill] sm:$0xff] %v4660_v42  ;;  %v6710_v42 = vld [vmem:[#allocation118_spill] sm:$0xff]  ;;  %v958_v34 = vadd.f32 %v956_v28, %v938_v22  ;;  %v993_v52 = vsel %vm581_vm15, %v6713_v47, %v6712_v45  ;;  %v1032_v56 = vsel %vm623_vm2, %v6715_v36, %v6714_v6  ;;  %v6719_v28 = vld [vmem:[#allocation113_spill] sm:$0xff]  ;;  %v1064_v45 = vmul.f32 %v6615_v59, %v1063_v61 }
 0x27b   :  { %v1012_v46 = vsel %vm602_vm3, %v6711_v39, %v6710_v42  ;;  %v919_v17 = vadd.f32 %v917_v29, %v899_v41  ;;  %v1043_v42 = vrot.slane %v4674_v0, %v4233_v5  ;;  %v1013_v16 = vsel %vm602_vm3, %v6719_v28, %v6718_v25  ;;  %v6721_v41 = vld [vmem:[#allocation119_spill] sm:$0xff]  ;;  %v6725_v59 = vld [vmem:[#allocation121_spill] sm:$0xff] }
 0x27c   :  { %v4685_v30 = vpop.permute.xlu1 %1358  ;;  %v1016_v37 = vmul.f32 %v1012_v46, %v1003_v8  ;;  %v1052_v22 = vsel %vm6436_vm1, %v6721_v41, %v6720_v12  ;;  %v1065_v47 = vmul.f32 %v6616_v62, %v1063_v61  ;;  %v6722_v46 = vld [vmem:[#allocation124_spill] sm:$0xff] }
 0x27d   :  { %v4683_v32 = vpop.permute.xlu0 %1340  ;;  %6707 = vst [vmem:[#allocation31_spill] sm:$0xff] %v4685_v30  ;;  %v939_v39 = vadd.f32 %v937_v27, %v919_v17  ;;  %v978_v30 = vadd.f32 %v976_v58, %v958_v34  ;;  %v6723_v17 = vld [vmem:[#allocation117_spill] sm:$0xff]  ;;  %v1056_v25 = vmul.f32 %v1052_v22, %v1043_v42  ;;  %v6724_v12 = vld [vmem:[#allocation128_spill] sm:$0xff] }
 0x27e   :  { %6706 = vst [vmem:[#allocation26_spill] sm:$0xff] %v4683_v32  ;;  %v977_v32 = vmul.f32 %v973_v4, %v963_v63  ;;  %v997_v63 = vmul.f32 %v993_v52, %v983_v26  ;;  %v1036_v4 = vmul.f32 %v1032_v56, %v1023_v55  ;;  %v1033_v34 = vsel %vm623_vm2, %v6723_v17, %v6722_v46  ;;  %v6732_v17 = vld [vmem:[#allocation125_spill] sm:$0xff] }
 0x27f   :  { %v959_v27 = vadd.f32 %v957_v35, %v939_v39  ;;  %v998_v58 = vadd.f32 %v996_v54, %v978_v30  ;;  %v1053_v62 = vsel %vm6436_vm1, %v6725_v59, %v6724_v12  ;;  %v1071_v35 = vrot.slane %v1064_v45, 2 }
 0x280   :  { %v4707_v29 = vpop.permute.xlu1 %1374  ;;  %v1072_v30 = vrot.slane %v1065_v47, 2  ;;  %v1066_v26 = vmul.f32 %v4506_v40, %v1063_v61  ;;  %v1037_v56 = vmul.f32 %v1033_v34, %v1023_v55  ;;  %v1057_v22 = vmul.f32 %v1053_v62, %v1043_v42  ;;  %v6729_v61 = vld [vmem:[#allocation134_spill] sm:$0xff]  ;;  %v6731_v42 = vld [vmem:[#allocation132_spill] sm:$0xff] }
 0x281   :  { %v4705_v60 = vpop.permute.xlu0 %1356  ;;  %6717 = vst [vmem:[#allocation37_spill] sm:$0xff] %v4707_v29  ;;  %v979_v6 = vadd.f32 %v977_v32, %v959_v27  ;;  %v1018_v36 = vadd.f32 %v1016_v37, %v998_v58  ;;  %v1017_v29 = vmul.f32 %v1013_v16, %v1003_v8  ;;  %v1083_v37 = vrot.slane %v4674_v0, %v4257_v24  ;;  %v6726_v8 = vld [vmem:[#allocation130_spill] sm:$0xff]  ;;  %v6727_v32 = vld [vmem:[#allocation123_spill] sm:$0xff] }
 0x282   :  { %6716 = vst [vmem:[#allocation24_spill] sm:$0xff] %v4705_v60  ;;  %v1102_v39 = vsel %vm246_vm5, %v6727_v32, %v6726_v8  ;;  %v1113_v27 = vrot.slane %v4674_v0, %v4276_v31  ;;  %v1073_v40 = vsel %vm6728_vm0, %v1071_v35, %v1072_v30  ;;  %v1074_v55 = vrot.slane %v1066_v26, 2  ;;  %v6730_v58 = vld [vmem:[#allocation127_spill] sm:$0xff]  ;;  %v4756_v26 = vld [vmem:[%s6402_s1 + $0x30] sm:$0xff]  ;;  %v6737_v32 = vld [vmem:[#allocation129_spill] sm:$0xff] }
 0x283   :  { %v999_v54 = vadd.f32 %v997_v63, %v979_v6  ;;  %v1038_v52 = vadd.f32 %v1036_v4, %v1018_v36  ;;  %v1122_v63 = vsel %vm267_vm6, %v6730_v58, %v6729_v61  ;;  %v1106_v46 = vmul.f32 %v1102_v39, %v1083_v37  ;;  %v6733_v6 = vld [vmem:[#allocation138_spill] sm:$0xff]  ;;  %v6734_v36 = vld [vmem:[#allocation131_spill] sm:$0xff]  ;;  %v6736_v8 = vld [vmem:[#allocation136_spill] sm:$0xff] }
 0x284   :  { %v4722_v60 = vpop.permute.xlu1 %1378  ;;  %v1103_v34 = vsel %vm246_vm5, %v6732_v17, %v6731_v42  ;;  %v1126_v62 = vmul.f32 %v1122_v63, %v1113_v27  ;;  %v1153_v35 = vrot.slane %v4674_v0, %v4302_v20  ;;  %v1123_v39 = vsel %vm267_vm6, %v6737_v32, %v6736_v8  ;;  %v6739_v63 = vld [vmem:[#allocation140_spill] sm:$0xff]  ;;  %vm6745_vm0 = vmmov %vm6743_vm14 }
 0x285   :  { %v4720_v28 = vpop.permute.xlu0 %1360  ;;  %v1019_v16 = vadd.f32 %v1017_v29, %v999_v54  ;;  %v1058_v41 = vadd.f32 %v1056_v25, %v1038_v52  ;;  %v1133_v29 = vrot.slane %v4674_v0, %v4292_v21  ;;  %v1142_v25 = vsel %vm288_vm7, %v6734_v36, %v6733_v6 }
 0x286   :  { %v1173_v58 = vrot.slane %v4674_v0, %v4314_v13  ;;  %v1193_v17 = vrot.slane %v4756_v26, %v4231_v23  ;;  %v6742_v0 = vld [vmem:[#allocation137_spill] sm:$0xff]  ;;  %v1222_v32 = vsel %vm372_vm11, %v4393_v49, %v4436_v7 }
 0x287   :  { %v1039_v4 = vadd.f32 %v1037_v56, %v1019_v16  ;;  %v1078_v59 = vadd.f32 %v1073_v40, %v1058_v41  ;;  %v1075_v56 = vsel %vm6735_vm13, %v1072_v30, %v1074_v55  ;;  %v6738_v16 = vld [vmem:[#allocation135_spill] sm:$0xff]  ;;  %v1107_v40 = vmul.f32 %v1103_v34, %v1083_v37 }
 0x288   :  { %v4737_v47 = vpop.permute.xlu1 %1394  ;;  %v1162_v41 = vsel %vm309_vm8, %v6738_v16, %v4298_v43  ;;  %v1146_v61 = vmul.f32 %v1142_v25, %v1133_v29  ;;  %v6741_v30 = vld [vmem:[#allocation139_spill] sm:$0xff]  ;;  %v1127_v43 = vmul.f32 %v1123_v39, %v1113_v27  ;;  %v1163_v25 = vsel %vm309_vm8, %v6742_v0, %v4321_v33  ;;  %v6751_v0 = vld [vmem:[#allocation13_spill] sm:$0xff] }
 0x289   :  { %v4735_v45 = vpop.permute.xlu0 %1376  ;;  %v1059_v12 = vadd.f32 %v1057_v22, %v1039_v4  ;;  %v1108_v22 = vadd.f32 %v1106_v46, %v1078_v59  ;;  %v6740_v4 = vld [vmem:[#allocation133_spill] sm:$0xff]  ;;  %v1182_v55 = vsel %vm330_vm9, %v6741_v30, %v4348_v50  ;;  %v1166_v46 = vmul.f32 %v1162_v41, %v1153_v35 }
 0x28a   :  { %v1143_v42 = vsel %vm288_vm7, %v6740_v4, %v6739_v63  ;;  %v1202_v59 = vsel %vm351_vm10, %v4350_v51, %v4391_v48  ;;  %v1213_v50 = vrot.slane %v4756_v26, %v4233_v5  ;;  %v1186_v27 = vmul.f32 %v1182_v55, %v1173_v58 }
 0x28b   :  { %v1079_v6 = vadd.f32 %v1075_v56, %v1059_v12  ;;  %v1128_v36 = vadd.f32 %v1126_v62, %v1108_v22  ;;  %v1147_v62 = vmul.f32 %v1143_v42, %v1133_v29  ;;  %v1183_v56 = vsel %vm330_vm9, %v4323_v11, %v4370_v2 }
 0x28c   :  { %v4760_v52 = vpop.permute.xlu1 %1398  ;;  %v1233_v33 = vrot.slane %v4756_v26, %v4248_v1  ;;  %v1167_v48 = vmul.f32 %v1163_v25, %v1153_v35  ;;  %v1206_v16 = vmul.f32 %v1202_v59, %v1193_v17  ;;  %v1203_v29 = vsel %vm351_vm10, %v4372_v44, %v4416_v18  ;;  %v6752_v25 = vld [vmem:[#allocation21_spill] sm:$0xff] }
 0x28d   :  { %v4758_v54 = vpop.permute.xlu0 %1380  ;;  %v1109_v8 = vadd.f32 %v1107_v40, %v1079_v6  ;;  %v1148_v12 = vadd.f32 %v1146_v61, %v1128_v36  ;;  %v1242_v11 = vsel %vm6743_vm14, %v4438_v3, %v4476_v9  ;;  %v1253_v2 = vrot.slane %v4756_v26, %v4257_v24  ;;  %vm6750_vm14 = vmmov %vm6744_vm12 }
 0x28e   :  { %v1187_v40 = vmul.f32 %v1183_v56, %v1173_v58  ;;  %v1226_v35 = vmul.f32 %v1222_v32, %v1213_v50  ;;  %v1223_v61 = vsel %vm372_vm11, %v4418_v57, %v4456_v14  ;;  %v1262_v63 = vsel %vm6744_vm12, %v4478_v19, %v4514_v38  ;;  %v6746_v57 = vld [vmem:[#allocation12_spill] sm:$0xff]  ;;  %v6754_v56 = vld [vmem:[#allocation14_spill] sm:$0xff]  ;;  %v6755_v32 = vld [vmem:[#allocation11_spill] sm:$0xff] }
 0x28f   :  { %v1129_v39 = vadd.f32 %v1127_v43, %v1109_v8  ;;  %v1168_v51 = vadd.f32 %v1166_v46, %v1148_v12  ;;  %v1273_v44 = vrot.slane %v4756_v26, %v4276_v31  ;;  %v1207_v9 = vmul.f32 %v1203_v29, %v1193_v17  ;;  %v6748_v17 = vld [vmem:[#allocation15_spill] sm:$0xff]  ;;  %v6749_v43 = vld [vmem:[#allocation17_spill] sm:$0xff] }
 0x290   :  { %v4781_v34 = vpop.permute.xlu1 %1414  ;;  %v1246_v4 = vmul.f32 %v1242_v11, %v1233_v33  ;;  %v1243_v58 = vsel %vm6745_vm0, %v4458_v15, %v4496_v53  ;;  %vm6747_vm13 = vcmask 646144   ;;  %v1293_v19 = vrot.slane %v4756_v26, %v4292_v21 }
 0x291   :  { %v4779_v37 = vpop.permute.xlu0 %1396  ;;  %v1149_v49 = vadd.f32 %v1147_v62, %v1129_v39  ;;  %v1188_v7 = vadd.f32 %v1186_v27, %v1168_v51  ;;  %v1282_v14 = vsel %vm6747_vm13, %v6746_v57, %v4555_v10  ;;  %v1227_v6 = vmul.f32 %v1223_v61, %v1213_v50  ;;  %v4840_v50 = vld [vmem:[%s6402_s1 + $0x38] sm:$0x7f]  ;;  %vm6756_vm0 = vmmov %vm6747_vm13  ;;  %v6757_v51 = vld [vmem:[#allocation16_spill] sm:$0xff]  ;;  %s3041_s1 = spop %3040 }
 0x292   :  { %v1266_v36 = vmul.f32 %v1262_v63, %v1253_v2  ;;  %v1263_v46 = vsel %vm6750_vm14, %v6749_v43, %v6748_v17  ;;  %vm6753_vm12 = vcmask 515072   ;;  %v1313_v15 = vrot.slane %v4756_v26, %v4302_v20  ;;  %v6763_v63 = vld [vmem:[#allocation20_spill] sm:$0xff]  ;;  %v6770_v17 = vld [vmem:[#allocation33_spill] sm:$0xff] }
 0x293   :  { %v1169_v18 = vadd.f32 %v1167_v48, %v1149_v49  ;;  %v1208_v3 = vadd.f32 %v1206_v16, %v1188_v7  ;;  %v1302_v59 = vsel %vm6753_vm12, %v6752_v25, %v6751_v0  ;;  %v1247_v8 = vmul.f32 %v1243_v58, %v1233_v33  ;;  %v6758_v48 = vld [vmem:[#allocation25_spill] sm:$0xff]  ;;  %vm6762_vm14 = vmmov %vm6753_vm12 }
 0x294   :  { %v4801_v22 = vpop.permute.xlu1 %1418  ;;  %v1286_v12 = vmul.f32 %v1282_v14, %v1273_v44  ;;  %v1283_v39 = vsel %vm6756_vm0, %v6755_v32, %v6754_v56  ;;  %vm6759_vm13 = vcmask 384000   ;;  %v1333_v33 = vrot.slane %v4756_v26, %v4314_v13 }
 0x295   :  { %v4799_v41 = vpop.permute.xlu0 %1400  ;;  %v1189_v38 = vadd.f32 %v1187_v40, %v1169_v18  ;;  %v1228_v55 = vadd.f32 %v1226_v35, %v1208_v3  ;;  %v1322_v16 = vsel %vm6759_vm13, %v6758_v48, %v6757_v51  ;;  %v1267_v49 = vmul.f32 %v1263_v46, %v1253_v2  ;;  %v6760_v40 = vld [vmem:[#allocation18_spill] sm:$0xff]  ;;  %v6761_v35 = vld [vmem:[#allocation19_spill] sm:$0xff]  ;;  %v6764_v18 = vld [vmem:[#allocation29_spill] sm:$0xff] }
 0x296   :  { %v1306_v7 = vmul.f32 %v1302_v59, %v1293_v19  ;;  %v1303_v61 = vsel %vm6762_vm14, %v6761_v35, %v6760_v40  ;;  %vm6765_vm12 = vcmask 252928   ;;  %v1287_v57 = vmul.f32 %v1283_v39, %v1273_v44  ;;  %v6767_v2 = vld [vmem:[#allocation23_spill] sm:$0xff]  ;;  %vm6768_vm0 = vmmov %vm6759_vm13 }
 0x297   :  { %v1209_v53 = vadd.f32 %v1207_v9, %v1189_v38  ;;  %v1248_v10 = vadd.f32 %v1246_v4, %v1228_v55  ;;  %v1342_v3 = vsel %vm6765_vm12, %v6764_v18, %v6763_v63  ;;  %v1353_v9 = vrot.slane %v4840_v50, %v4231_v23  ;;  %v6766_v55 = vld [vmem:[#allocation22_spill] sm:$0xff]  ;;  %v6773_v44 = vld [vmem:[#allocation27_spill] sm:$0xff]  ;;  %vm6774_vm14 = vmmov %vm6765_vm12 }
 0x298   :  { %v4819_v30 = vpop.permute.xlu1 %1434  ;;  %v1326_v14 = vmul.f32 %v1322_v16, %v1313_v15  ;;  %vm6771_vm13 = vcmask 1031168   ;;  %v1373_v46 = vrot.slane %v4840_v50, %v4233_v5  ;;  %v1307_v59 = vmul.f32 %v1303_v61, %v1293_v19 }
 0x299   :  { %v1417_v42 = vpop.permute.xlu0 %1416  ;;  %v1229_v29 = vadd.f32 %v1227_v6, %v1209_v53  ;;  %v1268_v11 = vadd.f32 %v1266_v36, %v1248_v10  ;;  %v1323_v6 = vsel %vm6768_vm0, %v6767_v2, %v6766_v55  ;;  %v6769_v36 = vld [vmem:[#allocation24_spill] sm:$0xff]  ;;  %v1346_v53 = vmul.f32 %v1342_v3, %v1333_v33  ;;  %v6772_v10 = vld [vmem:[#allocation26_spill] sm:$0xff]  ;;  %vm6778_vm0 = vmmov %vm6771_vm13 }
 0x29a   :  { %v1362_v43 = vsel %vm6771_vm13, %v6770_v17, %v6769_v36  ;;  %vm6776_vm12 = vcmask 900096   ;;  %v1393_v32 = vrot.slane %v4840_v50, %v4248_v1  ;;  %v1327_v48 = vmul.f32 %v1323_v6, %v1313_v15 }
 0x29b   :  { %v1249_v4 = vadd.f32 %v1247_v8, %v1229_v29  ;;  %v1288_v58 = vadd.f32 %v1286_v12, %v1268_v11  ;;  %v1343_v8 = vsel %vm6774_vm14, %v6773_v44, %v6772_v10  ;;  %v6775_v12 = vld [vmem:[#allocation37_spill] sm:$0xff]  ;;  %v1366_v16 = vmul.f32 %v1362_v43, %v1353_v9  ;;  %v6777_v11 = vld [vmem:[#allocation31_spill] sm:$0xff]  ;;  %vm6779_vm13 = vmmov %vm6776_vm12 }
 0x29c   :  { %v4842_v27 = vpop.permute.xlu1 %1438  ;;  %v1382_v56 = vsel %vm6776_vm12, %v6775_v12, %v4735_v45  ;;  %v1363_v19 = vsel %vm6778_vm0, %v6777_v11, %v4720_v28  ;;  %v1347_v35 = vmul.f32 %v1343_v8, %v1333_v33  ;;  %v1383_v15 = vsel %vm6779_vm13, %v4722_v60, %v4758_v54 }
 0x29d   :  { %v1421_v62 = vpop.permute.xlu0 %1420  ;;  %v1269_v0 = vadd.f32 %v1267_v49, %v1249_v4  ;;  %v1308_v25 = vadd.f32 %v1306_v7, %v1288_v58  ;;  %v1402_v49 = vsel %vm560_vm4, %v4737_v47, %v4779_v37  ;;  %v1413_v7 = vrot.slane %v4840_v50, %v4257_v24 }
 0x29e   :  { %v1386_v61 = vmul.f32 %v1382_v56, %v1373_v46  ;;  %v1422_v18 = vsel %vm581_vm15, %v4781_v34, %v1417_v42  ;;  %v1433_v28 = vrot.slane %v4840_v50, %v4276_v31  ;;  %v1367_v37 = vmul.f32 %v1363_v19, %v1353_v9 }
 0x29f   :  { %v1289_v39 = vadd.f32 %v1287_v57, %v1269_v0  ;;  %v1328_v51 = vadd.f32 %v1326_v14, %v1308_v25  ;;  %v1406_v4 = vmul.f32 %v1402_v49, %v1393_v32  ;;  %v1403_v33 = vsel %vm560_vm4, %v4760_v52, %v4799_v41  ;;  %v6780_v49 = vld [vmem:[#allocation8_spill] sm:$0xff] }
 0x2a0   :  { %v1455_v38 = vpop.permute.xlu1 %1454  ;;  %v1453_v60 = vrot.slane %v4840_v50, %v4292_v21  ;;  %v1387_v42 = vmul.f32 %v1383_v15, %v1373_v46  ;;  %v1426_v14 = vmul.f32 %v1422_v18, %v1413_v7  ;;  %v1423_v55 = vsel %vm581_vm15, %v4801_v22, %v1421_v62 }
 0x2a1   :  { %v1437_v26 = vpop.permute.xlu0 %1436  ;;  %v1309_v45 = vadd.f32 %v1307_v59, %v1289_v39  ;;  %v1348_v40 = vadd.f32 %v1346_v53, %v1328_v51  ;;  %v1407_v36 = vmul.f32 %v1403_v33, %v1393_v32  ;;  %v1427_v0 = vmul.f32 %v1423_v55, %v1413_v7  ;;  %v6789_v33 = vld [vmem:[#allocation71_spill] sm:$0xff] }
 0x2a2   :  { %v1442_v57 = vsel %vm602_vm3, %v4819_v30, %v1437_v26  ;;  %v1473_v26 = vrot.slane %v4840_v50, %v4302_v20  ;;  %vm6781_vm14 = vcmp.lt.s32.totalorder %v6780_v49, 64 }
 0x2a3   :  { %v1329_v3 = vadd.f32 %v1327_v48, %v1309_v45  ;;  %v1368_v47 = vadd.f32 %v1366_v16, %v1348_v40  ;;  %v1446_v17 = vmul.f32 %v1442_v57, %v1433_v28  ;;  %vm6782_vm12 = vmmov %vm6781_vm14 }
 0x2a4   :  { %v1459_v63 = vpop.permute.xlu1 %1458  ;;  %vm6783_vm0 = vmmov %vm6782_vm12 }
 0x2a5   :  { %v1441_v29 = vpop.permute.xlu0 %1440  ;;  %v1349_v54 = vadd.f32 %v1347_v35, %v1329_v3  ;;  %v1388_v34 = vadd.f32 %v1386_v61, %v1368_v47  ;;  %vm6784_vm13 = vmmov %vm6783_vm0 }
 0x2a6   :  { %v1443_v30 = vsel %vm602_vm3, %v4842_v27, %v1441_v29 }
 0x2a7   :  { %v1369_v2 = vadd.f32 %v1367_v37, %v1349_v54  ;;  %v1408_v6 = vadd.f32 %v1406_v4, %v1388_v34  ;;  %v1447_v59 = vmul.f32 %v1443_v30, %v1433_v28  ;;  %v168_v4 = vstv %s3041_s1 }
 0x2a8   :  { %v1475_v41 = vpop.permute.xlu1 %1474  ;;  %v169_v57 = vmul.f32 %v6789_v33, %v168_v4 }
 0x2a9   :  { %v1457_v58 = vpop.permute.xlu0 %1456  ;;  %v1389_v43 = vadd.f32 %v1387_v42, %v1369_v2  ;;  %v1428_v46 = vadd.f32 %v1426_v14, %v1408_v6  ;;  %v6791_v42 = vld [vmem:[#allocation72_spill] sm:$0xff] }
 0x2aa   :  { %v1462_v9 = vsel %vm623_vm2, %v1455_v38, %v1457_v58  ;;  %v123_v58 = vstv %s3926_s26 }
 0x2ab   :  { %v1466_v25 = vmul.f32 %v1462_v9, %v1453_v60  ;;  %v1409_v62 = vadd.f32 %v1407_v36, %v1389_v43  ;;  %v1448_v38 = vadd.f32 %v1446_v17, %v1428_v46 }
 0x2ac   :  { %v1479_v27 = vpop.permute.xlu1 %1478 }
 0x2ad   :  { %v1461_v52 = vpop.permute.xlu0 %1460  ;;  %v1429_v44 = vadd.f32 %v1427_v0, %v1409_v62  ;;  %v1468_v8 = vadd.f32 %v1466_v25, %v1448_v38 }
 0x2ae   :  { %v1463_v22 = vsel %vm623_vm2, %v1459_v63, %v1461_v52 }
 0x2af   :  { %v1467_v12 = vmul.f32 %v1463_v22, %v1453_v60  ;;  %v1449_v32 = vadd.f32 %v1447_v59, %v1429_v44  ;;  %v6790_v60 = vld [vmem:[#allocation70_spill] sm:$0xff] }
 0x2b0   :  { %v124_v54 = vmul.f32 %v6790_v60, %v123_v58 }
 0x2b1   :  { %v1477_v53 = vpop.permute.xlu0 %1476  ;;  %v1469_v48 = vadd.f32 %v1467_v12, %v1449_v32 }
 0x2b2   :  { %v1482_v10 = vsel %vm6436_vm1, %v1475_v41, %v1477_v53  ;;  %v170_v34 = vadd.f32 %v169_v57, %v124_v54 }
 0x2b3   :  { %v1486_v56 = vmul.f32 %v1482_v10, %v1473_v26 }
 0x2b5   :  { %v1488_v39 = vadd.f32 %v1486_v56, %v1468_v8  ;;  %v1481_v50 = vpop.permute.xlu0 %1480 }
 0x2b6   :  { %v1483_v51 = vsel %vm6436_vm1, %v1479_v27, %v1481_v50  ;;  %vm6785_vm1 = vcmp.ge.s32.totalorder %v6780_v49, 64 }
 0x2b7   :  { %v1487_v16 = vmul.f32 %v1483_v51, %v1473_v26  ;;  %v4908_v29 = vmax.f32 %v1488_v39, 0.0 }
 0x2b9   :  { %v1489_v11 = vadd.f32 %v1487_v16, %v1469_v48  ;;  %v1504_v7 = vsel %vm6781_vm14, %v4908_v29, -3e+38  ;;  %v1492_v40 = vsel %vm6783_vm0, %v4908_v29, 3e+38  ;;  %vm6786_vm14 = vmmov %vm6785_vm1 }
 0x2ba   :  { %vm6788_vm0 = vmmov %vm6785_vm1 }
 0x2bb   :  { %v4910_v19 = vmax.f32 %v1489_v11, 0.0  ;;  %v1542_v3 = vsel %vm6788_vm0, %v4908_v29, -3e+38  ;;  %vm6797_vm0 = vcmask 1046528  }
 0x2bd   :  { %v1505_v45 = vsel %vm6782_vm12, %v4910_v19, -3e+38  ;;  %v1493_v35 = vsel %vm6784_vm13, %v4910_v19, 3e+38  ;;  %v1531_v15 = vsel %vm6785_vm1, %v4910_v19, 3e+38  ;;  %vm6787_vm12 = vmmov %vm6785_vm1 }
 0x2be   :  { %v1506_v61 = vmax.f32 %v1504_v7, %v1505_v45  ;;  %v1494_v63 = vmin.f32 %v1492_v40, %v1493_v35  ;;  %v1543_v18 = vsel %vm6786_vm14, %v4910_v19, -3e+38  ;;  %v1530_v28 = vsel %vm6787_vm12, %v4908_v29, 3e+38 }
 0x2bf   :  { %v1532_v47 = vmin.f32 %v1530_v28, %v1531_v15  ;;  %v1544_v37 = vmax.f32 %v1542_v3, %v1543_v18  ;;  %vm1593_vm14 = vcmask 400384   ;;  %vm1602_vm12 = vcmask 1040384  }
 0x2c0   :  { %1507 = vmax.xlane.f32.xlu0 %v1506_v61  ;;  %1495 = vmin.xlane.f32.xlu1 %v1494_v63 }
 0x2c4   :  { %1533 = vmin.xlane.f32.xlu0 %v1532_v47  ;;  %1545 = vmax.xlane.f32.xlu1 %v1544_v37 }
 0x2d5   :  { %185 = vrot.lane.b32.xlu1 %v170_v34, %s3263_s15 }
 0x2da   :  { %213 = vrot.lane.b32.xlu0 %v6791_v42, %s3263_s15 }
 0x349   :  { %v1508_v14 = vpop.xlane.xlu0 %1507  ;;  %v1496_v55 = vpop.xlane.xlu1 %1495 }
 0x34a   :  { %v1509_v9 = vrot.slane %v1508_v14, 4  ;;  %v1497_v2 = vrot.slane %v1496_v55, 4 }
 0x34c   :  { %v1510_v6 = vmax.f32 %v1508_v14, %v1509_v9  ;;  %v1498_v36 = vmin.f32 %v1496_v55, %v1497_v2 }
 0x34d   :  { %v1534_v25 = vpop.xlane.xlu0 %1533  ;;  %v1546_v22 = vpop.xlane.xlu1 %1545 }
 0x34e   :  { %v1499_v17 = vrot.slane %v1498_v36, 2  ;;  %v1511_v52 = vrot.slane %v1510_v6, 2  ;;  %v1535_v62 = vrot.slane %v1534_v25, 4  ;;  %v1547_v38 = vrot.slane %v1546_v22, 4 }
 0x350   :  { %v1500_v41 = vmin.f32 %v1498_v36, %v1499_v17  ;;  %v1512_v30 = vmax.f32 %v1510_v6, %v1511_v52  ;;  %v1536_v59 = vmin.f32 %v1534_v25, %v1535_v62  ;;  %v1548_v53 = vmax.f32 %v1546_v22, %v1547_v38 }
 0x352   :  { %v1501_v26 = vrot.slane %v1500_v41, 1  ;;  %v1513_v43 = vrot.slane %v1512_v30, 1  ;;  %v1537_v44 = vrot.slane %v1536_v59, 2  ;;  %v1549_v8 = vrot.slane %v1548_v53, 2 }
 0x354   :  { %v1502_v46 = vmin.f32 %v1500_v41, %v1501_v26  ;;  %v1514_v0 = vmax.f32 %v1512_v30, %v1513_v43  ;;  %v1538_v12 = vmin.f32 %v1536_v59, %v1537_v44  ;;  %v1550_v56 = vmax.f32 %v1548_v53, %v1549_v8  ;;  %v4954_v59 = vpop.permute.xlu0 %213  ;;  %v4956_v53 = vpop.permute.xlu1 %185 }
 0x355   :  { %6792 = vst [vmem:[#allocation30_spill] sm:$0xff] %v4954_v59  ;;  %6793 = vst [vmem:[#allocation35_spill] sm:$0xff] %v4956_v53 }
 0x356   :  { %3090 = vpush %v1502_v46  ;;  %v1539_v27 = vrot.slane %v1538_v12, 1  ;;  %v1551_v32 = vrot.slane %v1550_v56, 1 }
 0x357   :  { %3092 = vpush %v1514_v0 }
 0x358   :  { %v1540_v50 = vmin.f32 %v1538_v12, %v1539_v27  ;;  %v1552_v51 = vmax.f32 %v1550_v56, %v1551_v32 }
 0x387   :  { %s3091_s26 = spop %3090 }
 0x388   :  { %s3093_s30 = spop %3092  ;;  %v1524_v48 = vstv %s3091_s26 }
 0x389   :  { %s1516_s27 = ssub.f32 %s3093_s30, %s3091_s26  ;;  %v1525_v11 = vmul.f32 %v6790_v60, %v1524_v48 }
 0x38b   :  { %s1519_s28 = smul.f32 0.003921569, %s1516_s27 }
 0x38d   :  { %s1520_s16 = smax.f32 %s3261_s29, %s1519_s28 }
 0x38e   :  { %v1521_v10 = vstv %s1520_s16 }
 0x38f   :  { %3177 = vrcp.f32 %v1521_v10  ;;  %v1529_v35 = vmul.f32 %v6790_v60, %v1521_v10 }
 0x39c   :  { %v3178_v39 = vpop.eup %3177 }
 0x39d   :  { %3094 = vpush %v3178_v39 }
 0x39e   :  { %3096 = vpush %v1540_v50 }
 0x39f   :  { %3098 = vpush %v1552_v51 }
 0x3ce   :  { %s3095_s24 = spop %3094 }
 0x3cf   :  { %s3097_s1 = spop %3096  ;;  %v1526_v18 = vstv %s3095_s24 }
 0x3d0   :  { %v1562_v16 = vstv %s3097_s1  ;;  %s3099_s30 = spop %3098  ;;  %v1527_v3 = vmul.f32 %v6790_v60, %v1526_v18 }
 0x3d1   :  { %v1563_v7 = vmul.f32 %v6789_v33, %v1562_v16  ;;  %s1554_s27 = ssub.f32 %s3099_s30, %s3097_s1 }
 0x3d3   :  { %v1564_v45 = vadd.f32 %v1563_v7, %v1525_v11  ;;  %s1557_s28 = smul.f32 0.003921569, %s1554_s27 }
 0x3d5   :  { %s1558_s16 = smax.f32 %s3261_s29, %s1557_s28  ;;  %v1571_v4 = vsub.f32 %v4908_v29, %v1564_v45  ;;  %v1572_v58 = vsub.f32 %v4910_v19, %v1564_v45 }
 0x3d6   :  { %v1559_v40 = vstv %s1558_s16 }
 0x3d7   :  { %3179 = vrcp.f32 %v1559_v40  ;;  %v1569_v61 = vmul.f32 %v6789_v33, %v1559_v40 }
 0x3d9   :  { %v1570_v63 = vadd.f32 %v1569_v61, %v1529_v35 }
 0x3e4   :  { %v3180_v15 = vpop.eup %3179 }
 0x3e5   :  { %3100 = vpush %v3180_v15 }
 0x416   :  { %s3101_s26 = spop %3100 }
 0x417   :  { %v1565_v28 = vstv %s3101_s26 }
 0x418   :  { %v1566_v47 = vmul.f32 %v6789_v33, %v1565_v28 }
 0x41a   :  { %v1567_v37 = vadd.f32 %v1566_v47, %v1527_v3 }
 0x41c   :  { %v1573_v57 = vmul.f32 %v1571_v4, %v1567_v37  ;;  %v1574_v54 = vmul.f32 %v1572_v58, %v1567_v37 }
 0x41e   :  { %v3104_v34 = vcvt.f32.s32 %v1573_v57  ;;  %v3112_v42 = vcvt.f32.s32 %v1574_v54  ;;  %v3102_v55 = vand.u32 2147483647, %v1573_v57  ;;  %v3107_v6 = vand.u32 2147483648, %v1573_v57 }
 0x41f   :  { %v3110_v36 = vand.u32 2147483647, %v1574_v54  ;;  %v3115_v52 = vand.u32 2147483648, %v1574_v54 }
 0x420   :  { %v3105_v14 = vcvt.s32.f32 %v3104_v34  ;;  %v3113_v9 = vcvt.s32.f32 %v3112_v42  ;;  %vm3103_vm1 = vcmp.lt.f32.partialorder %v3102_v55, 8388608.0 }
 0x421   :  { %vm3111_vm13 = vcmp.lt.f32.partialorder %v3110_v36, 8388608.0 }
 0x422   :  { %v3106_v2 = vand.u32 2147483647, %v3105_v14  ;;  %v3114_v17 = vand.u32 2147483647, %v3113_v9 }
 0x424   :  { %v3108_v41 = vor.u32 %v3107_v6, %v3106_v2  ;;  %v3116_v30 = vor.u32 %v3115_v52, %v3114_v17 }
 0x426   :  { %v3109_v26 = vsel %vm3103_vm1, %v3108_v41, %v1573_v57  ;;  %v3117_v29 = vsel %vm3111_vm13, %v3116_v30, %v1574_v54  ;;  %vm6798_vm1 = vmmov %vm6797_vm0 }
 0x427   :  { %v1577_v43 = vmax.f32 %v3109_v26, 0.0  ;;  %v1578_v19 = vmax.f32 %v3117_v29, 0.0  ;;  %vm6799_vm13 = vmmov %vm6797_vm0 }
 0x429   :  { %v1579_v46 = vmin.f32 %v1577_v43, 255.0  ;;  %v1580_v0 = vmin.f32 %v1578_v19, 255.0 }
 0x42b   :  { %v1581_v25 = vmul.f32 %v1579_v46, %v1570_v63  ;;  %v1582_v22 = vmul.f32 %v1580_v0, %v1570_v63 }
 0x42d   :  { %v1583_v62 = vadd.f32 %v1581_v25, %v1564_v45  ;;  %v1584_v38 = vadd.f32 %v1582_v22, %v1564_v45 }
 0x42f   :  { %1587 = vrot.lane.b32.xlu0 %v1583_v62, %s3263_s15  ;;  %1589 = vrot.lane.b32.xlu1 %v1584_v38, %s3263_s15 }
 0x4a1   :  { %v1588_v10 = vpop.permute.xlu0 %1587  ;;  %v1590_v12 = vpop.permute.xlu1 %1589 }
 0x4a2   :  { %v1594_v44 = vsel %vm1593_vm14, 0.0, %v1588_v10  ;;  %v1596_v8 = vsel %vm1593_vm14, %v1588_v10, 0.0  ;;  %v1595_v32 = vsel %vm1593_vm14, 0.0, %v1590_v12  ;;  %v1597_v39 = vsel %vm1593_vm14, %v1590_v12, 0.0  ;;  %vm6800_vm14 = vmmov %vm6797_vm0 }
 0x4a3   :  { %v1603_v56 = vrot.slane %v1594_v44, 7  ;;  %v1604_v27 = vrot.slane %v1596_v8, 7  ;;  %v1605_v50 = vrot.slane %v1595_v32, 7  ;;  %v1607_v51 = vrot.slane %v1597_v39, 7 }
 0x4a5   :  { %v4959_v48 = vsel %vm1602_vm12, 0.0, %v1603_v56  ;;  %v4962_v16 = vsel %vm1602_vm12, 0.0, %v1604_v27  ;;  %v4969_v11 = vsel %vm1602_vm12, %v1605_v50, 0.0  ;;  %v4972_v7 = vsel %vm1602_vm12, %v1607_v51, 0.0 }
 0x4a6   :  { %6794 = vst [vmem:[#allocation28_spill] sm:$0xff] %v4959_v48  ;;  %1632 = vrot.lane.b32.xlu0 %v4962_v16, %s3241_s25  ;;  %1630 = vrot.lane.b32.xlu1 %v4959_v48, %s3241_s25  ;;  %6795 = vst [vmem:[#allocation34_spill] sm:$0xff] %v4969_v11  ;;  %v4975_v45 = vsel %vm1602_vm12, %v1603_v56, %v1605_v50  ;;  %v4978_v40 = vsel %vm1602_vm12, %v1604_v27, %v1607_v51  ;;  %v2051_v52 = vrot.slane %v4959_v48, 1  ;;  %vm6866_vm12 = vcmask 1045504  }
 0x4a7   :  { %6796 = vst [vmem:[#allocation39_spill] sm:$0xff] %v4975_v45  ;;  %v2054_v41 = vrot.slane %v4962_v16, 1  ;;  %v2052_v30 = vrot.slane %v4975_v45, 1  ;;  %v2055_v26 = vrot.slane %v4978_v40, 1  ;;  %v2057_v0 = vrot.slane %v4969_v11, 1 }
 0x4a8   :  { %v2059_v25 = vrot.slane %v4972_v7, 1 }
 0x4a9   :  { %v5189_v19 = vsel %vm6797_vm0, %v2051_v52, %v2052_v30  ;;  %v5192_v46 = vsel %vm6798_vm1, %v2054_v41, %v2055_v26  ;;  %v5205_v38 = vsel %vm6799_vm13, %v2052_v30, %v2057_v0  ;;  %vm6867_vm0 = vmmov %vm6866_vm12 }
 0x4aa   :  { %1636 = vrot.lane.b32.xlu0 %v4978_v40, %s3241_s25  ;;  %1634 = vrot.lane.b32.xlu1 %v4975_v45, %s3241_s25  ;;  %v5208_v10 = vsel %vm6800_vm14, %v2055_v26, %v2059_v25  ;;  %vm6870_vm1 = vmmov %vm6867_vm0  ;;  %vm6880_vm14 = vcmask 908288  }
 0x4ab   :  { %vm6871_vm13 = vmmov %vm6867_vm0 }
 0x4ae   :  { %1652 = vrot.lane.b32.xlu0 %v4962_v16, %s3243_s5  ;;  %1650 = vrot.lane.b32.xlu1 %v4959_v48, %s3243_s5 }
 0x4b2   :  { %1656 = vrot.lane.b32.xlu0 %v4978_v40, %s3243_s5  ;;  %1654 = vrot.lane.b32.xlu1 %v4975_v45, %s3243_s5 }
 0x4b6   :  { %1672 = vrot.lane.b32.xlu0 %v4962_v16, %s3244_s6  ;;  %1670 = vrot.lane.b32.xlu1 %v4959_v48, %s3244_s6 }
 0x4ba   :  { %1676 = vrot.lane.b32.xlu0 %v4978_v40, %s3244_s6  ;;  %1674 = vrot.lane.b32.xlu1 %v4975_v45, %s3244_s6 }
 0x4be   :  { %1692 = vrot.lane.b32.xlu0 %v4962_v16, %s3245_s7  ;;  %1690 = vrot.lane.b32.xlu1 %v4959_v48, %s3245_s7 }
 0x4c2   :  { %1696 = vrot.lane.b32.xlu0 %v4978_v40, %s3245_s7  ;;  %1694 = vrot.lane.b32.xlu1 %v4975_v45, %s3245_s7 }
 0x4c6   :  { %1712 = vrot.lane.b32.xlu0 %v4962_v16, %s3246_s8  ;;  %1710 = vrot.lane.b32.xlu1 %v4959_v48, %s3246_s8 }
 0x4ca   :  { %1716 = vrot.lane.b32.xlu0 %v4978_v40, %s3246_s8  ;;  %1714 = vrot.lane.b32.xlu1 %v4975_v45, %s3246_s8 }
 0x4ce   :  { %1732 = vrot.lane.b32.xlu0 %v4962_v16, %s3247_s9  ;;  %1730 = vrot.lane.b32.xlu1 %v4959_v48, %s3247_s9 }
 0x4d2   :  { %1736 = vrot.lane.b32.xlu0 %v4978_v40, %s3247_s9  ;;  %1734 = vrot.lane.b32.xlu1 %v4975_v45, %s3247_s9 }
 0x4d6   :  { %1752 = vrot.lane.b32.xlu0 %v4962_v16, %s3248_s10  ;;  %1750 = vrot.lane.b32.xlu1 %v4959_v48, %s3248_s10 }
 0x4da   :  { %1756 = vrot.lane.b32.xlu0 %v4978_v40, %s3248_s10  ;;  %1754 = vrot.lane.b32.xlu1 %v4975_v45, %s3248_s10 }
 0x4de   :  { %1772 = vrot.lane.b32.xlu0 %v4962_v16, %s3249_s11  ;;  %1770 = vrot.lane.b32.xlu1 %v4959_v48, %s3249_s11 }
 0x4e2   :  { %1776 = vrot.lane.b32.xlu0 %v4978_v40, %s3249_s11  ;;  %1774 = vrot.lane.b32.xlu1 %v4975_v45, %s3249_s11 }
 0x4e6   :  { %1792 = vrot.lane.b32.xlu0 %v4962_v16, %s3250_s12  ;;  %1790 = vrot.lane.b32.xlu1 %v4959_v48, %s3250_s12 }
 0x4ea   :  { %1796 = vrot.lane.b32.xlu0 %v4978_v40, %s3250_s12  ;;  %1794 = vrot.lane.b32.xlu1 %v4975_v45, %s3250_s12 }
 0x4ee   :  { %1812 = vrot.lane.b32.xlu0 %v4962_v16, %s3242_s4  ;;  %1810 = vrot.lane.b32.xlu1 %v4959_v48, %s3242_s4 }
 0x4f2   :  { %1816 = vrot.lane.b32.xlu0 %v4978_v40, %s3242_s4  ;;  %1814 = vrot.lane.b32.xlu1 %v4975_v45, %s3242_s4 }
 0x4f6   :  { %1832 = vrot.lane.b32.xlu0 %v4962_v16, %s3251_s13  ;;  %1830 = vrot.lane.b32.xlu1 %v4959_v48, %s3251_s13 }
 0x4fa   :  { %1836 = vrot.lane.b32.xlu0 %v4978_v40, %s3251_s13  ;;  %1834 = vrot.lane.b32.xlu1 %v4975_v45, %s3251_s13 }
 0x4fe   :  { %1852 = vrot.lane.b32.xlu0 %v4962_v16, %s3252_s14  ;;  %1850 = vrot.lane.b32.xlu1 %v4959_v48, %s3252_s14 }
 0x502   :  { %1856 = vrot.lane.b32.xlu0 %v4978_v40, %s3252_s14  ;;  %1854 = vrot.lane.b32.xlu1 %v4975_v45, %s3252_s14 }
 0x506   :  { %1872 = vrot.lane.b32.xlu0 %v4962_v16, %s3253_s17  ;;  %1870 = vrot.lane.b32.xlu1 %v4959_v48, %s3253_s17 }
 0x50a   :  { %1876 = vrot.lane.b32.xlu0 %v4978_v40, %s3253_s17  ;;  %1874 = vrot.lane.b32.xlu1 %v4975_v45, %s3253_s17 }
 0x50e   :  { %1892 = vrot.lane.b32.xlu0 %v4962_v16, %s3254_s18  ;;  %1890 = vrot.lane.b32.xlu1 %v4959_v48, %s3254_s18 }
 0x512   :  { %1896 = vrot.lane.b32.xlu0 %v4978_v40, %s3254_s18  ;;  %1894 = vrot.lane.b32.xlu1 %v4975_v45, %s3254_s18 }
 0x516   :  { %1912 = vrot.lane.b32.xlu0 %v4962_v16, %s3255_s19  ;;  %1910 = vrot.lane.b32.xlu1 %v4959_v48, %s3255_s19 }
 0x518   :  { %v5092_v35 = vpop.permute.xlu0 %1632  ;;  %v5094_v61 = vpop.permute.xlu1 %1630 }
 0x51a   :  { %1916 = vrot.lane.b32.xlu0 %v4978_v40, %s3255_s19  ;;  %1914 = vrot.lane.b32.xlu1 %v4975_v45, %s3255_s19 }
 0x51c   :  { %v5100_v63 = vpop.permute.xlu0 %1636  ;;  %v5102_v15 = vpop.permute.xlu1 %1634 }
 0x51e   :  { %1932 = vrot.lane.b32.xlu0 %v4962_v16, %s3256_s20  ;;  %1930 = vrot.lane.b32.xlu1 %v4959_v48, %s3256_s20 }
 0x520   :  { %v5108_v18 = vpop.permute.xlu0 %1652  ;;  %v5110_v28 = vpop.permute.xlu1 %1650 }
 0x522   :  { %1936 = vrot.lane.b32.xlu0 %v4978_v40, %s3256_s20  ;;  %1934 = vrot.lane.b32.xlu1 %v4975_v45, %s3256_s20 }
 0x524   :  { %v5116_v3 = vpop.permute.xlu0 %1656  ;;  %v5118_v47 = vpop.permute.xlu1 %1654 }
 0x526   :  { %1952 = vrot.lane.b32.xlu0 %v4962_v16, %s3257_s21  ;;  %1950 = vrot.lane.b32.xlu1 %v4959_v48, %s3257_s21 }
 0x528   :  { %v5124_v37 = vpop.permute.xlu0 %1672  ;;  %v5126_v4 = vpop.permute.xlu1 %1670 }
 0x52a   :  { %1956 = vrot.lane.b32.xlu0 %v4978_v40, %s3257_s21  ;;  %1954 = vrot.lane.b32.xlu1 %v4975_v45, %s3257_s21 }
 0x52c   :  { %v5132_v58 = vpop.permute.xlu0 %1676  ;;  %v5134_v57 = vpop.permute.xlu1 %1674 }
 0x52e   :  { %1972 = vrot.lane.b32.xlu0 %v4962_v16, %s3258_s22  ;;  %1970 = vrot.lane.b32.xlu1 %v4959_v48, %s3258_s22 }
 0x530   :  { %v5140_v54 = vpop.permute.xlu0 %1692  ;;  %v5142_v34 = vpop.permute.xlu1 %1690 }
 0x532   :  { %1976 = vrot.lane.b32.xlu0 %v4978_v40, %s3258_s22  ;;  %1974 = vrot.lane.b32.xlu1 %v4975_v45, %s3258_s22 }
 0x534   :  { %v5148_v42 = vpop.permute.xlu0 %1696  ;;  %v5150_v14 = vpop.permute.xlu1 %1694 }
 0x536   :  { %1992 = vrot.lane.b32.xlu0 %v4962_v16, %s3259_s23  ;;  %1990 = vrot.lane.b32.xlu1 %v4959_v48, %s3259_s23 }
 0x538   :  { %v5156_v55 = vpop.permute.xlu0 %1712  ;;  %v5158_v9 = vpop.permute.xlu1 %1710 }
 0x53a   :  { %1996 = vrot.lane.b32.xlu0 %v4978_v40, %s3259_s23  ;;  %1994 = vrot.lane.b32.xlu1 %v4975_v45, %s3259_s23 }
 0x53c   :  { %v5164_v2 = vpop.permute.xlu0 %1716  ;;  %v5166_v6 = vpop.permute.xlu1 %1714 }
 0x53e   :  { %2012 = vrot.lane.b32.xlu0 %v4962_v16, %s6581_s2  ;;  %2010 = vrot.lane.b32.xlu1 %v4959_v48, %s6581_s2 }
 0x540   :  { %v5172_v36 = vpop.permute.xlu0 %1732  ;;  %v5174_v17 = vpop.permute.xlu1 %1730 }
 0x542   :  { %2016 = vrot.lane.b32.xlu0 %v4978_v40, %s6581_s2  ;;  %2014 = vrot.lane.b32.xlu1 %v4975_v45, %s6581_s2 }
 0x544   :  { %v5184_v29 = vpop.permute.xlu0 %1736  ;;  %v5186_v43 = vpop.permute.xlu1 %1734 }
 0x546   :  { %2063 = vrot.lane.b32.xlu0 %v5192_v46, %s3241_s25  ;;  %2061 = vrot.lane.b32.xlu1 %v5189_v19, %s3241_s25 }
 0x548   :  { %v5200_v22 = vpop.permute.xlu0 %1752  ;;  %v5202_v62 = vpop.permute.xlu1 %1750 }
 0x54a   :  { %2067 = vrot.lane.b32.xlu0 %v5208_v10, %s3241_s25  ;;  %2065 = vrot.lane.b32.xlu1 %v5205_v38, %s3241_s25 }
 0x54c   :  { %v5214_v44 = vpop.permute.xlu0 %1756  ;;  %v5216_v8 = vpop.permute.xlu1 %1754 }
 0x54e   :  { %2083 = vrot.lane.b32.xlu0 %v5192_v46, %s3243_s5  ;;  %2081 = vrot.lane.b32.xlu1 %v5189_v19, %s3243_s5 }
 0x550   :  { %v5222_v12 = vpop.permute.xlu0 %1772  ;;  %v5224_v56 = vpop.permute.xlu1 %1770 }
 0x552   :  { %2087 = vrot.lane.b32.xlu0 %v5208_v10, %s3243_s5  ;;  %2085 = vrot.lane.b32.xlu1 %v5205_v38, %s3243_s5 }
 0x554   :  { %v5230_v27 = vpop.permute.xlu0 %1776  ;;  %v5232_v32 = vpop.permute.xlu1 %1774 }
 0x556   :  { %2103 = vrot.lane.b32.xlu0 %v5192_v46, %s3244_s6  ;;  %2101 = vrot.lane.b32.xlu1 %v5189_v19, %s3244_s6 }
 0x558   :  { %v5238_v39 = vpop.permute.xlu0 %1792  ;;  %v5240_v50 = vpop.permute.xlu1 %1790 }
 0x559   :  { %6801 = vst [vmem:[#allocation32_spill] sm:$0xff] %v5238_v39  ;;  %6802 = vst [vmem:[#allocation38_spill] sm:$0xff] %v5240_v50  ;;  %v2483_v39 = vrot.slane %v4962_v16, 2  ;;  %v2486_v16 = vrot.slane %v4969_v11, 2  ;;  %v1638_v11 = vsel %vm246_vm5, %v5094_v61, %v5092_v35 }
 0x55a   :  { %2107 = vrot.lane.b32.xlu0 %v5208_v10, %s3244_s6  ;;  %2105 = vrot.lane.b32.xlu1 %v5205_v38, %s3244_s6 }
 0x55c   :  { %v5246_v51 = vpop.permute.xlu0 %1796  ;;  %v5248_v52 = vpop.permute.xlu1 %1794 }
 0x55e   :  { %2123 = vrot.lane.b32.xlu0 %v5192_v46, %s3245_s7  ;;  %2121 = vrot.lane.b32.xlu1 %v5189_v19, %s3245_s7 }
 0x560   :  { %v5254_v41 = vpop.permute.xlu0 %1812  ;;  %v5256_v30 = vpop.permute.xlu1 %1810 }
 0x561   :  { %6803 = vst [vmem:[#allocation42_spill] sm:$0xff] %v5254_v41  ;;  %6804 = vst [vmem:[#allocation36_spill] sm:$0xff] %v5256_v30 }
 0x562   :  { %2127 = vrot.lane.b32.xlu0 %v5208_v10, %s3245_s7  ;;  %2125 = vrot.lane.b32.xlu1 %v5205_v38, %s3245_s7 }
 0x564   :  { %v5262_v26 = vpop.permute.xlu0 %1816  ;;  %v5264_v0 = vpop.permute.xlu1 %1814 }
 0x566   :  { %2143 = vrot.lane.b32.xlu0 %v5192_v46, %s3246_s8  ;;  %2141 = vrot.lane.b32.xlu1 %v5189_v19, %s3246_s8 }
 0x568   :  { %v5270_v25 = vpop.permute.xlu0 %1832  ;;  %v5272_v33 = vpop.permute.xlu1 %1830 }
 0x569   :  { %6805 = vst [vmem:[#allocation142_spill] sm:$0xff] %v5270_v25  ;;  %6806 = vst [vmem:[#allocation141_spill] sm:$0xff] %v5272_v33 }
 0x56a   :  { %2147 = vrot.lane.b32.xlu0 %v5208_v10, %s3246_s8  ;;  %2145 = vrot.lane.b32.xlu1 %v5205_v38, %s3246_s8 }
 0x56c   :  { %v5278_v60 = vpop.permute.xlu0 %1836  ;;  %v5280_v59 = vpop.permute.xlu1 %1834 }
 0x56e   :  { %2163 = vrot.lane.b32.xlu0 %v5192_v46, %s3247_s9  ;;  %2161 = vrot.lane.b32.xlu1 %v5189_v19, %s3247_s9 }
 0x570   :  { %v5286_v49 = vpop.permute.xlu0 %1852  ;;  %v5288_v53 = vpop.permute.xlu1 %1850 }
 0x571   :  { %6807 = vst [vmem:[#allocation47_spill] sm:$0xff] %v5286_v49  ;;  %6808 = vst [vmem:[#allocation41_spill] sm:$0xff] %v5288_v53 }
 0x572   :  { %2167 = vrot.lane.b32.xlu0 %v5208_v10, %s3247_s9  ;;  %2165 = vrot.lane.b32.xlu1 %v5205_v38, %s3247_s9 }
 0x574   :  { %v5294_v33 = vpop.permute.xlu0 %1856  ;;  %v5296_v25 = vpop.permute.xlu1 %1854 }
 0x575   :  { %6809 = vst [vmem:[#allocation45_spill] sm:$0xff] %v5296_v25  ;;  %v2481_v25 = vrot.slane %v4975_v45, 2 }
 0x576   :  { %2183 = vrot.lane.b32.xlu0 %v5192_v46, %s3248_s10  ;;  %2181 = vrot.lane.b32.xlu1 %v5189_v19, %s3248_s10 }
 0x578   :  { %v5302_v30 = vpop.permute.xlu0 %1872  ;;  %v5304_v49 = vpop.permute.xlu1 %1870 }
 0x579   :  { %6810 = vst [vmem:[#allocation40_spill] sm:$0xff] %v5302_v30  ;;  %6811 = vst [vmem:[#allocation49_spill] sm:$0xff] %v5304_v49 }
 0x57a   :  { %2187 = vrot.lane.b32.xlu0 %v5208_v10, %s3248_s10  ;;  %2185 = vrot.lane.b32.xlu1 %v5205_v38, %s3248_s10 }
 0x57c   :  { %v5310_v53 = vpop.permute.xlu0 %1876  ;;  %v5312_v41 = vpop.permute.xlu1 %1874 }
 0x57d   :  { %6812 = vst [vmem:[#allocation43_spill] sm:$0xff] %v5310_v53  ;;  %6813 = vst [vmem:[#allocation51_spill] sm:$0xff] %v5312_v41 }
 0x57e   :  { %2203 = vrot.lane.b32.xlu0 %v5192_v46, %s3249_s11  ;;  %2201 = vrot.lane.b32.xlu1 %v5189_v19, %s3249_s11 }
 0x580   :  { %v5318_v50 = vpop.permute.xlu0 %1892  ;;  %v5320_v30 = vpop.permute.xlu1 %1890 }
 0x581   :  { %6814 = vst [vmem:[#allocation44_spill] sm:$0xff] %v5318_v50  ;;  %6815 = vst [vmem:[#allocation55_spill] sm:$0xff] %v5320_v30 }
 0x582   :  { %2207 = vrot.lane.b32.xlu0 %v5208_v10, %s3249_s11  ;;  %2205 = vrot.lane.b32.xlu1 %v5205_v38, %s3249_s11 }
 0x584   :  { %v5326_v49 = vpop.permute.xlu0 %1896  ;;  %v5328_v53 = vpop.permute.xlu1 %1894 }
 0x585   :  { %6816 = vst [vmem:[#allocation48_spill] sm:$0xff] %v5326_v49  ;;  %6817 = vst [vmem:[#allocation53_spill] sm:$0xff] %v5328_v53 }
 0x586   :  { %2223 = vrot.lane.b32.xlu0 %v5192_v46, %s3250_s12  ;;  %2221 = vrot.lane.b32.xlu1 %v5189_v19, %s3250_s12 }
 0x588   :  { %v5334_v41 = vpop.permute.xlu0 %1912  ;;  %v5336_v50 = vpop.permute.xlu1 %1910 }
 0x589   :  { %6818 = vst [vmem:[#allocation46_spill] sm:$0xff] %v5334_v41  ;;  %6819 = vst [vmem:[#allocation59_spill] sm:$0xff] %v5336_v50 }
 0x58a   :  { %2227 = vrot.lane.b32.xlu0 %v5208_v10, %s3250_s12  ;;  %2225 = vrot.lane.b32.xlu1 %v5205_v38, %s3250_s12 }
 0x58c   :  { %v5342_v30 = vpop.permute.xlu0 %1916  ;;  %v5344_v49 = vpop.permute.xlu1 %1914 }
 0x58d   :  { %6820 = vst [vmem:[#allocation52_spill] sm:$0xff] %v5342_v30  ;;  %6821 = vst [vmem:[#allocation57_spill] sm:$0xff] %v5344_v49 }
 0x58e   :  { %2243 = vrot.lane.b32.xlu0 %v5192_v46, %s3242_s4  ;;  %2241 = vrot.lane.b32.xlu1 %v5189_v19, %s3242_s4 }
 0x590   :  { %v5350_v53 = vpop.permute.xlu0 %1932  ;;  %v5352_v41 = vpop.permute.xlu1 %1930 }
 0x591   :  { %6822 = vst [vmem:[#allocation50_spill] sm:$0xff] %v5350_v53  ;;  %6823 = vst [vmem:[#allocation63_spill] sm:$0xff] %v5352_v41 }
 0x592   :  { %2247 = vrot.lane.b32.xlu0 %v5208_v10, %s3242_s4  ;;  %2245 = vrot.lane.b32.xlu1 %v5205_v38, %s3242_s4 }
 0x594   :  { %v5358_v50 = vpop.permute.xlu0 %1936  ;;  %v5360_v30 = vpop.permute.xlu1 %1934 }
 0x595   :  { %6824 = vst [vmem:[#allocation56_spill] sm:$0xff] %v5358_v50  ;;  %6825 = vst [vmem:[#allocation61_spill] sm:$0xff] %v5360_v30 }
 0x596   :  { %2263 = vrot.lane.b32.xlu0 %v5192_v46, %s3251_s13  ;;  %2261 = vrot.lane.b32.xlu1 %v5189_v19, %s3251_s13 }
 0x598   :  { %v5366_v49 = vpop.permute.xlu0 %1952  ;;  %v5368_v53 = vpop.permute.xlu1 %1950 }
 0x599   :  { %6826 = vst [vmem:[#allocation54_spill] sm:$0xff] %v5366_v49  ;;  %6827 = vst [vmem:[#allocation67_spill] sm:$0xff] %v5368_v53 }
 0x59a   :  { %2267 = vrot.lane.b32.xlu0 %v5208_v10, %s3251_s13  ;;  %2265 = vrot.lane.b32.xlu1 %v5205_v38, %s3251_s13 }
 0x59c   :  { %v5374_v41 = vpop.permute.xlu0 %1956  ;;  %v5376_v50 = vpop.permute.xlu1 %1954 }
 0x59d   :  { %6828 = vst [vmem:[#allocation60_spill] sm:$0xff] %v5374_v41  ;;  %6829 = vst [vmem:[#allocation65_spill] sm:$0xff] %v5376_v50 }
 0x59e   :  { %2283 = vrot.lane.b32.xlu0 %v5192_v46, %s3252_s14  ;;  %2281 = vrot.lane.b32.xlu1 %v5189_v19, %s3252_s14 }
 0x5a0   :  { %v5382_v30 = vpop.permute.xlu0 %1972  ;;  %v5384_v49 = vpop.permute.xlu1 %1970 }
 0x5a1   :  { %6830 = vst [vmem:[#allocation58_spill] sm:$0xff] %v5382_v30  ;;  %6831 = vst [vmem:[#allocation74_spill] sm:$0xff] %v5384_v49 }
 0x5a2   :  { %2287 = vrot.lane.b32.xlu0 %v5208_v10, %s3252_s14  ;;  %2285 = vrot.lane.b32.xlu1 %v5205_v38, %s3252_s14 }
 0x5a4   :  { %v5390_v53 = vpop.permute.xlu0 %1976  ;;  %v5392_v41 = vpop.permute.xlu1 %1974 }
 0x5a5   :  { %6832 = vst [vmem:[#allocation64_spill] sm:$0xff] %v5390_v53  ;;  %6833 = vst [vmem:[#allocation69_spill] sm:$0xff] %v5392_v41 }
 0x5a6   :  { %2303 = vrot.lane.b32.xlu0 %v5192_v46, %s3253_s17  ;;  %2301 = vrot.lane.b32.xlu1 %v5189_v19, %s3253_s17 }
 0x5a8   :  { %v5398_v50 = vpop.permute.xlu0 %1992  ;;  %v5400_v30 = vpop.permute.xlu1 %1990 }
 0x5a9   :  { %6834 = vst [vmem:[#allocation62_spill] sm:$0xff] %v5398_v50  ;;  %6835 = vst [vmem:[#allocation78_spill] sm:$0xff] %v5400_v30 }
 0x5aa   :  { %2307 = vrot.lane.b32.xlu0 %v5208_v10, %s3253_s17  ;;  %2305 = vrot.lane.b32.xlu1 %v5205_v38, %s3253_s17 }
 0x5ac   :  { %v5406_v49 = vpop.permute.xlu0 %1996  ;;  %v5408_v53 = vpop.permute.xlu1 %1994 }
 0x5ad   :  { %6836 = vst [vmem:[#allocation68_spill] sm:$0xff] %v5406_v49  ;;  %6837 = vst [vmem:[#allocation76_spill] sm:$0xff] %v5408_v53 }
 0x5ae   :  { %2323 = vrot.lane.b32.xlu0 %v5192_v46, %s3254_s18  ;;  %2321 = vrot.lane.b32.xlu1 %v5189_v19, %s3254_s18 }
 0x5b0   :  { %v5414_v41 = vpop.permute.xlu0 %2012  ;;  %v5416_v50 = vpop.permute.xlu1 %2010 }
 0x5b1   :  { %6838 = vst [vmem:[#allocation66_spill] sm:$0xff] %v5414_v41  ;;  %6839 = vst [vmem:[#allocation82_spill] sm:$0xff] %v5416_v50 }
 0x5b2   :  { %2327 = vrot.lane.b32.xlu0 %v5208_v10, %s3254_s18  ;;  %2325 = vrot.lane.b32.xlu1 %v5205_v38, %s3254_s18 }
 0x5b4   :  { %v5422_v30 = vpop.permute.xlu0 %2016  ;;  %v5424_v49 = vpop.permute.xlu1 %2014 }
 0x5b5   :  { %6840 = vst [vmem:[#allocation75_spill] sm:$0xff] %v5422_v30  ;;  %6841 = vst [vmem:[#allocation80_spill] sm:$0xff] %v5424_v49 }
 0x5b6   :  { %2343 = vrot.lane.b32.xlu0 %v5192_v46, %s3255_s19  ;;  %2341 = vrot.lane.b32.xlu1 %v5189_v19, %s3255_s19 }
 0x5b8   :  { %v5430_v53 = vpop.permute.xlu0 %2063  ;;  %v5432_v41 = vpop.permute.xlu1 %2061 }
 0x5b9   :  { %6842 = vst [vmem:[#allocation73_spill] sm:$0xff] %v5430_v53  ;;  %6843 = vst [vmem:[#allocation86_spill] sm:$0xff] %v5432_v41 }
 0x5ba   :  { %2347 = vrot.lane.b32.xlu0 %v5208_v10, %s3255_s19  ;;  %2345 = vrot.lane.b32.xlu1 %v5205_v38, %s3255_s19 }
 0x5bc   :  { %v5438_v50 = vpop.permute.xlu0 %2067  ;;  %v5440_v30 = vpop.permute.xlu1 %2065 }
 0x5bd   :  { %6844 = vst [vmem:[#allocation79_spill] sm:$0xff] %v5438_v50  ;;  %6845 = vst [vmem:[#allocation84_spill] sm:$0xff] %v5440_v30 }
 0x5be   :  { %2363 = vrot.lane.b32.xlu0 %v5192_v46, %s3256_s20  ;;  %2361 = vrot.lane.b32.xlu1 %v5189_v19, %s3256_s20 }
 0x5c0   :  { %v5446_v49 = vpop.permute.xlu0 %2083  ;;  %v5448_v53 = vpop.permute.xlu1 %2081 }
 0x5c1   :  { %6846 = vst [vmem:[#allocation77_spill] sm:$0xff] %v5446_v49  ;;  %6847 = vst [vmem:[#allocation88_spill] sm:$0xff] %v5448_v53 }
 0x5c2   :  { %2367 = vrot.lane.b32.xlu0 %v5208_v10, %s3256_s20  ;;  %2365 = vrot.lane.b32.xlu1 %v5205_v38, %s3256_s20 }
 0x5c4   :  { %v5454_v41 = vpop.permute.xlu0 %2087  ;;  %v5456_v50 = vpop.permute.xlu1 %2085 }
 0x5c5   :  { %6848 = vst [vmem:[#allocation81_spill] sm:$0xff] %v5454_v41  ;;  %6849 = vst [vmem:[#allocation90_spill] sm:$0xff] %v5456_v50 }
 0x5c6   :  { %2383 = vrot.lane.b32.xlu0 %v5192_v46, %s3257_s21  ;;  %2381 = vrot.lane.b32.xlu1 %v5189_v19, %s3257_s21 }
 0x5c8   :  { %v5462_v30 = vpop.permute.xlu0 %2103  ;;  %v5464_v49 = vpop.permute.xlu1 %2101 }
 0x5c9   :  { %6850 = vst [vmem:[#allocation83_spill] sm:$0xff] %v5462_v30  ;;  %6851 = vst [vmem:[#allocation94_spill] sm:$0xff] %v5464_v49 }
 0x5ca   :  { %2387 = vrot.lane.b32.xlu0 %v5208_v10, %s3257_s21  ;;  %2385 = vrot.lane.b32.xlu1 %v5205_v38, %s3257_s21 }
 0x5cc   :  { %v5470_v53 = vpop.permute.xlu0 %2107  ;;  %v5472_v41 = vpop.permute.xlu1 %2105 }
 0x5cd   :  { %6852 = vst [vmem:[#allocation87_spill] sm:$0xff] %v5470_v53  ;;  %6853 = vst [vmem:[#allocation9_spill] sm:$0xff] %v5472_v41 }
 0x5ce   :  { %2403 = vrot.lane.b32.xlu0 %v5192_v46, %s3258_s22  ;;  %2401 = vrot.lane.b32.xlu1 %v5189_v19, %s3258_s22 }
 0x5d0   :  { %v5478_v50 = vpop.permute.xlu0 %2123  ;;  %v5480_v30 = vpop.permute.xlu1 %2121 }
 0x5d1   :  { %6854 = vst [vmem:[#allocation92_spill] sm:$0xff] %v5478_v50  ;;  %6855 = vst [vmem:[#allocation85_spill] sm:$0xff] %v5480_v30 }
 0x5d2   :  { %2407 = vrot.lane.b32.xlu0 %v5208_v10, %s3258_s22  ;;  %2405 = vrot.lane.b32.xlu1 %v5205_v38, %s3258_s22 }
 0x5d4   :  { %v5486_v49 = vpop.permute.xlu0 %2127  ;;  %v5488_v53 = vpop.permute.xlu1 %2125 }
 0x5d5   :  { %6856 = vst [vmem:[#allocation98_spill] sm:$0xff] %v5486_v49  ;;  %6857 = vst [vmem:[#allocation91_spill] sm:$0xff] %v5488_v53 }
 0x5d6   :  { %2423 = vrot.lane.b32.xlu0 %v5192_v46, %s3259_s23  ;;  %2421 = vrot.lane.b32.xlu1 %v5189_v19, %s3259_s23 }
 0x5d8   :  { %v5494_v41 = vpop.permute.xlu0 %2143  ;;  %v5496_v50 = vpop.permute.xlu1 %2141 }
 0x5d9   :  { %6858 = vst [vmem:[#allocation10_spill] sm:$0xff] %v5494_v41  ;;  %6859 = vst [vmem:[#allocation96_spill] sm:$0xff] %v5496_v50  ;;  %v2480_v50 = vrot.slane %v4959_v48, 2 }
 0x5da   :  { %2427 = vrot.lane.b32.xlu0 %v5208_v10, %s3259_s23  ;;  %2425 = vrot.lane.b32.xlu1 %v5205_v38, %s3259_s23 }
 0x5dc   :  { %v5502_v30 = vpop.permute.xlu0 %2147  ;;  %v5504_v49 = vpop.permute.xlu1 %2145 }
 0x5dd   :  { %6860 = vst [vmem:[#allocation89_spill] sm:$0xff] %v5502_v30  ;;  %6861 = vst [vmem:[#allocation102_spill] sm:$0xff] %v5504_v49  ;;  %v2484_v30 = vrot.slane %v4978_v40, 2  ;;  %v2488_v40 = vrot.slane %v4972_v7, 2 }
 0x5de   :  { %2443 = vrot.lane.b32.xlu0 %v5192_v46, %s6581_s2  ;;  %2441 = vrot.lane.b32.xlu1 %v5189_v19, %s6581_s2 }
 0x5e0   :  { %v5510_v53 = vpop.permute.xlu0 %2163  ;;  %v5512_v41 = vpop.permute.xlu1 %2161 }
 0x5e1   :  { %6862 = vst [vmem:[#allocation95_spill] sm:$0xff] %v5510_v53  ;;  %6863 = vst [vmem:[#allocation100_spill] sm:$0xff] %v5512_v41  ;;  %v5527_v41 = vsel %vm6866_vm12, %v2480_v50, %v2481_v25  ;;  %v5530_v53 = vsel %vm6867_vm0, %v2483_v39, %v2484_v30  ;;  %v5543_v50 = vsel %vm6870_vm1, %v2481_v25, %v2486_v16  ;;  %v45_v16 = vld [vmem:[#allocation2] sm:$0xff]  ;;  %vm6881_vm12 = vcmask 777216  }
 0x5e2   :  { %2447 = vrot.lane.b32.xlu0 %v5208_v10, %s6581_s2  ;;  %2445 = vrot.lane.b32.xlu1 %v5205_v38, %s6581_s2  ;;  %v5546_v39 = vsel %vm6871_vm13, %v2484_v30, %v2488_v40  ;;  %v1639_v40 = vsel %vm246_vm5, %v5102_v15, %v5100_v63  ;;  %v1679_v63 = vsel %vm288_vm7, %v5134_v57, %v5132_v58  ;;  %vm6882_vm0 = vcmask 646144   ;;  %vm6884_vm13 = vmmov %vm6880_vm14 }
 0x5e3   :  { %v1709_v35 = vrot.slane %v45_v16, %v4292_v21  ;;  %vm6883_vm1 = vcmask 515072  }
 0x5e4   :  { %v5522_v46 = vpop.permute.xlu0 %2167  ;;  %v5524_v19 = vpop.permute.xlu1 %2165 }
 0x5e5   :  { %6864 = vst [vmem:[#allocation93_spill] sm:$0xff] %v5522_v46  ;;  %6865 = vst [vmem:[#allocation106_spill] sm:$0xff] %v5524_v19  ;;  %v1649_v46 = vrot.slane %v45_v16, %v4248_v1 }
 0x5e6   :  { %2492 = vrot.lane.b32.xlu0 %v5530_v53, %s3241_s25  ;;  %2490 = vrot.lane.b32.xlu1 %v5527_v41, %s3241_s25 }
 0x5e8   :  { %v5538_v38 = vpop.permute.xlu0 %2183  ;;  %v5540_v10 = vpop.permute.xlu1 %2181 }
 0x5e9   :  { %6868 = vst [vmem:[#allocation99_spill] sm:$0xff] %v5538_v38  ;;  %6869 = vst [vmem:[#allocation104_spill] sm:$0xff] %v5540_v10  ;;  %v1621_v10 = vrot.slane %v45_v16, %v4231_v23  ;;  %v1627_v38 = vrot.slane %v45_v16, %v4233_v5 }
 0x5ea   :  { %2496 = vrot.lane.b32.xlu0 %v5546_v39, %s3241_s25  ;;  %2494 = vrot.lane.b32.xlu1 %v5543_v50, %s3241_s25 }
 0x5eb   :  { %v1623_v15 = vmul.f32 %v1621_v10, %v4975_v45 }
 0x5ec   :  { %v5552_v7 = vpop.permute.xlu0 %2187  ;;  %v5554_v19 = vpop.permute.xlu1 %2185 }
 0x5ed   :  { %6872 = vst [vmem:[#allocation97_spill] sm:$0xff] %v5552_v7  ;;  %6873 = vst [vmem:[#allocation110_spill] sm:$0xff] %v5554_v19  ;;  %v1643_v7 = vmul.f32 %v1639_v40, %v1627_v38  ;;  %v1699_v40 = vsel %vm309_vm8, %v5150_v14, %v5148_v42  ;;  %v1658_v42 = vsel %vm267_vm6, %v5110_v28, %v5108_v18 }
 0x5ee   :  { %2512 = vrot.lane.b32.xlu0 %v5530_v53, %s3243_s5  ;;  %2510 = vrot.lane.b32.xlu1 %v5527_v41, %s3243_s5 }
 0x5ef   :  { %v1645_v58 = vadd.f32 %v1643_v7, %v1623_v15  ;;  %v1729_v15 = vrot.slane %v45_v16, %v4302_v20 }
 0x5f0   :  { %v5560_v25 = vpop.permute.xlu0 %2203  ;;  %v5562_v30 = vpop.permute.xlu1 %2201 }
 0x5f1   :  { %6874 = vst [vmem:[#allocation103_spill] sm:$0xff] %v5560_v25  ;;  %6875 = vst [vmem:[#allocation108_spill] sm:$0xff] %v5562_v30  ;;  %v1659_v30 = vsel %vm267_vm6, %v5118_v47, %v5116_v3  ;;  %v1689_v47 = vrot.slane %v45_v16, %v4276_v31 }
 0x5f2   :  { %2516 = vrot.lane.b32.xlu0 %v5546_v39, %s3243_s5  ;;  %2514 = vrot.lane.b32.xlu1 %v5543_v50, %s3243_s5 }
 0x5f4   :  { %v5573_v19 = vpop.permute.xlu0 %2207  ;;  %v5575_v25 = vpop.permute.xlu1 %2205 }
 0x5f5   :  { %6876 = vst [vmem:[#allocation101_spill] sm:$0xff] %v5573_v19  ;;  %6877 = vst [vmem:[#allocation114_spill] sm:$0xff] %v5575_v25  ;;  %v1663_v25 = vmul.f32 %v1659_v30, %v1649_v46  ;;  %v1669_v19 = vrot.slane %v45_v16, %v4257_v24  ;;  %v1719_v30 = vsel %vm330_vm9, %v5166_v6, %v5164_v2  ;;  %v5623_v6 = vld [vmem:[#allocation2 + $0x8] sm:$0xff] }
 0x5f6   :  { %2532 = vrot.lane.b32.xlu0 %v5530_v53, %s3244_s6  ;;  %2530 = vrot.lane.b32.xlu1 %v5527_v41, %s3244_s6  ;;  %v1678_v2 = vsel %vm288_vm7, %v5126_v4, %v5124_v37  ;;  %v1723_v28 = vmul.f32 %v1719_v30, %v1709_v35  ;;  %v1698_v37 = vsel %vm309_vm8, %v5142_v34, %v5140_v54 }
 0x5f7   :  { %v1683_v57 = vmul.f32 %v1679_v63, %v1669_v19  ;;  %v1665_v14 = vadd.f32 %v1663_v25, %v1645_v58  ;;  %v1642_v63 = vmul.f32 %v1638_v11, %v1627_v38  ;;  %v1622_v11 = vmul.f32 %v1621_v10, %v4959_v48 }
 0x5f8   :  { %v5590_v49 = vpop.permute.xlu0 %2223  ;;  %v5592_v3 = vpop.permute.xlu1 %2221  ;;  %v1662_v38 = vmul.f32 %v1658_v42, %v1649_v46  ;;  %v1749_v25 = vrot.slane %v45_v16, %v4314_v13  ;;  %v1682_v30 = vmul.f32 %v1678_v2, %v1669_v19  ;;  %v1769_v46 = vrot.slane %v5623_v6, %v4231_v23 }
 0x5f9   :  { %6878 = vst [vmem:[#allocation107_spill] sm:$0xff] %v5590_v49  ;;  %6879 = vst [vmem:[#allocation112_spill] sm:$0xff] %v5592_v3  ;;  %v1703_v3 = vmul.f32 %v1699_v40, %v1689_v47  ;;  %v1739_v49 = vsel %vm351_vm10, %v5186_v43, %v5184_v29  ;;  %v1685_v18 = vadd.f32 %v1683_v57, %v1665_v14 }
 0x5fa   :  { %2536 = vrot.lane.b32.xlu0 %v5546_v39, %s3244_s6  ;;  %2534 = vrot.lane.b32.xlu1 %v5543_v50, %s3244_s6  ;;  %v1759_v29 = vsel %vm372_vm11, %v5216_v8, %v5214_v44  ;;  %v1743_v43 = vmul.f32 %v1739_v49, %v1729_v15  ;;  %v1644_v57 = vadd.f32 %v1642_v63, %v1622_v11 }
 0x5fb   :  { %v1705_v4 = vadd.f32 %v1703_v3, %v1685_v18  ;;  %v1779_v44 = vsel %vm6880_vm14, %v5232_v32, %v5230_v27  ;;  %v1718_v54 = vsel %vm330_vm9, %v5158_v9, %v5156_v55  ;;  %v1763_v34 = vmul.f32 %v1759_v29, %v1749_v25  ;;  %v6887_v29 = vld [vmem:[#allocation32_spill] sm:$0xff] }
 0x5fc   :  { %v5612_v61 = vpop.permute.xlu0 %2227  ;;  %v5614_v7 = vpop.permute.xlu1 %2225  ;;  %v1664_v8 = vadd.f32 %v1662_v38, %v1644_v57  ;;  %v1702_v19 = vmul.f32 %v1698_v37, %v1689_v47  ;;  %v1799_v10 = vsel %vm6881_vm12, %v5248_v52, %v5246_v51  ;;  %v1738_v27 = vsel %vm351_vm10, %v5174_v17, %v5172_v36  ;;  %v6889_v57 = vld [vmem:[#allocation43_spill] sm:$0xff] }
 0x5fd   :  { %v1725_v49 = vadd.f32 %v1723_v28, %v1705_v4  ;;  %v1783_v55 = vmul.f32 %v1779_v44, %v1769_v46  ;;  %v1789_v9 = vrot.slane %v5623_v6, %v4233_v5  ;;  %v1722_v14 = vmul.f32 %v1718_v54, %v1709_v35  ;;  %v6892_v54 = vld [vmem:[#allocation42_spill] sm:$0xff] }
 0x5fe   :  { %2552 = vrot.lane.b32.xlu0 %v5530_v53, %s3245_s7  ;;  %2550 = vrot.lane.b32.xlu1 %v5527_v41, %s3245_s7  ;;  %v1684_v42 = vadd.f32 %v1682_v30, %v1664_v8  ;;  %v1809_v47 = vrot.slane %v5623_v6, %v4248_v1  ;;  %v1819_v51 = vsel %vm6882_vm0, %v5264_v0, %v5262_v26  ;;  %vm6886_vm14 = vcmask 384000   ;;  %v6890_v30 = vld [vmem:[#allocation51_spill] sm:$0xff] }
 0x5ff   :  { %v1745_v32 = vadd.f32 %v1743_v43, %v1725_v49  ;;  %v1758_v36 = vsel %vm372_vm11, %v5202_v62, %v5200_v22  ;;  %v1803_v52 = vmul.f32 %v1799_v10, %v1789_v9  ;;  %v1742_v63 = vmul.f32 %v1738_v27, %v1729_v15 }
 0x600   :  { %v5637_v40 = vpop.permute.xlu0 %2243  ;;  %v5639_v58 = vpop.permute.xlu1 %2241  ;;  %v1704_v35 = vadd.f32 %v1702_v19, %v1684_v42  ;;  %v1839_v2 = vsel %vm6883_vm1, %v5280_v59, %v5278_v60  ;;  %v1778_v26 = vsel %vm6884_vm13, %v5224_v56, %v5222_v12  ;;  %v1823_v22 = vmul.f32 %v1819_v51, %v1809_v47  ;;  %v6885_v60 = vld [vmem:[#allocation45_spill] sm:$0xff]  ;;  %v6888_v12 = vld [vmem:[#allocation38_spill] sm:$0xff]  ;;  %v6895_v42 = vld [vmem:[#allocation48_spill] sm:$0xff] }
 0x601   :  { %v1765_v17 = vadd.f32 %v1763_v34, %v1745_v32  ;;  %v1829_v62 = vrot.slane %v5623_v6, %v4257_v24  ;;  %v1762_v38 = vmul.f32 %v1758_v36, %v1749_v25  ;;  %v1849_v15 = vrot.slane %v5623_v6, %v4276_v31  ;;  %v6898_v36 = vld [vmem:[#allocation142_spill] sm:$0xff] }
 0x602   :  { %2556 = vrot.lane.b32.xlu0 %v5546_v39, %s3245_s7  ;;  %2554 = vrot.lane.b32.xlu1 %v5543_v50, %s3245_s7  ;;  %v1724_v11 = vadd.f32 %v1722_v14, %v1704_v35  ;;  %v1859_v59 = vsel %vm6886_vm14, %v6885_v60, %v5294_v33  ;;  %v1798_v56 = vsel %vm6881_vm12, %v6888_v12, %v6887_v29  ;;  %vm6891_vm0 = vcmask 252928   ;;  %v6893_v33 = vld [vmem:[#allocation36_spill] sm:$0xff]  ;;  %v6896_v14 = vld [vmem:[#allocation53_spill] sm:$0xff] }
 0x603   :  { %v1785_v0 = vadd.f32 %v1783_v55, %v1765_v17  ;;  %v1843_v4 = vmul.f32 %v1839_v2, %v1829_v62  ;;  %v1782_v25 = vmul.f32 %v1778_v26, %v1769_v46  ;;  %v1879_v44 = vsel %vm6891_vm0, %v6890_v30, %v6889_v57  ;;  %v6899_v17 = vld [vmem:[#allocation141_spill] sm:$0xff]  ;;  %v6901_v26 = vld [vmem:[#allocation52_spill] sm:$0xff] }
 0x604   :  { %v5661_v16 = vpop.permute.xlu0 %2247  ;;  %v5663_v3 = vpop.permute.xlu1 %2245  ;;  %v1744_v43 = vadd.f32 %v1742_v63, %v1724_v11  ;;  %vm6894_vm1 = vcmask 646144   ;;  %v1863_v8 = vmul.f32 %v1859_v59, %v1849_v15  ;;  %v1869_v19 = vrot.slane %v5623_v6, %v4292_v21  ;;  %v5728_v11 = vld [vmem:[#allocation2 + $0x10] sm:$0xff]  ;;  %v6905_v60 = vld [vmem:[#allocation41_spill] sm:$0xff] }
 0x605   :  { %v1805_v37 = vadd.f32 %v1803_v52, %v1785_v0  ;;  %v1818_v49 = vsel %vm6894_vm1, %v6893_v33, %v6892_v54  ;;  %v1802_v55 = vmul.f32 %v1798_v56, %v1789_v9  ;;  %v1889_v46 = vrot.slane %v5623_v6, %v4302_v20  ;;  %v6902_v0 = vld [vmem:[#allocation57_spill] sm:$0xff]  ;;  %v6907_v57 = vld [vmem:[#allocation56_spill] sm:$0xff] }
 0x606   :  { %2572 = vrot.lane.b32.xlu0 %v5530_v53, %s3246_s8  ;;  %2570 = vrot.lane.b32.xlu1 %v5527_v41, %s3246_s8  ;;  %v1764_v32 = vadd.f32 %v1762_v38, %v1744_v43  ;;  %vm6897_vm13 = vcmask 1031168   ;;  %vm6900_vm14 = vcmask 515072   ;;  %v1883_v63 = vmul.f32 %v1879_v44, %v1869_v19  ;;  %v6904_v38 = vld [vmem:[#allocation47_spill] sm:$0xff]  ;;  %v6908_v30 = vld [vmem:[#allocation61_spill] sm:$0xff]  ;;  %v6909_v54 = vld [vmem:[#allocation40_spill] sm:$0xff] }
 0x607   :  { %v1825_v34 = vadd.f32 %v1823_v22, %v1805_v37  ;;  %v1899_v51 = vsel %vm6897_vm13, %v6896_v14, %v6895_v42  ;;  %v1838_v52 = vsel %vm6900_vm14, %v6899_v17, %v6898_v36  ;;  %v1822_v2 = vmul.f32 %v1818_v49, %v1809_v47  ;;  %v6910_v33 = vld [vmem:[#allocation49_spill] sm:$0xff]  ;;  %v6915_v36 = vld [vmem:[#allocation55_spill] sm:$0xff] }
 0x608   :  { %v5685_v18 = vpop.permute.xlu0 %2263  ;;  %v5687_v28 = vpop.permute.xlu1 %2261  ;;  %v1784_v9 = vadd.f32 %v1782_v25, %v1764_v32  ;;  %vm6903_vm12 = vcmask 900096   ;;  %vm6906_vm0 = vcmask 384000   ;;  %v1903_v12 = vmul.f32 %v1899_v51, %v1889_v46  ;;  %v6913_v42 = vld [vmem:[#allocation65_spill] sm:$0xff]  ;;  %v6914_v51 = vld [vmem:[#allocation44_spill] sm:$0xff] }
 0x609   :  { %v1845_v35 = vadd.f32 %v1843_v4, %v1825_v34  ;;  %v1919_v22 = vsel %vm6903_vm12, %v6902_v0, %v6901_v26  ;;  %v1858_v59 = vsel %vm6906_vm0, %v6905_v60, %v6904_v38  ;;  %v1909_v56 = vrot.slane %v5623_v6, %v4314_v13  ;;  %v6917_v38 = vld [vmem:[#allocation69_spill] sm:$0xff]  ;;  %vm6920_vm14 = vmmov %vm6903_vm12 }
 0x60a   :  { %2576 = vrot.lane.b32.xlu0 %v5546_v39, %s3246_s8  ;;  %2574 = vrot.lane.b32.xlu1 %v5543_v50, %s3246_s8  ;;  %v1804_v47 = vadd.f32 %v1802_v55, %v1784_v9  ;;  %v1842_v43 = vmul.f32 %v1838_v52, %v1829_v62  ;;  %v1929_v25 = vrot.slane %v5728_v11, %v4231_v23  ;;  %vm6911_vm1 = vcmask 252928   ;;  %v6912_v55 = vld [vmem:[#allocation60_spill] sm:$0xff] }
 0x60b   :  { %v1865_v29 = vadd.f32 %v1863_v8, %v1845_v35  ;;  %v1939_v44 = vsel %vm560_vm4, %v6908_v30, %v6907_v57  ;;  %v1878_v49 = vsel %vm6911_vm1, %v6910_v33, %v6909_v54  ;;  %v1923_v8 = vmul.f32 %v1919_v22, %v1909_v56  ;;  %v6916_v22 = vld [vmem:[#allocation64_spill] sm:$0xff] }
 0x60c   :  { %v5709_v10 = vpop.permute.xlu0 %2267  ;;  %v5711_v27 = vpop.permute.xlu1 %2265  ;;  %v5753_v6 = vrot.slane %v5728_v11, %v4292_v21  ;;  %v1824_v62 = vadd.f32 %v1822_v2, %v1804_v47  ;;  %v1862_v32 = vmul.f32 %v1858_v59, %v1849_v15  ;;  %v1959_v14 = vsel %vm581_vm15, %v6913_v42, %v6912_v55  ;;  %v6918_v59 = vld [vmem:[#allocation46_spill] sm:$0xff]  ;;  %v6922_v54 = vld [vmem:[#allocation76_spill] sm:$0xff] }
 0x60d   :  { %v1885_v34 = vadd.f32 %v1883_v63, %v1865_v29  ;;  %v1898_v17 = vsel %vm6897_vm13, %v6915_v36, %v6914_v51  ;;  %v1943_v35 = vmul.f32 %v1939_v44, %v1929_v25  ;;  %v1949_v63 = vrot.slane %v5728_v11, %v4233_v5  ;;  %v6919_v29 = vld [vmem:[#allocation59_spill] sm:$0xff]  ;;  %v6921_v44 = vld [vmem:[#allocation68_spill] sm:$0xff] }
 0x60e   :  { %2592 = vrot.lane.b32.xlu0 %v5530_v53, %s3247_s9  ;;  %2590 = vrot.lane.b32.xlu1 %v5527_v41, %s3247_s9  ;;  %v1844_v0 = vadd.f32 %v1842_v43, %v1824_v62  ;;  %v1882_v2 = vmul.f32 %v1878_v49, %v1869_v19  ;;  %v1969_v15 = vrot.slane %v5728_v11, %v4248_v1  ;;  %v6923_v49 = vld [vmem:[#allocation50_spill] sm:$0xff]  ;;  %vm6927_vm12 = vcmask 244736  }
 0x60f   :  { %v1905_v52 = vadd.f32 %v1903_v12, %v1885_v34  ;;  %v1979_v60 = vsel %vm602_vm3, %v6917_v38, %v6916_v22  ;;  %v1918_v12 = vsel %vm6920_vm14, %v6919_v29, %v6918_v59  ;;  %v1963_v57 = vmul.f32 %v1959_v14, %v1949_v63  ;;  %v6924_v34 = vld [vmem:[#allocation63_spill] sm:$0xff]  ;;  %v6928_v22 = vld [vmem:[#allocation54_spill] sm:$0xff]  ;;  %vm6939_vm0 = vmmov %vm6927_vm12 }
 0x610   :  { %v5735_v37 = vpop.permute.xlu0 %2283  ;;  %v5737_v4 = vpop.permute.xlu1 %2281  ;;  %v5781_v19 = vmul.f32 %v5753_v6, %v4975_v45  ;;  %v1864_v43 = vadd.f32 %v1862_v32, %v1844_v0  ;;  %v1902_v30 = vmul.f32 %v1898_v17, %v1889_v46  ;;  %v1999_v33 = vsel %vm623_vm2, %v6922_v54, %v6921_v44  ;;  %v6925_v17 = vld [vmem:[#allocation75_spill] sm:$0xff] }
 0x611   :  { %v1925_v47 = vadd.f32 %v1923_v8, %v1905_v52  ;;  %v1938_v8 = vsel %vm560_vm4, %v6924_v34, %v6923_v49  ;;  %v1983_v55 = vmul.f32 %v1979_v60, %v1969_v15  ;;  %v1989_v42 = vrot.slane %v5728_v11, %v4257_v24  ;;  %v6926_v52 = vld [vmem:[#allocation80_spill] sm:$0xff]  ;;  %v6929_v38 = vld [vmem:[#allocation67_spill] sm:$0xff] }
 0x612   :  { %2596 = vrot.lane.b32.xlu0 %v5546_v39, %s3247_s9  ;;  %2594 = vrot.lane.b32.xlu1 %v5543_v50, %s3247_s9  ;;  %v1884_v36 = vadd.f32 %v1882_v2, %v1864_v43  ;;  %v1922_v32 = vmul.f32 %v1918_v12, %v1909_v56  ;;  %v2009_v46 = vrot.slane %v5728_v11, %v4276_v31  ;;  %v6930_v56 = vld [vmem:[#allocation34_spill] sm:$0xff]  ;;  %vm6942_vm1 = vcmask 1046528  }
 0x613   :  { %v1945_v62 = vadd.f32 %v1943_v35, %v1925_v47  ;;  %v2019_v0 = vsel %vm6927_vm12, %v6926_v52, %v6925_v17  ;;  %v1958_v35 = vsel %vm581_vm15, %v6929_v38, %v6928_v22  ;;  %v2003_v59 = vmul.f32 %v1999_v33, %v1989_v42  ;;  %v6931_v47 = vld [vmem:[#allocation58_spill] sm:$0xff]  ;;  %vm6954_vm13 = vmmov %vm6942_vm1 }
 0x614   :  { %v5763_v9 = vpop.permute.xlu0 %2287  ;;  %v5765_v26 = vpop.permute.xlu1 %2285  ;;  %v2032_v2 = vmul.f32 %v5753_v6, %v6930_v56  ;;  %v1904_v29 = vadd.f32 %v1902_v30, %v1884_v36  ;;  %v1942_v12 = vmul.f32 %v1938_v8, %v1929_v25  ;;  %v6932_v43 = vld [vmem:[#allocation74_spill] sm:$0xff]  ;;  %v2023_v49 = vmul.f32 %v2019_v0, %v2009_v46  ;;  %v6935_v36 = vld [vmem:[#allocation79_spill] sm:$0xff]  ;;  %v6936_v0 = vld [vmem:[#allocation84_spill] sm:$0xff] }
 0x615   :  { %v1965_v60 = vadd.f32 %v1963_v57, %v1945_v62  ;;  %v1978_v44 = vsel %vm602_vm3, %v6932_v43, %v6931_v47  ;;  %v1962_v62 = vmul.f32 %v1958_v35, %v1949_v63  ;;  %v2037_v17 = vrot.slane %v5781_v19, 1  ;;  %v6933_v52 = vld [vmem:[#allocation62_spill] sm:$0xff]  ;;  %v6961_v56 = vld [vmem:[#allocation92_spill] sm:$0xff] }
 0x616   :  { %2612 = vrot.lane.b32.xlu0 %v5530_v53, %s3248_s10  ;;  %2610 = vrot.lane.b32.xlu1 %v5527_v41, %s3248_s10  ;;  %v1924_v33 = vadd.f32 %v1922_v32, %v1904_v29  ;;  %v6934_v22 = vld [vmem:[#allocation78_spill] sm:$0xff]  ;;  %v2039_v25 = vrot.slane %v2032_v2, 1  ;;  %v2070_v63 = vsel %vm246_vm5, %v6936_v0, %v6935_v36  ;;  %vm6965_vm14 = vcmask 908288  }
 0x617   :  { %v1985_v54 = vadd.f32 %v1983_v55, %v1965_v60  ;;  %v1998_v38 = vsel %vm623_vm2, %v6934_v22, %v6933_v52  ;;  %v1982_v55 = vmul.f32 %v1978_v44, %v1969_v15  ;;  %v6937_v32 = vld [vmem:[#allocation66_spill] sm:$0xff]  ;;  %v2030_v15 = vmul.f32 %v5753_v6, %v4959_v48  ;;  %v6943_v22 = vld [vmem:[#allocation87_spill] sm:$0xff] }
 0x618   :  { %v5791_v14 = vpop.permute.xlu0 %2303  ;;  %v5793_v51 = vpop.permute.xlu1 %2301  ;;  %v1944_v8 = vadd.f32 %v1942_v12, %v1924_v33  ;;  %v6938_v19 = vld [vmem:[#allocation82_spill] sm:$0xff]  ;;  %v2002_v2 = vmul.f32 %v1998_v38, %v1989_v42  ;;  %v6940_v12 = vld [vmem:[#allocation81_spill] sm:$0xff]  ;;  %v2040_v42 = vsel %vm6942_vm1, %v2037_v17, %v2039_v25  ;;  %vm6968_vm12 = vcmask 777216  }
 0x619   :  { %v2005_v30 = vadd.f32 %v2003_v59, %v1985_v54  ;;  %v2018_v35 = vsel %vm6939_vm0, %v6938_v19, %v6937_v32  ;;  %v2048_v59 = vrot.slane %v5728_v11, %v4302_v20  ;;  %v6941_v44 = vld [vmem:[#allocation90_spill] sm:$0xff]  ;;  %v5841_v33 = vld [vmem:[#allocation2 + $0x18] sm:$0xff]  ;;  %v2036_v19 = vrot.slane %v2030_v15, 1 }
 0x61a   :  { %2616 = vrot.lane.b32.xlu0 %v5546_v39, %s3248_s10  ;;  %2614 = vrot.lane.b32.xlu1 %v5543_v50, %s3248_s10  ;;  %v1964_v43 = vadd.f32 %v1962_v62, %v1944_v8  ;;  %v2090_v54 = vsel %vm267_vm6, %v6941_v44, %v6940_v12  ;;  %v2022_v6 = vmul.f32 %v2018_v35, %v2009_v46  ;;  %v6944_v38 = vld [vmem:[#allocation9_spill] sm:$0xff]  ;;  %v6946_v46 = vld [vmem:[#allocation91_spill] sm:$0xff]  ;;  %v6948_v12 = vld [vmem:[#allocation86_spill] sm:$0xff]  ;;  %vm6971_vm0 = vcmask 646144  }
 0x61b   :  { %v2025_v60 = vadd.f32 %v2023_v49, %v2005_v30  ;;  %v2074_v52 = vmul.f32 %v2070_v63, %v2048_v59  ;;  %v2080_v49 = vrot.slane %v5728_v11, %v4314_v13  ;;  %v2110_v30 = vsel %vm288_vm7, %v6944_v38, %v6943_v22  ;;  %v6949_v15 = vld [vmem:[#allocation89_spill] sm:$0xff]  ;;  %v6952_v38 = vld [vmem:[#allocation88_spill] sm:$0xff] }
 0x61c   :  { %v5812_v34 = vpop.permute.xlu0 %2307  ;;  %v5814_v57 = vpop.permute.xlu1 %2305  ;;  %v1984_v62 = vadd.f32 %v1982_v55, %v1964_v43  ;;  %v2100_v0 = vrot.slane %v5841_v33, %v4231_v23  ;;  %v2120_v25 = vrot.slane %v5841_v33, %v4233_v5  ;;  %v6945_v55 = vld [vmem:[#allocation98_spill] sm:$0xff]  ;;  %v6947_v43 = vld [vmem:[#allocation73_spill] sm:$0xff]  ;;  %vm6974_vm1 = vcmask 515072  }
 0x61d   :  { %v2044_v8 = vadd.f32 %v2040_v42, %v2025_v60  ;;  %v2094_v36 = vmul.f32 %v2090_v54, %v2080_v49  ;;  %v2130_v35 = vsel %vm309_vm8, %v6946_v46, %v6945_v55  ;;  %v2069_v60 = vsel %vm246_vm5, %v6948_v12, %v6947_v43  ;;  %v6950_v42 = vld [vmem:[#allocation102_spill] sm:$0xff]  ;;  %v6951_v22 = vld [vmem:[#allocation77_spill] sm:$0xff] }
 0x61e   :  { %2632 = vrot.lane.b32.xlu0 %v5530_v53, %s3249_s11  ;;  %2630 = vrot.lane.b32.xlu1 %v5527_v41, %s3249_s11  ;;  %v2004_v32 = vadd.f32 %v2002_v2, %v1984_v62  ;;  %v2114_v54 = vmul.f32 %v2110_v30, %v2100_v0  ;;  %v2150_v62 = vsel %vm330_vm9, %v6950_v42, %v6949_v15  ;;  %v6955_v12 = vld [vmem:[#allocation93_spill] sm:$0xff]  ;;  %v6956_v15 = vld [vmem:[#allocation106_spill] sm:$0xff] }
 0x61f   :  { %v2076_v44 = vadd.f32 %v2074_v52, %v2044_v8  ;;  %v2089_v55 = vsel %vm267_vm6, %v6952_v38, %v6951_v22  ;;  %v2134_v45 = vmul.f32 %v2130_v35, %v2120_v25  ;;  %v2140_v52 = vrot.slane %v5841_v33, %v4248_v1  ;;  %v6957_v22 = vld [vmem:[#allocation83_spill] sm:$0xff] }
 0x620   :  { %v5832_v29 = vpop.permute.xlu0 %2323  ;;  %v5834_v47 = vpop.permute.xlu1 %2321  ;;  %v2024_v2 = vadd.f32 %v2022_v6, %v2004_v32  ;;  %v2038_v43 = vsel %vm6954_vm13, %v2036_v19, %v2037_v17  ;;  %v2073_v6 = vmul.f32 %v2069_v60, %v2048_v59  ;;  %v2160_v32 = vrot.slane %v5841_v33, %v4257_v24  ;;  %v6959_v19 = vld [vmem:[#allocation97_spill] sm:$0xff]  ;;  %v6960_v60 = vld [vmem:[#allocation110_spill] sm:$0xff]  ;;  %vm6977_vm13 = vmmov %vm6965_vm14 }
 0x621   :  { %v2096_v46 = vadd.f32 %v2094_v36, %v2076_v44  ;;  %v2170_v42 = vsel %vm351_vm10, %v6956_v15, %v6955_v12  ;;  %v6958_v36 = vld [vmem:[#allocation94_spill] sm:$0xff]  ;;  %v2154_v38 = vmul.f32 %v2150_v62, %v2140_v52  ;;  %v2093_v59 = vmul.f32 %v2089_v55, %v2080_v49  ;;  %v6962_v12 = vld [vmem:[#allocation85_spill] sm:$0xff] }
 0x622   :  { %2636 = vrot.lane.b32.xlu0 %v5546_v39, %s3249_s11  ;;  %2634 = vrot.lane.b32.xlu1 %v5543_v50, %s3249_s11  ;;  %v2109_v35 = vsel %vm288_vm7, %v6958_v36, %v6957_v22  ;;  %v2043_v17 = vadd.f32 %v2038_v43, %v2024_v2  ;;  %v2190_v48 = vsel %vm372_vm11, %v6960_v60, %v6959_v19  ;;  %v6963_v55 = vld [vmem:[#allocation101_spill] sm:$0xff]  ;;  %v6964_v43 = vld [vmem:[#allocation114_spill] sm:$0xff] }
 0x623   :  { %v2116_v44 = vadd.f32 %v2114_v54, %v2096_v46  ;;  %v2129_v15 = vsel %vm309_vm8, %v6962_v12, %v6961_v56  ;;  %v2174_v22 = vmul.f32 %v2170_v42, %v2160_v32  ;;  %v2180_v54 = vrot.slane %v5841_v33, %v4276_v31  ;;  %v6966_v60 = vld [vmem:[#allocation10_spill] sm:$0xff]  ;;  %v6967_v56 = vld [vmem:[#allocation96_spill] sm:$0xff] }
 0x624   :  { %v5855_v11 = vpop.permute.xlu0 %2327  ;;  %v5857_v63 = vpop.permute.xlu1 %2325  ;;  %v2075_v36 = vadd.f32 %v2073_v6, %v2043_v17  ;;  %v2113_v2 = vmul.f32 %v2109_v35, %v2100_v0  ;;  %v2200_v49 = vrot.slane %v5841_v33, %v4292_v21  ;;  %v2210_v19 = vsel %vm6965_vm14, %v6964_v43, %v6963_v55  ;;  %v6969_v17 = vld [vmem:[#allocation95_spill] sm:$0xff]  ;;  %v6970_v12 = vld [vmem:[#allocation100_spill] sm:$0xff] }
 0x625   :  { %v2133_v6 = vmul.f32 %v2129_v15, %v2120_v25  ;;  %v2230_v35 = vsel %vm6968_vm12, %v5614_v7, %v5612_v61  ;;  %v2169_v55 = vsel %vm351_vm10, %v6970_v12, %v6969_v17  ;;  %v2240_v25 = vrot.slane %v5841_v33, %v4314_v13  ;;  %v5937_v7 = vld [vmem:[#allocation2 + $0x20] sm:$0xff]  ;;  %v6972_v15 = vld [vmem:[#allocation99_spill] sm:$0xff] }
 0x626   :  { %2652 = vrot.lane.b32.xlu0 %v5530_v53, %s3250_s12  ;;  %2650 = vrot.lane.b32.xlu1 %v5527_v41, %s3250_s12  ;;  %v2095_v0 = vadd.f32 %v2093_v59, %v2075_v36  ;;  %v2250_v61 = vsel %vm6971_vm0, %v5663_v3, %v5661_v16  ;;  %v2270_v16 = vsel %vm6974_vm1, %v5711_v27, %v5709_v10  ;;  %v6975_v3 = vld [vmem:[#allocation103_spill] sm:$0xff]  ;;  %vm6978_vm14 = vcmask 384000  }
 0x627   :  { %v2254_v17 = vmul.f32 %v2250_v61, %v2240_v25  ;;  %v2290_v10 = vsel %vm6978_vm14, %v5765_v26, %v5763_v9  ;;  %v6979_v27 = vld [vmem:[#allocation107_spill] sm:$0xff]  ;;  %vm6981_vm0 = vcmask 252928   ;;  %vm6982_vm1 = vcmask 646144  }
 0x628   :  { %v5879_v30 = vpop.permute.xlu0 %2343  ;;  %v5881_v8 = vpop.permute.xlu1 %2341  ;;  %v2310_v61 = vsel %vm6981_vm0, %v5814_v57, %v5812_v34  ;;  %v2249_v9 = vsel %vm6982_vm1, %v5639_v58, %v5637_v40  ;;  %vm6984_vm14 = vcmask 515072   ;;  %vm6986_vm0 = vcmask 384000  }
 0x629   :  { %6953 = vst [vmem:[#allocation105_spill] sm:$0xff] %v5881_v8  ;;  %v2136_v8 = vadd.f32 %v2134_v45, %v2116_v44  ;;  %v2149_v45 = vsel %vm330_vm9, %v6967_v56, %v6966_v60  ;;  %v2194_v44 = vmul.f32 %v2190_v48, %v2180_v54  ;;  %v2214_v60 = vmul.f32 %v2210_v19, %v2200_v49 }
 0x62a   :  { %2656 = vrot.lane.b32.xlu0 %v5546_v39, %s3250_s12  ;;  %2654 = vrot.lane.b32.xlu1 %v5543_v50, %s3250_s12  ;;  %v2220_v48 = vrot.slane %v5841_v33, %v4302_v20  ;;  %v2115_v56 = vadd.f32 %v2113_v2, %v2095_v0  ;;  %v2153_v59 = vmul.f32 %v2149_v45, %v2140_v52  ;;  %v6976_v2 = vld [vmem:[#allocation108_spill] sm:$0xff]  ;;  %vm6987_vm1 = vcmask 252928  }
 0x62b   :  { %v2156_v42 = vadd.f32 %v2154_v38, %v2136_v8  ;;  %v2173_v33 = vmul.f32 %v2169_v55, %v2160_v32  ;;  %v2209_v45 = vsel %vm6977_vm13, %v6976_v2, %v6975_v3  ;;  %v2280_v32 = vrot.slane %v5937_v7, %v4233_v5 }
 0x62c   :  { %v5904_v62 = vpop.permute.xlu0 %2347  ;;  %v5906_v46 = vpop.permute.xlu1 %2345  ;;  %v2135_v52 = vadd.f32 %v2133_v6, %v2115_v56  ;;  %v6980_v6 = vld [vmem:[#allocation112_spill] sm:$0xff]  ;;  %vm6983_vm13 = vcmask 1031168   ;;  %v2269_v40 = vsel %vm6984_vm14, %v5687_v28, %v5685_v18  ;;  %v2340_v28 = vrot.slane %v5937_v7, %v4276_v31 }
 0x62d   :  { %v2176_v43 = vadd.f32 %v2174_v22, %v2156_v42  ;;  %v6973_v22 = vld [vmem:[#allocation104_spill] sm:$0xff]  ;;  %v2234_v42 = vmul.f32 %v2230_v35, %v2220_v48  ;;  %v2229_v55 = vsel %vm6968_vm12, %v6980_v6, %v6979_v27  ;;  %v2330_v34 = vsel %vm6983_vm13, %v5857_v63, %v5855_v11 }
 0x62e   :  { %2672 = vrot.lane.b32.xlu0 %v5530_v53, %s3242_s4  ;;  %2670 = vrot.lane.b32.xlu1 %v5527_v41, %s3242_s4  ;;  %v2189_v36 = vsel %vm372_vm11, %v6973_v22, %v6972_v15  ;;  %v2294_v22 = vmul.f32 %v2290_v10, %v2280_v32  ;;  %vm6985_vm12 = vcmask 900096   ;;  %v2289_v11 = vsel %vm6986_vm0, %v5737_v4, %v5735_v37 }
 0x62f   :  { %v2196_v19 = vadd.f32 %v2194_v44, %v2176_v43  ;;  %v2260_v44 = vrot.slane %v5937_v7, %v4231_v23  ;;  %v2155_v43 = vadd.f32 %v2153_v59, %v2135_v52  ;;  %v2193_v15 = vmul.f32 %v2189_v36, %v2180_v54  ;;  %vm6989_vm14 = vmmov %vm6985_vm12 }
 0x630   :  { %v5928_v8 = vpop.permute.xlu0 %2363  ;;  %v5930_v38 = vpop.permute.xlu1 %2361  ;;  %v2213_v59 = vmul.f32 %v2209_v45, %v2200_v49  ;;  %v2300_v36 = vrot.slane %v5937_v7, %v4248_v1  ;;  %v2320_v49 = vrot.slane %v5937_v7, %v4257_v24  ;;  %v2350_v3 = vsel %vm6985_vm12, %v5906_v46, %v5904_v62 }
 0x631   :  { %v2216_v0 = vadd.f32 %v2214_v60, %v2196_v19  ;;  %v2274_v56 = vmul.f32 %v2270_v16, %v2260_v44  ;;  %v2175_v54 = vadd.f32 %v2173_v33, %v2155_v43  ;;  %v2233_v16 = vmul.f32 %v2229_v55, %v2220_v48 }
 0x632   :  { %2676 = vrot.lane.b32.xlu0 %v5546_v39, %s3242_s4  ;;  %2674 = vrot.lane.b32.xlu1 %v5543_v50, %s3242_s4  ;;  %v2314_v57 = vmul.f32 %v2310_v61, %v2300_v36  ;;  %v2253_v33 = vmul.f32 %v2249_v9, %v2240_v25  ;;  %v2334_v18 = vmul.f32 %v2330_v34, %v2320_v49  ;;  %vm6991_vm12 = vcmask 244736  }
 0x633   :  { %v2236_v60 = vadd.f32 %v2234_v42, %v2216_v0  ;;  %v2195_v52 = vadd.f32 %v2193_v15, %v2175_v54  ;;  %v2360_v25 = vrot.slane %v5937_v7, %v4292_v21  ;;  %v2309_v62 = vsel %vm6987_vm1, %v5793_v51, %v5791_v14  ;;  %v6988_v54 = vld [vmem:[#allocation105_spill] sm:$0xff]  ;;  %vm6994_vm0 = vmmov %vm6991_vm12 }
 0x634   :  { %v2368_v35 = vpop.permute.xlu0 %2367  ;;  %v2366_v12 = vpop.permute.xlu1 %2365  ;;  %v2354_v37 = vmul.f32 %v2350_v3, %v2340_v28  ;;  %v2293_v15 = vmul.f32 %v2289_v11, %v2280_v32  ;;  %v2313_v51 = vmul.f32 %v2309_v62, %v2300_v36  ;;  %v2329_v55 = vsel %vm6983_vm13, %v5834_v47, %v5832_v29 }
 0x635   :  { %v2256_v26 = vadd.f32 %v2254_v17, %v2236_v60  ;;  %v2215_v48 = vadd.f32 %v2213_v59, %v2195_v52  ;;  %v2273_v17 = vmul.f32 %v2269_v40, %v2260_v44  ;;  %v2370_v43 = vsel %vm560_vm4, %v2366_v12, %v2368_v35 }
 0x636   :  { %2692 = vrot.lane.b32.xlu0 %v5530_v53, %s3251_s13  ;;  %2690 = vrot.lane.b32.xlu1 %v5527_v41, %s3251_s13  ;;  %v2374_v27 = vmul.f32 %v2370_v43, %v2360_v25  ;;  %v2380_v35 = vrot.slane %v5937_v7, %v4302_v20  ;;  %v2349_v59 = vsel %vm6989_vm14, %v6988_v54, %v5879_v30  ;;  %vm6995_vm1 = vcmask 1045504  }
 0x637   :  { %v2276_v58 = vadd.f32 %v2274_v56, %v2256_v26  ;;  %v2235_v0 = vadd.f32 %v2233_v16, %v2215_v48  ;;  %v2333_v61 = vmul.f32 %v2329_v55, %v2320_v49  ;;  %v2400_v26 = vrot.slane %v5937_v7, %v4314_v13  ;;  %vm6996_vm13 = vmmov %vm6995_vm1 }
 0x638   :  { %v2384_v19 = vpop.permute.xlu0 %2383  ;;  %v2382_v42 = vpop.permute.xlu1 %2381  ;;  %v2369_v36 = vsel %vm560_vm4, %v5930_v38, %v5928_v8  ;;  %v2353_v16 = vmul.f32 %v2349_v59, %v2340_v28  ;;  %vm7006_vm14 = vcmask 384000  }
 0x639   :  { %v2296_v63 = vadd.f32 %v2294_v22, %v2276_v58  ;;  %v2255_v4 = vadd.f32 %v2253_v33, %v2235_v0  ;;  %v2389_v30 = vsel %vm581_vm15, %v2382_v42, %v2384_v19  ;;  %v2373_v49 = vmul.f32 %v2369_v36, %v2360_v25  ;;  %v6028_v33 = vld [vmem:[#allocation2 + $0x28] sm:$0xff] }
 0x63a   :  { %2696 = vrot.lane.b32.xlu0 %v5546_v39, %s3251_s13  ;;  %2694 = vrot.lane.b32.xlu1 %v5543_v50, %s3251_s13  ;;  %v2393_v11 = vmul.f32 %v2389_v30, %v2380_v35  ;;  %v2440_v0 = vrot.slane %v6028_v33, %v4233_v5 }
 0x63b   :  { %v2316_v46 = vadd.f32 %v2314_v57, %v2296_v63  ;;  %v2275_v14 = vadd.f32 %v2273_v17, %v2255_v4  ;;  %v2420_v63 = vrot.slane %v6028_v33, %v4231_v23 }
 0x63c   :  { %v2388_v2 = vpop.permute.xlu0 %2387  ;;  %v2386_v45 = vpop.permute.xlu1 %2385 }
 0x63d   :  { %v2390_v44 = vsel %vm581_vm15, %v2386_v45, %v2388_v2  ;;  %v2336_v10 = vadd.f32 %v2334_v18, %v2316_v46  ;;  %v2295_v32 = vadd.f32 %v2293_v15, %v2275_v14  ;;  %v2460_v2 = vrot.slane %v6028_v33, %v4248_v1  ;;  %v6990_v15 = vld [vmem:[#allocation34_spill] sm:$0xff] }
 0x63e   :  { %2712 = vrot.lane.b32.xlu0 %v5530_v53, %s3252_s14  ;;  %2710 = vrot.lane.b32.xlu1 %v5527_v41, %s3252_s14  ;;  %v2394_v56 = vmul.f32 %v2390_v44, %v2380_v35 }
 0x63f   :  { %v2356_v60 = vadd.f32 %v2354_v37, %v2336_v10  ;;  %v2315_v47 = vadd.f32 %v2313_v51, %v2295_v32  ;;  %v2463_v44 = vmul.f32 %v2460_v2, %v6990_v15 }
 0x640   :  { %v2404_v12 = vpop.permute.xlu0 %2403  ;;  %v2402_v6 = vpop.permute.xlu1 %2401 }
 0x641   :  { %v2376_v9 = vadd.f32 %v2374_v27, %v2356_v60  ;;  %v2335_v7 = vadd.f32 %v2333_v61, %v2315_v47  ;;  %v2409_v8 = vsel %vm602_vm3, %v2402_v6, %v2404_v12  ;;  %v6992_v27 = vld [vmem:[#allocation28_spill] sm:$0xff]  ;;  %v6993_v12 = vld [vmem:[#allocation39_spill] sm:$0xff]  ;;  %v2470_v32 = vrot.slane %v2463_v44, 2 }
 0x642   :  { %2716 = vrot.lane.b32.xlu0 %v5546_v39, %s3252_s14  ;;  %2714 = vrot.lane.b32.xlu1 %v5543_v50, %s3252_s14  ;;  %v2413_v42 = vmul.f32 %v2409_v8, %v2400_v26  ;;  %v2461_v35 = vmul.f32 %v2460_v2, %v6992_v27  ;;  %v2462_v6 = vmul.f32 %v2460_v2, %v6993_v12 }
 0x643   :  { %v2396_v34 = vadd.f32 %v2394_v56, %v2376_v9  ;;  %v2355_v3 = vadd.f32 %v2353_v16, %v2335_v7  ;;  %v2509_v8 = vrot.slane %v6028_v33, %v4276_v31  ;;  %v2549_v27 = vrot.slane %v6028_v33, %v4302_v20 }
 0x644   :  { %v2408_v22 = vpop.permute.xlu0 %2407  ;;  %v2406_v29 = vpop.permute.xlu1 %2405  ;;  %v2467_v59 = vrot.slane %v2461_v35, 2  ;;  %v2468_v61 = vrot.slane %v2462_v6, 2 }
 0x645   :  { %v2410_v52 = vsel %vm602_vm3, %v2406_v29, %v2408_v22  ;;  %v2375_v19 = vadd.f32 %v2373_v49, %v2355_v3 }
 0x646   :  { %v2414_v40 = vmul.f32 %v2410_v52, %v2400_v26  ;;  %2732 = vrot.lane.b32.xlu0 %v5530_v53, %s3253_s17  ;;  %2730 = vrot.lane.b32.xlu1 %v5527_v41, %s3253_s17  ;;  %v2479_v26 = vrot.slane %v6028_v33, %v4257_v24  ;;  %v2469_v36 = vsel %vm6995_vm1, %v2467_v59, %v2468_v61  ;;  %vm7009_vm1 = vmmov %vm7006_vm14 }
 0x647   :  { %v2395_v17 = vadd.f32 %v2393_v11, %v2375_v19  ;;  %v2471_v16 = vsel %vm6996_vm13, %v2468_v61, %v2470_v32  ;;  %v2569_v59 = vrot.slane %v6028_v33, %v4314_v13  ;;  %vm7010_vm13 = vcmask 1031168  }
 0x648   :  { %v2416_v58 = vadd.f32 %v2414_v40, %v2396_v34  ;;  %v2424_v57 = vpop.permute.xlu0 %2423  ;;  %v2422_v48 = vpop.permute.xlu1 %2421 }
 0x649   :  { %v2429_v38 = vsel %vm623_vm2, %v2422_v48, %v2424_v57  ;;  %v2415_v62 = vadd.f32 %v2413_v42, %v2395_v17 }
 0x64a   :  { %2736 = vrot.lane.b32.xlu0 %v5546_v39, %s3253_s17  ;;  %2734 = vrot.lane.b32.xlu1 %v5543_v50, %s3253_s17  ;;  %v2433_v25 = vmul.f32 %v2429_v38, %v2420_v63 }
 0x64c   :  { %v2428_v18 = vpop.permute.xlu0 %2427  ;;  %v2426_v28 = vpop.permute.xlu1 %2425  ;;  %v2435_v14 = vadd.f32 %v2433_v25, %v2415_v62 }
 0x64d   :  { %v2430_v45 = vsel %vm623_vm2, %v2426_v28, %v2428_v18 }
 0x64e   :  { %v2434_v43 = vmul.f32 %v2430_v45, %v2420_v63  ;;  %2752 = vrot.lane.b32.xlu0 %v5530_v53, %s3254_s18  ;;  %2750 = vrot.lane.b32.xlu1 %v5527_v41, %s3254_s18 }
 0x650   :  { %v2436_v46 = vadd.f32 %v2434_v43, %v2416_v58  ;;  %v2444_v37 = vpop.permute.xlu0 %2443  ;;  %v2442_v4 = vpop.permute.xlu1 %2441 }
 0x651   :  { %v2449_v10 = vsel %vm6991_vm12, %v2442_v4, %v2444_v37 }
 0x652   :  { %v2453_v51 = vmul.f32 %v2449_v10, %v2440_v0  ;;  %2756 = vrot.lane.b32.xlu0 %v5546_v39, %s3254_s18  ;;  %2754 = vrot.lane.b32.xlu1 %v5543_v50, %s3254_s18 }
 0x654   :  { %v2455_v55 = vadd.f32 %v2453_v51, %v2435_v14  ;;  %v2448_v60 = vpop.permute.xlu0 %2447  ;;  %v2446_v56 = vpop.permute.xlu1 %2445 }
 0x655   :  { %v2450_v54 = vsel %vm6994_vm0, %v2446_v56, %v2448_v60  ;;  %vm7008_vm0 = vcmask 252928  }
 0x656   :  { %v2454_v9 = vmul.f32 %v2450_v54, %v2440_v0  ;;  %2772 = vrot.lane.b32.xlu0 %v5530_v53, %s3255_s19  ;;  %2770 = vrot.lane.b32.xlu1 %v5527_v41, %s3255_s19  ;;  %v2474_v34 = vadd.f32 %v2469_v36, %v2455_v55  ;;  %v2529_v0 = vrot.slane %v6028_v33, %v4292_v21 }
 0x658   :  { %v2456_v22 = vadd.f32 %v2454_v9, %v2436_v46  ;;  %v2493_v29 = vpop.permute.xlu0 %2492  ;;  %v2491_v47 = vpop.permute.xlu1 %2490 }
 0x659   :  { %v2498_v52 = vsel %vm246_vm5, %v2491_v47, %v2493_v29  ;;  %v6117_v47 = vld [vmem:[#allocation2 + $0x30] sm:$0xff] }
 0x65a   :  { %v2502_v40 = vmul.f32 %v2498_v52, %v2479_v26  ;;  %2776 = vrot.lane.b32.xlu0 %v5546_v39, %s3255_s19  ;;  %2774 = vrot.lane.b32.xlu1 %v5543_v50, %s3255_s19  ;;  %v2475_v30 = vadd.f32 %v2471_v16, %v2456_v22 }
 0x65c   :  { %v2504_v7 = vadd.f32 %v2502_v40, %v2474_v34  ;;  %v2497_v49 = vpop.permute.xlu0 %2496  ;;  %v2495_v58 = vpop.permute.xlu1 %2494  ;;  %v2589_v40 = vrot.slane %v6117_v47, %v4231_v23 }
 0x65d   :  { %v2499_v57 = vsel %vm246_vm5, %v2495_v58, %v2497_v49  ;;  %vm6997_vm5 = vcmask 908288  }
 0x65e   :  { %v2503_v48 = vmul.f32 %v2499_v57, %v2479_v26  ;;  %2792 = vrot.lane.b32.xlu0 %v5530_v53, %s3256_s20  ;;  %2790 = vrot.lane.b32.xlu1 %v5527_v41, %s3256_s20 }
 0x660   :  { %v2505_v38 = vadd.f32 %v2503_v48, %v2475_v30  ;;  %v2513_v3 = vpop.permute.xlu0 %2512  ;;  %v2511_v11 = vpop.permute.xlu1 %2510 }
 0x661   :  { %v2518_v63 = vsel %vm267_vm6, %v2511_v11, %v2513_v3  ;;  %v2609_v3 = vrot.slane %v6117_v47, %v4233_v5 }
 0x662   :  { %v2522_v19 = vmul.f32 %v2518_v63, %v2509_v8  ;;  %2796 = vrot.lane.b32.xlu0 %v5546_v39, %s3256_s20  ;;  %2794 = vrot.lane.b32.xlu1 %v5543_v50, %s3256_s20 }
 0x664   :  { %v2524_v42 = vadd.f32 %v2522_v19, %v2504_v7  ;;  %v2517_v18 = vpop.permute.xlu0 %2516  ;;  %v2515_v28 = vpop.permute.xlu1 %2514 }
 0x665   :  { %v2519_v2 = vsel %vm267_vm6, %v2515_v28, %v2517_v18  ;;  %vm6998_vm6 = vmmov %vm6997_vm5 }
 0x666   :  { %v2523_v45 = vmul.f32 %v2519_v2, %v2509_v8  ;;  %2812 = vrot.lane.b32.xlu0 %v5530_v53, %s3257_s21  ;;  %2810 = vrot.lane.b32.xlu1 %v5527_v41, %s3257_s21 }
 0x668   :  { %v2525_v17 = vadd.f32 %v2523_v45, %v2505_v38  ;;  %v2533_v25 = vpop.permute.xlu0 %2532  ;;  %v2531_v43 = vpop.permute.xlu1 %2530 }
 0x669   :  { %v2538_v62 = vsel %vm288_vm7, %v2531_v43, %v2533_v25 }
 0x66a   :  { %v2542_v46 = vmul.f32 %v2538_v62, %v2529_v0  ;;  %2816 = vrot.lane.b32.xlu0 %v5546_v39, %s3257_s21  ;;  %2814 = vrot.lane.b32.xlu1 %v5543_v50, %s3257_s21 }
 0x66c   :  { %v2544_v37 = vadd.f32 %v2542_v46, %v2524_v42  ;;  %v2537_v4 = vpop.permute.xlu0 %2536  ;;  %v2535_v15 = vpop.permute.xlu1 %2534 }
 0x66d   :  { %v2539_v44 = vsel %vm288_vm7, %v2535_v15, %v2537_v4  ;;  %vm6999_vm7 = vcmask 777216  }
 0x66e   :  { %v2543_v10 = vmul.f32 %v2539_v44, %v2529_v0  ;;  %2832 = vrot.lane.b32.xlu0 %v5530_v53, %s3258_s22  ;;  %2830 = vrot.lane.b32.xlu1 %v5527_v41, %s3258_s22  ;;  %v2629_v0 = vrot.slane %v6117_v47, %v4248_v1 }
 0x670   :  { %v2545_v35 = vadd.f32 %v2543_v10, %v2525_v17  ;;  %v2553_v12 = vpop.permute.xlu0 %2552  ;;  %v2551_v6 = vpop.permute.xlu1 %2550 }
 0x671   :  { %v2558_v14 = vsel %vm309_vm8, %v2551_v6, %v2553_v12 }
 0x672   :  { %v2562_v51 = vmul.f32 %v2558_v14, %v2549_v27  ;;  %2836 = vrot.lane.b32.xlu0 %v5546_v39, %s3258_s22  ;;  %2834 = vrot.lane.b32.xlu1 %v5543_v50, %s3258_s22 }
 0x674   :  { %v2564_v55 = vadd.f32 %v2562_v51, %v2544_v37  ;;  %v2557_v60 = vpop.permute.xlu0 %2556  ;;  %v2555_v56 = vpop.permute.xlu1 %2554 }
 0x675   :  { %v2559_v32 = vsel %vm309_vm8, %v2555_v56, %v2557_v60  ;;  %vm7000_vm8 = vmmov %vm6999_vm7 }
 0x676   :  { %v2563_v54 = vmul.f32 %v2559_v32, %v2549_v27  ;;  %2852 = vrot.lane.b32.xlu0 %v5530_v53, %s3259_s23  ;;  %2850 = vrot.lane.b32.xlu1 %v5527_v41, %s3259_s23  ;;  %v2649_v27 = vrot.slane %v6117_v47, %v4257_v24 }
 0x678   :  { %v2565_v61 = vadd.f32 %v2563_v54, %v2545_v35  ;;  %v2573_v9 = vpop.permute.xlu0 %2572  ;;  %v2571_v26 = vpop.permute.xlu1 %2570 }
 0x679   :  { %v2578_v22 = vsel %vm330_vm9, %v2571_v26, %v2573_v9 }
 0x67a   :  { %v2582_v29 = vmul.f32 %v2578_v22, %v2569_v59  ;;  %2856 = vrot.lane.b32.xlu0 %v5546_v39, %s3259_s23  ;;  %2854 = vrot.lane.b32.xlu1 %v5543_v50, %s3259_s23 }
 0x67c   :  { %v2584_v36 = vadd.f32 %v2582_v29, %v2564_v55  ;;  %v2577_v52 = vpop.permute.xlu0 %2576  ;;  %v2575_v16 = vpop.permute.xlu1 %2574 }
 0x67d   :  { %v2579_v34 = vsel %vm330_vm9, %v2575_v16, %v2577_v52  ;;  %vm7001_vm9 = vcmask 646144  }
 0x67e   :  { %v2583_v33 = vmul.f32 %v2579_v34, %v2569_v59  ;;  %2872 = vrot.lane.b32.xlu0 %v5530_v53, %s6581_s2  ;;  %2870 = vrot.lane.b32.xlu1 %v5527_v41, %s6581_s2  ;;  %v6146_v59 = vrot.slane %v6117_v47, %v4276_v31 }
 0x680   :  { %v2585_v30 = vadd.f32 %v2583_v33, %v2565_v61  ;;  %v2593_v7 = vpop.permute.xlu0 %2592  ;;  %v2591_v49 = vpop.permute.xlu1 %2590 }
 0x681   :  { %v2598_v58 = vsel %vm351_vm10, %v2591_v49, %v2593_v7 }
 0x682   :  { %v2602_v57 = vmul.f32 %v2598_v58, %v2589_v40  ;;  %2876 = vrot.lane.b32.xlu0 %v5546_v39, %s6581_s2  ;;  %2874 = vrot.lane.b32.xlu1 %v5543_v50, %s6581_s2 }
 0x684   :  { %v2604_v48 = vadd.f32 %v2602_v57, %v2584_v36  ;;  %v2597_v53 = vpop.permute.xlu0 %2596  ;;  %v2595_v8 = vpop.permute.xlu1 %2594 }
 0x685   :  { %v2599_v41 = vsel %vm351_vm10, %v2595_v8, %v2597_v53  ;;  %vm7003_vm10 = vcmask 515072  }
 0x686   :  { %v2603_v38 = vmul.f32 %v2599_v41, %v2589_v40  ;;  %vm7007_vm12 = vmmov %vm7003_vm10 }
 0x688   :  { %v2605_v11 = vadd.f32 %v2603_v38, %v2585_v30  ;;  %v2613_v63 = vpop.permute.xlu0 %2612  ;;  %v2611_v19 = vpop.permute.xlu1 %2610 }
 0x689   :  { %v2618_v42 = vsel %vm372_vm11, %v2611_v19, %v2613_v63 }
 0x68a   :  { %v2622_v18 = vmul.f32 %v2618_v42, %v2609_v3 }
 0x68c   :  { %v2624_v28 = vadd.f32 %v2622_v18, %v2604_v48  ;;  %v2617_v39 = vpop.permute.xlu0 %2616  ;;  %v2615_v2 = vpop.permute.xlu1 %2614 }
 0x68d   :  { %v2619_v50 = vsel %vm372_vm11, %v2615_v2, %v2617_v39  ;;  %vm7004_vm11 = vmmov %vm7001_vm9 }
 0x68e   :  { %v2623_v45 = vmul.f32 %v2619_v50, %v2609_v3 }
 0x690   :  { %v2625_v17 = vadd.f32 %v2623_v45, %v2605_v11  ;;  %v2633_v25 = vpop.permute.xlu0 %2632  ;;  %v2631_v43 = vpop.permute.xlu1 %2630 }
 0x691   :  { %v2638_v62 = vsel %vm6997_vm5, %v2631_v43, %v2633_v25  ;;  %v2689_v25 = vrot.slane %v6117_v47, %v4292_v21  ;;  %v3188_v43 = vld [vmem:[%s6401_s0] sm:$0xff]  ;;  %vm7011_vm5 = vmmov %vm7008_vm0 }
 0x692   :  { %v2642_v46 = vmul.f32 %v2638_v62, %v2629_v0  ;;  %v7002_v62 = vld [vmem:[#allocation143_spill] sm:$0xff] }
 0x694   :  { %v2644_v37 = vadd.f32 %v2642_v46, %v2624_v28  ;;  %v2637_v4 = vpop.permute.xlu0 %2636  ;;  %v2635_v15 = vpop.permute.xlu1 %2634  ;;  %v178_v46 = vsub.f32 %v3188_v43, %v7002_v62 }
 0x695   :  { %v2639_v44 = vsel %vm6998_vm6, %v2635_v15, %v2637_v4  ;;  %v3190_v15 = vld [vmem:[%s6401_s0 + $0x10] sm:$0xff]  ;;  %vm7012_vm6 = vcmask 900096  }
 0x696   :  { %v2643_v10 = vmul.f32 %v2639_v44, %v2629_v0  ;;  %v180_v44 = vsub.f32 %v3190_v15, %v7002_v62 }
 0x698   :  { %v2645_v35 = vadd.f32 %v2643_v10, %v2625_v17  ;;  %v2653_v12 = vpop.permute.xlu0 %2652  ;;  %v2651_v6 = vpop.permute.xlu1 %2650 }
 0x699   :  { %v2658_v14 = vsel %vm6999_vm7, %v2651_v6, %v2653_v12  ;;  %v3191_v12 = vld [vmem:[%s6401_s0 + $0x18] sm:$0xff]  ;;  %vm7013_vm7 = vmmov %vm7010_vm13 }
 0x69a   :  { %v2662_v51 = vmul.f32 %v2658_v14, %v2649_v27  ;;  %v181_v6 = vsub.f32 %v3191_v12, %v7002_v62  ;;  %v3192_v14 = vld [vmem:[%s6401_s0 + $0x20] sm:$0x3] }
 0x69c   :  { %v2664_v55 = vadd.f32 %v2662_v51, %v2644_v37  ;;  %v2657_v60 = vpop.permute.xlu0 %2656  ;;  %v2655_v56 = vpop.permute.xlu1 %2654  ;;  %v3189_v37 = vld [vmem:[%s6401_s0 + $0x8] sm:$0xff]  ;;  %v182_v51 = vsub.f32 %v3192_v14, %v7002_v62 }
 0x69d   :  { %v2659_v32 = vsel %vm7000_vm8, %v2655_v56, %v2657_v60  ;;  %v179_v4 = vsub.f32 %v3189_v37, %v7002_v62  ;;  %v2709_v60 = vrot.slane %v6117_v47, %v4302_v20  ;;  %v3193_v56 = vld [vmem:[%s6401_s0 + $0x28] sm:$0x3]  ;;  %vm7014_vm8 = vmmov %vm7012_vm6 }
 0x69e   :  { %v2663_v54 = vmul.f32 %v2659_v32, %v2649_v27  ;;  %v183_v32 = vsub.f32 %v3193_v56, %v7002_v62 }
 0x6a0   :  { %v6148_v61 = vadd.f32 %v2663_v54, %v2645_v35  ;;  %v2673_v9 = vpop.permute.xlu0 %2672  ;;  %v2671_v26 = vpop.permute.xlu1 %2670  ;;  %v7005_v54 = vld [vmem:[#allocation35_spill] sm:$0xff] }
 0x6a1   :  { %v2678_v22 = vsel %vm7001_vm9, %v2671_v26, %v2673_v9  ;;  %v6207_v9 = vmul.f32 %v7005_v54, %v178_v46  ;;  %v6210_v26 = vmul.f32 %v7005_v54, %v179_v4  ;;  %v6222_v43 = vmul.f32 %v7005_v54, %v181_v6 }
 0x6a2   :  { %v2682_v29 = vmul.f32 %v2678_v22, %v6146_v59  ;;  %v6225_v46 = vmul.f32 %v7005_v54, %v182_v51  ;;  %v6230_v15 = vmul.f32 %v7005_v54, %v183_v32 }
 0x6a4   :  { %v6152_v36 = vadd.f32 %v2682_v29, %v2664_v55  ;;  %v2677_v52 = vpop.permute.xlu0 %2676  ;;  %v2675_v16 = vpop.permute.xlu1 %2674  ;;  %v6213_v29 = vld [vmem:[#allocation2 + $0x38] sm:$0x7f] }
 0x6a5   :  { %v2679_v55 = vsel %vm7004_vm11, %v2675_v16, %v2677_v52  ;;  %v6216_v52 = vmul.f32 %v7005_v54, %v180_v44  ;;  %v2769_v6 = vrot.slane %v6213_v29, %v4233_v5  ;;  %v2809_v56 = vrot.slane %v6213_v29, %v4257_v24 }
 0x6a6   :  { %v2683_v37 = vmul.f32 %v2679_v55, %v6146_v59  ;;  %v3052_v59 = vcvt.f32.s32 %v6210_v26 }
 0x6a8   :  { %v2693_v34 = vpop.permute.xlu0 %2692  ;;  %v2691_v33 = vpop.permute.xlu1 %2690 }
 0x6a9   :  { %v2698_v10 = vsel %vm7003_vm10, %v2691_v33, %v2693_v34  ;;  %v2729_v33 = vrot.slane %v6117_v47, %v4314_v13  ;;  %v2749_v13 = vrot.slane %v6213_v29, %v4231_v23 }
 0x6aa   :  { %v2702_v16 = vmul.f32 %v2698_v10, %v2689_v25  ;;  %v3050_v10 = vand.u32 2147483647, %v6210_v26 }
 0x6ac   :  { %v2697_v40 = vpop.permute.xlu0 %2696  ;;  %v2695_v30 = vpop.permute.xlu1 %2694 }
 0x6ad   :  { %v2699_v34 = vsel %vm7007_vm12, %v2695_v30, %v2697_v40 }
 0x6ae   :  { %v2703_v47 = vmul.f32 %v2699_v34, %v2689_v25 }
 0x6b0   :  { %v2713_v7 = vpop.permute.xlu0 %2712  ;;  %v2711_v49 = vpop.permute.xlu1 %2710 }
 0x6b1   :  { %v2718_v22 = vsel %vm7006_vm14, %v2711_v49, %v2713_v7 }
 0x6b2   :  { %v2722_v44 = vmul.f32 %v2718_v22, %v2709_v60 }
 0x6b4   :  { %v2717_v58 = vpop.permute.xlu0 %2716  ;;  %v2715_v57 = vpop.permute.xlu1 %2714 }
 0x6b5   :  { %v2719_v40 = vsel %vm7009_vm1, %v2715_v57, %v2717_v58  ;;  %v2685_v58 = vadd.f32 %v2683_v37, %v6148_v61 }
 0x6b6   :  { %v2723_v57 = vmul.f32 %v2719_v40, %v2709_v60 }
 0x6b8   :  { %v2733_v48 = vpop.permute.xlu0 %2732  ;;  %v2731_v53 = vpop.permute.xlu1 %2730 }
 0x6b9   :  { %v2738_v7 = vsel %vm7008_vm0, %v2731_v53, %v2733_v48  ;;  %v2704_v48 = vadd.f32 %v2702_v16, %v6152_v36 }
 0x6ba   :  { %v2742_v53 = vmul.f32 %v2738_v7, %v2729_v33  ;;  %v2849_v7 = vrot.slane %v6213_v29, %v4292_v21  ;;  %v3076_v21 = vcvt.f32.s32 %v6225_v46 }
 0x6bc   :  { %v2737_v8 = vpop.permute.xlu0 %2736  ;;  %v2735_v41 = vpop.permute.xlu1 %2734 }
 0x6bd   :  { %v2739_v12 = vsel %vm7011_vm5, %v2735_v41, %v2737_v8  ;;  %v2789_v8 = vrot.slane %v6213_v29, %v4248_v1  ;;  %v2705_v41 = vadd.f32 %v2703_v47, %v2685_v58 }
 0x6be   :  { %v2743_v5 = vmul.f32 %v2739_v12, %v2729_v33  ;;  %v3053_v33 = vcvt.s32.f32 %v3052_v59 }
 0x6c0   :  { %v2753_v38 = vpop.permute.xlu0 %2752  ;;  %v2751_v3 = vpop.permute.xlu1 %2750 }
 0x6c1   :  { %v2758_v30 = vsel %vm7010_vm13, %v2751_v3, %v2753_v38  ;;  %v3055_v38 = vand.u32 2147483648, %v6210_v26  ;;  %v2724_v3 = vadd.f32 %v2722_v44, %v2704_v48 }
 0x6c2   :  { %v2762_v51 = vmul.f32 %v2758_v30, %v2749_v13 }
 0x6c4   :  { %v6154_v11 = vpop.permute.xlu0 %2756  ;;  %v6156_v63 = vpop.permute.xlu1 %2754 }
 0x6c5   :  { %v2759_v36 = vsel %vm7013_vm7, %v6156_v63, %v6154_v11  ;;  %v2725_v11 = vadd.f32 %v2723_v57, %v2705_v41 }
 0x6c6   :  { %v2763_v63 = vmul.f32 %v2759_v36, %v2749_v13  ;;  %v3060_v13 = vcvt.f32.s32 %v6216_v52 }
 0x6c7   :  { %v2745_v24 = vadd.f32 %v2743_v5, %v2725_v11 }
 0x6c8   :  { %v2773_v19 = vpop.permute.xlu0 %2772  ;;  %v2771_v42 = vpop.permute.xlu1 %2770 }
 0x6c9   :  { %v2778_v23 = vsel %vm7012_vm6, %v2771_v42, %v2773_v19  ;;  %v3066_v19 = vand.u32 2147483647, %v6222_v43  ;;  %v2744_v42 = vadd.f32 %v2742_v53, %v2724_v3  ;;  %v2765_v44 = vadd.f32 %v2763_v63, %v2745_v24 }
 0x6ca   :  { %v2782_v55 = vmul.f32 %v2778_v23, %v2769_v6 }
 0x6cc   :  { %v6158_v18 = vpop.permute.xlu0 %2776  ;;  %v6160_v28 = vpop.permute.xlu1 %2774 }
 0x6cd   :  { %v2779_v60 = vsel %vm7014_vm8, %v6160_v28, %v6158_v18  ;;  %v2829_v18 = vrot.slane %v6213_v29, %v4276_v31 }
 0x6ce   :  { %v2783_v28 = vmul.f32 %v2779_v60, %v2769_v6  ;;  %v3044_v6 = vcvt.f32.s32 %v6207_v9 }
 0x6d0   :  { %v6162_v39 = vpop.permute.xlu0 %2792  ;;  %v2791_v2 = vpop.permute.xlu1 %2790  ;;  %v2785_v59 = vadd.f32 %v2783_v28, %v2765_v44  ;;  %v3045_v60 = vcvt.s32.f32 %v3044_v6  ;;  %v3042_v44 = vand.u32 2147483647, %v6207_v9 }
 0x6d1   :  { %v2798_v61 = vsel %vm560_vm4, %v2791_v2, %v6162_v39  ;;  %v3068_v39 = vcvt.f32.s32 %v6222_v43  ;;  %v2764_v2 = vadd.f32 %v2762_v51, %v2744_v42  ;;  %v3054_v51 = vand.u32 2147483647, %v3053_v33 }
 0x6d2   :  { %v2802_v22 = vmul.f32 %v2798_v61, %v2789_v8  ;;  %v3077_v61 = vcvt.s32.f32 %v3076_v21  ;;  %v3046_v33 = vand.u32 2147483647, %v3045_v60  ;;  %vm6341_vm5 = vcmp.lt.f32.partialorder %v3042_v44, 8388608.0 }
 0x6d3   :  { %v2784_v37 = vadd.f32 %v2782_v55, %v2764_v2  ;;  %v3069_v30 = vcvt.s32.f32 %v3068_v39  ;;  %v3071_v55 = vand.u32 2147483648, %v6222_v43 }
 0x6d4   :  { %v6164_v50 = vpop.permute.xlu0 %2796  ;;  %v6166_v45 = vpop.permute.xlu1 %2794 }
 0x6d5   :  { %v2799_v16 = vsel %vm560_vm4, %v6166_v45, %v6164_v50  ;;  %v2804_v47 = vadd.f32 %v2802_v22, %v2784_v37  ;;  %vm6295_vm4 = vcmp.lt.f32.partialorder %v3066_v19, 8388608.0  ;;  %v3074_v19 = vand.u32 2147483647, %v6225_v46 }
 0x6d6   :  { %v2803_v40 = vmul.f32 %v2799_v16, %v2789_v8  ;;  %v3070_v8 = vand.u32 2147483647, %v3069_v30 }
 0x6d7   :  { %vm6337_vm13 = vcmp.lt.f32.partialorder %v3074_v19, 8388608.0 }
 0x6d8   :  { %v6168_v0 = vpop.permute.xlu0 %2812  ;;  %v6170_v17 = vpop.permute.xlu1 %2810  ;;  %v2805_v58 = vadd.f32 %v2803_v40, %v2785_v59  ;;  %v3072_v16 = vor.u32 %v3071_v55, %v3070_v8  ;;  %v7023_v40 = vld [vmem:[#allocation8_spill] sm:$0xff]  ;;  %v7036_v55 = vld [vmem:[#allocation30_spill] sm:$0xff] }
 0x6d9   :  { %v2818_v1 = vsel %vm581_vm15, %v6170_v17, %v6168_v0  ;;  %vm7024_vm10 = vcmp.lt.s32.totalorder %v7023_v40, 64  ;;  %vm7028_vm0 = vcmp.ge.s32.totalorder %v7023_v40, 64 }
 0x6da   :  { %v2822_v0 = vmul.f32 %v2818_v1, %v2809_v56  ;;  %vm7025_vm11 = vmmov %vm7024_vm10 }
 0x6db   :  { %vm7026_vm14 = vmmov %vm7024_vm10 }
 0x6dc   :  { %v6187_v27 = vpop.permute.xlu0 %2816  ;;  %v6189_v35 = vpop.permute.xlu1 %2814  ;;  %vm7027_vm12 = vmmov %vm7024_vm10 }
 0x6dd   :  { %v2819_v17 = vsel %vm581_vm15, %v6189_v35, %v6187_v27  ;;  %v2869_v27 = vrot.slane %v6213_v29, %v4302_v20  ;;  %v2824_v35 = vadd.f32 %v2822_v0, %v2804_v47  ;;  %v3061_v20 = vcvt.s32.f32 %v3060_v13  ;;  %vm7029_vm1 = vmmov %vm7028_vm0 }
 0x6de   :  { %v2823_v48 = vmul.f32 %v2819_v17, %v2809_v56  ;;  %v3084_v56 = vcvt.f32.s32 %v6230_v15  ;;  %v3047_v13 = vand.u32 2147483648, %v6207_v9  ;;  %vm7034_vm6 = vmmov %vm7028_vm0 }
 0x6df   :  { %vm7035_vm7 = vmmov %vm7028_vm0 }
 0x6e0   :  { %v2833_v49 = vpop.permute.xlu0 %2832  ;;  %v2831_v4 = vpop.permute.xlu1 %2830  ;;  %v2825_v29 = vadd.f32 %v2823_v48, %v2805_v58  ;;  %v3085_v37 = vcvt.s32.f32 %v3084_v56  ;;  %v3048_v48 = vor.u32 %v3047_v13, %v3046_v33  ;;  %v3082_v58 = vand.u32 2147483647, %v6230_v15 }
 0x6e1   :  { %v2838_v34 = vsel %vm602_vm3, %v2831_v4, %v2833_v49 }
 0x6e2   :  { %v2842_v49 = vmul.f32 %v2838_v34, %v2829_v18  ;;  %v3078_v34 = vand.u32 2147483647, %v3077_v61  ;;  %v3049_v8 = vsel %vm6341_vm5, %v3048_v48, %v6207_v9  ;;  %vm3083_vm8 = vcmp.lt.f32.partialorder %v3082_v58, 8388608.0 }
 0x6e4   :  { %v2837_v25 = vpop.permute.xlu0 %2836  ;;  %v2835_v14 = vpop.permute.xlu1 %2834 }
 0x6e5   :  { %v2839_v4 = vsel %vm602_vm3, %v2835_v14, %v2837_v25  ;;  %v3058_v25 = vand.u32 2147483647, %v6216_v52  ;;  %v2844_v14 = vadd.f32 %v2842_v49, %v2824_v35  ;;  %vm7015_vm3 = vcmask 244736  }
 0x6e6   :  { %v2843_v57 = vmul.f32 %v2839_v4, %v2829_v18  ;;  %vm7020_vm15 = vmmov %vm7015_vm3  ;;  %v3062_v18 = vand.u32 2147483647, %v3061_v20 }
 0x6e7   :  { %vm6302_vm9 = vcmp.lt.f32.partialorder %v3058_v25, 8388608.0 }
 0x6e8   :  { %v2853_v32 = vpop.permute.xlu0 %2852  ;;  %v2851_v54 = vpop.permute.xlu1 %2850  ;;  %v2845_v11 = vadd.f32 %v2843_v57, %v2825_v29  ;;  %v3087_v57 = vand.u32 2147483648, %v6230_v15 }
 0x6e9   :  { %v2858_v50 = vsel %vm623_vm2, %v2851_v54, %v2853_v32  ;;  %v3056_v54 = vor.u32 %v3055_v38, %v3054_v51  ;;  %v3063_v38 = vand.u32 2147483648, %v6216_v52 }
 0x6ea   :  { %v2862_v53 = vmul.f32 %v2858_v50, %v2849_v7 }
 0x6ec   :  { %v2857_v45 = vpop.permute.xlu0 %2856  ;;  %v2855_v31 = vpop.permute.xlu1 %2854  ;;  %v2864_v42 = vadd.f32 %v2862_v53, %v2844_v14 }
 0x6ed   :  { %v2859_v12 = vsel %vm623_vm2, %v2855_v31, %v2857_v45  ;;  %vm6287_vm2 = vcmp.lt.f32.partialorder %v3050_v10, 8388608.0  ;;  %v3073_v45 = vsel %vm6295_vm4, %v3072_v16, %v6222_v43  ;;  %v3064_v31 = vor.u32 %v3063_v38, %v3062_v18 }
 0x6ee   :  { %v2863_v41 = vmul.f32 %v2859_v12, %v2849_v7  ;;  %v3057_v17 = vsel %vm6287_vm2, %v3056_v54, %v6210_v26  ;;  %v3079_v7 = vand.u32 2147483648, %v6225_v46  ;;  %v3086_v43 = vand.u32 2147483647, %v3085_v37 }
 0x6ef   :  { %v201_v35 = vmax.f32 %v3057_v17, 0.0  ;;  %v203_v12 = vmax.f32 %v3073_v45, 0.0  ;;  %v3065_v51 = vsel %vm6302_vm9, %v3064_v31, %v6216_v52 }
 0x6f0   :  { %v2873_v23 = vpop.permute.xlu0 %2872  ;;  %v2871_v3 = vpop.permute.xlu1 %2870  ;;  %v2865_v24 = vadd.f32 %v2863_v41, %v2845_v11  ;;  %v3080_v4 = vor.u32 %v3079_v7, %v3078_v34  ;;  %v3088_v20 = vor.u32 %v3087_v57, %v3086_v43 }
 0x6f1   :  { %v2878_v36 = vsel %vm7015_vm3, %v2871_v3, %v2873_v23  ;;  %v207_v29 = vmin.f32 %v201_v35, 255.0  ;;  %v209_v41 = vmin.f32 %v203_v12, 255.0  ;;  %vm7037_vm3 = vcmask 1046528  }
 0x6f2   :  { %v2882_v5 = vmul.f32 %v2878_v36, %v2869_v27  ;;  %v3081_v25 = vsel %vm6337_vm13, %v3080_v4, %v6225_v46  ;;  %v3089_v52 = vsel %vm3083_vm8, %v3088_v20, %v6230_v15  ;;  %vm7038_vm2 = vmmov %vm7037_vm3 }
 0x6f3   :  { %v204_v61 = vmax.f32 %v3081_v25, 0.0  ;;  %v217_v60 = vmul.f32 %v7036_v55, %v207_v29  ;;  %v219_v46 = vmul.f32 %v7036_v55, %v209_v41  ;;  %vm7039_vm4 = vmmov %vm7038_vm2 }
 0x6f4   :  { %v2877_v63 = vpop.permute.xlu0 %2876  ;;  %v2875_v1 = vpop.permute.xlu1 %2874  ;;  %v6299_v2 = vadd.f32 %v2882_v5, %v2864_v42  ;;  %v202_v5 = vmax.f32 %v3065_v51, 0.0  ;;  %v200_v42 = vmax.f32 %v3049_v8, 0.0 }
 0x6f5   :  { %v2879_v22 = vsel %vm7020_vm15, %v2875_v1, %v2877_v63  ;;  %v210_v11 = vmin.f32 %v204_v61, 255.0  ;;  %v205_v1 = vmax.f32 %v3089_v52, 0.0  ;;  %v223_v9 = vadd.f32 %v217_v60, %v7002_v62  ;;  %vm7040_vm15 = vmmov %vm7038_vm2 }
 0x6f6   :  { %v2883_v10 = vmul.f32 %v2879_v22, %v2869_v27  ;;  %v2898_v50 = vsel %vm7024_vm10, %v6299_v2, -3e+38  ;;  %v2886_v26 = vsel %vm7026_vm14, %v6299_v2, 3e+38  ;;  %v2924_v23 = vsel %vm7034_vm6, %v6299_v2, 3e+38 }
 0x6f7   :  { %v2936_v3 = vsel %vm7035_vm7, %v6299_v2, -3e+38  ;;  %v208_v56 = vmin.f32 %v202_v5, 255.0  ;;  %v206_v63 = vmin.f32 %v200_v42, 255.0  ;;  %v225_v32 = vadd.f32 %v219_v46, %v7002_v62  ;;  %v7041_v42 = vld [vmem:[#allocation70_spill] sm:$0xff] }
 0x6f8   :  { %v6308_v0 = vadd.f32 %v2883_v10, %v2865_v24  ;;  %v220_v39 = vmul.f32 %v7036_v55, %v210_v11  ;;  %v211_v16 = vmin.f32 %v205_v1, 255.0  ;;  %v2988_v15 = vrot.slane %v223_v9, 1 }
 0x6f9   :  { %v218_v54 = vmul.f32 %v7036_v55, %v208_v56  ;;  %v216_v22 = vmul.f32 %v7036_v55, %v206_v63  ;;  %v2989_v18 = vrot.slane %v225_v32, 1 }
 0x6fa   :  { %v2899_v47 = vsel %vm7025_vm11, %v6308_v0, -3e+38  ;;  %v2887_v49 = vsel %vm7027_vm12, %v6308_v0, 3e+38  ;;  %v2925_v27 = vsel %vm7028_vm0, %v6308_v0, 3e+38  ;;  %v226_v10 = vadd.f32 %v220_v39, %v7002_v62 }
 0x6fb   :  { %v2900_v30 = vmax.f32 %v2898_v50, %v2899_v47  ;;  %v2888_v59 = vmin.f32 %v2886_v26, %v2887_v49  ;;  %v2937_v21 = vsel %vm7029_vm1, %v6308_v0, -3e+38  ;;  %v2926_v14 = vmin.f32 %v2924_v23, %v2925_v27 }
 0x6fc   :  { %v2938_v36 = vmax.f32 %v2936_v3, %v2937_v21  ;;  %v224_v24 = vadd.f32 %v218_v54, %v7002_v62  ;;  %v222_v28 = vadd.f32 %v216_v22, %v7002_v62  ;;  %v221_v34 = vmul.f32 %v7036_v55, %v211_v16  ;;  %v7042_v55 = vld [vmem:[#allocation71_spill] sm:$0xff] }
 0x6fd   :  { %2901 = vmax.xlane.f32.xlu0 %v2900_v30  ;;  %2889 = vmin.xlane.f32.xlu1 %v2888_v59  ;;  %v2990_v38 = vsel %vm7037_vm3, %v2988_v15, %v2989_v18  ;;  %v2991_v33 = vrot.slane %v226_v10, 1  ;;  %vm7043_vm11 = vcmask 646144  }
 0x6fe   :  { %v2986_v19 = vrot.slane %v224_v24, 1  ;;  %v2985_v37 = vrot.slane %v222_v28, 1  ;;  %v227_v17 = vadd.f32 %v221_v34, %v7002_v62  ;;  %vm7044_vm14 = vmmov %vm7043_vm11 }
 0x700   :  { %v2992_v7 = vsel %vm7038_vm2, %v2986_v19, %v2991_v33  ;;  %v2987_v44 = vsel %vm7039_vm4, %v2985_v37, %v2986_v19  ;;  %v2993_v40 = vrot.slane %v227_v17, 1 }
 0x701   :  { %2927 = vmin.xlane.f32.xlu0 %v2926_v14  ;;  %2939 = vmax.xlane.f32.xlu1 %v2938_v36 }
 0x702   :  { %v2994_v50 = vsel %vm7040_vm15, %v2989_v18, %v2993_v40 }
 0x712   :  { %2997 = vrot.lane.b32.xlu1 %v2990_v38, %s3242_s4 }
 0x716   :  { %2999 = vrot.lane.b32.xlu1 %v2992_v7, %s3242_s4 }
 0x717   :  { %2995 = vrot.lane.b32.xlu0 %v2987_v44, %s3242_s4 }
 0x71b   :  { %3001 = vrot.lane.b32.xlu0 %v2994_v50, %s3242_s4 }
 0x786   :  { %v2902_v45 = vpop.xlane.xlu0 %2901  ;;  %v2890_v31 = vpop.xlane.xlu1 %2889 }
 0x787   :  { %v2903_v13 = vrot.slane %v2902_v45, 4  ;;  %v2891_v47 = vrot.slane %v2890_v31, 4 }
 0x789   :  { %v2904_v26 = vmax.f32 %v2902_v45, %v2903_v13  ;;  %v2892_v49 = vmin.f32 %v2890_v31, %v2891_v47 }
 0x78a   :  { %v2928_v35 = vpop.xlane.xlu0 %2927  ;;  %v2940_v53 = vpop.xlane.xlu1 %2939 }
 0x78b   :  { %v2905_v62 = vrot.slane %v2904_v26, 2  ;;  %v2893_v4 = vrot.slane %v2892_v49, 2  ;;  %v2929_v12 = vrot.slane %v2928_v35, 4  ;;  %v2941_v6 = vrot.slane %v2940_v53, 4 }
 0x78d   :  { %v2894_v30 = vmin.f32 %v2892_v49, %v2893_v4  ;;  %v2906_v59 = vmax.f32 %v2904_v26, %v2905_v62  ;;  %v2930_v58 = vmin.f32 %v2928_v35, %v2929_v12  ;;  %v2942_v57 = vmax.f32 %v2940_v53, %v2941_v6 }
 0x78e   :  { %v2996_v31 = vpop.permute.xlu0 %2995  ;;  %v2998_v13 = vpop.permute.xlu1 %2997 }
 0x78f   :  { %v2895_v48 = vrot.slane %v2894_v30, 1  ;;  %v2907_v43 = vrot.slane %v2906_v59, 1  ;;  %v2931_v3 = vrot.slane %v2930_v58, 2  ;;  %v2943_v51 = vrot.slane %v2942_v57, 2 }
 0x791   :  { %v2896_v27 = vmin.f32 %v2894_v30, %v2895_v48  ;;  %v2908_v21 = vmax.f32 %v2906_v59, %v2907_v43  ;;  %v2932_v25 = vmin.f32 %v2930_v58, %v2931_v3  ;;  %v2944_v14 = vmax.f32 %v2942_v57, %v2943_v51 }
 0x792   :  { %v3002_v30 = vpop.permute.xlu0 %3001  ;;  %v3000_v59 = vpop.permute.xlu1 %2999 }
 0x793   :  { %3118 = vpush %v2896_v27  ;;  %v2933_v36 = vrot.slane %v2932_v25, 1  ;;  %v2945_v8 = vrot.slane %v2944_v14, 1  ;;  %v3003_v27 = vsel %vm7043_vm11, %v2996_v31, %v2998_v13  ;;  %v3004_v35 = vsel %vm7044_vm14, %v3000_v59, %v3002_v30 }
 0x794   :  { %3120 = vpush %v2908_v21 }
 0x795   :  { %v2934_v29 = vmin.f32 %v2932_v25, %v2933_v36  ;;  %v2946_v41 = vmax.f32 %v2944_v14, %v2945_v8 }
 0x7c4   :  { %s3119_s0 = spop %3118 }
 0x7c5   :  { %s3121_s4 = spop %3120  ;;  %v2918_v5 = vstv %s3119_s0 }
 0x7c6   :  { %s2910_s18 = ssub.f32 %s3121_s4, %s3119_s0  ;;  %v2919_v52 = vmul.f32 %v7041_v42, %v2918_v5 }
 0x7c8   :  { %s2913_s19 = smul.f32 0.003921569, %s2910_s18 }
 0x7ca   :  { %s2914_s20 = smax.f32 %s3261_s29, %s2913_s19 }
 0x7cb   :  { %v2915_v23 = vstv %s2914_s20 }
 0x7cc   :  { %3181 = vrcp.f32 %v2915_v23  ;;  %v2923_v11 = vmul.f32 %v7041_v42, %v2915_v23 }
 0x7d9   :  { %v3182_v20 = vpop.eup %3181 }
 0x7da   :  { %3122 = vpush %v3182_v20 }
 0x7db   :  { %3124 = vpush %v2934_v29 }
 0x7dc   :  { %3126 = vpush %v2946_v41 }
 0x80b   :  { %s3123_s21 = spop %3122 }
 0x80c   :  { %s3125_s22 = spop %3124  ;;  %v2920_v32 = vstv %s3123_s21 }
 0x80d   :  { %v2956_v61 = vstv %s3125_s22  ;;  %s3127_s23 = spop %3126  ;;  %v2921_v39 = vmul.f32 %v7041_v42, %v2920_v32 }
 0x80e   :  { %v2957_v60 = vmul.f32 %v7042_v55, %v2956_v61  ;;  %s2948_s15 = ssub.f32 %s3127_s23, %s3125_s22 }
 0x810   :  { %v2958_v46 = vadd.f32 %v2957_v60, %v2919_v52  ;;  %s2951_s2 = smul.f32 0.003921569, %s2948_s15 }
 0x812   :  { %s2952_s24 = smax.f32 %s3261_s29, %s2951_s2  ;;  %v2965_v15 = vsub.f32 %v6299_v2, %v2958_v46  ;;  %v2966_v18 = vsub.f32 %v6308_v0, %v2958_v46  ;;  %s3264_s29 = smov [#allocation5]  }
 0x813   :  { %v2953_v56 = vstv %s2952_s24  ;;  %s3016_s30 = sshll.u32 %s3264_s29, 4  ;;  %s3017_s30 = int_to_ptr.vmem [resolvable:$true] %s3016_s30 }
 0x814   :  { %3183 = vrcp.f32 %v2953_v56  ;;  %v2963_v63 = vmul.f32 %v7042_v55, %v2953_v56  ;;  %s3214_s27 = scalar_lea.vmem %s3017_s30, 256  ;;  %p3219_p6 = scmp.lt.s32.totalorder %s3017_s30, %s3017_s30 }
 0x815   :  { %p3215_p5 = scmp.ne.s32.totalorder %s3017_s30, %s3214_s27  ;;  %p3220_p7 = scmp.lt.s32.totalorder %s3214_s27, %s3214_s27 }
 0x816   :  { %v2964_v1 = vadd.f32 %v2963_v63, %v2923_v11 }
 0x817   :  { %p3221_p8 = por %p3220_p7, %p3219_p6 }
 0x819   :  { %p3222_p9 = pnand %p3221_p8, %p3215_p5 }
 0x821   :  { %v3184_v9 = vpop.eup %3183 }
 0x822   :  { %3128 = vpush %v3184_v9 }
 0x853   :  { %s3129_s1 = spop %3128 }
 0x854   :  { %v2959_v54 = vstv %s3129_s1 }
 0x855   :  { %v2960_v22 = vmul.f32 %v7042_v55, %v2959_v54 }
 0x857   :  { %v2961_v16 = vadd.f32 %v2960_v22, %v2921_v39 }
 0x859   :  { %v2967_v24 = vmul.f32 %v2965_v15, %v2961_v16  ;;  %v2968_v10 = vmul.f32 %v2966_v18, %v2961_v16 }
 0x85b   :  { %v3132_v28 = vcvt.f32.s32 %v2967_v24  ;;  %v3140_v34 = vcvt.f32.s32 %v2968_v10  ;;  %v3130_v19 = vand.u32 2147483647, %v2967_v24  ;;  %v3135_v17 = vand.u32 2147483648, %v2967_v24 }
 0x85c   :  { %v3138_v7 = vand.u32 2147483647, %v2968_v10  ;;  %v3143_v40 = vand.u32 2147483648, %v2968_v10 }
 0x85d   :  { %v3133_v38 = vcvt.s32.f32 %v3132_v28  ;;  %v3141_v33 = vcvt.s32.f32 %v3140_v34  ;;  %vm3131_vm9 = vcmp.lt.f32.partialorder %v3130_v19, 8388608.0 }
 0x85e   :  { %vm3139_vm10 = vcmp.lt.f32.partialorder %v3138_v7, 8388608.0 }
 0x85f   :  { %v3134_v37 = vand.u32 2147483647, %v3133_v38  ;;  %v3142_v44 = vand.u32 2147483647, %v3141_v33 }
 0x861   :  { %v3136_v50 = vor.u32 %v3135_v17, %v3134_v37  ;;  %v3144_v45 = vor.u32 %v3143_v40, %v3142_v44 }
 0x863   :  { %v3137_v2 = vsel %vm3131_vm9, %v3136_v50, %v2967_v24  ;;  %v3145_v0 = vsel %vm3139_vm10, %v3144_v45, %v2968_v10 }
 0x864   :  { %v2971_v47 = vmax.f32 %v3137_v2, 0.0  ;;  %v2972_v26 = vmax.f32 %v3145_v0, 0.0 }
 0x866   :  { %v2973_v49 = vmin.f32 %v2971_v47, 255.0  ;;  %v2974_v62 = vmin.f32 %v2972_v26, 255.0 }
 0x868   :  { %v2975_v4 = vmul.f32 %v2973_v49, %v2964_v1  ;;  %v2976_v48 = vmul.f32 %v2974_v62, %v2964_v1 }
 0x86a   :  { %v2977_v43 = vadd.f32 %v2975_v4, %v2958_v46  ;;  %v2978_v21 = vadd.f32 %v2976_v48, %v2958_v46 }
 0x86c   :  { %v3007_v53 = vadd.f32 %v3003_v27, %v2977_v43  ;;  %v3008_v12 = vadd.f32 %v3004_v35, %v2978_v21 }
 0x86e   :  { %3009 = vst [vmem:[#allocation5] sm:$0xff] %v3007_v53  ;;  %3010 = vst [vmem:[#allocation5 + $0x8] sm:$0xff] %v3008_v12 }
 0x86f   :  { %3225 = shalt.err (!%p3222_p9)
}
 0x870   :  { %s7045_s28 = smov 8   ;;  %s7046_s16 = smov 128  }
 0x871   :  { %3022 = dma.vmem_to_hbm [thread:$0]  %s3017_s30, 256, %s6404_s3, [#allocation4], %s7046_s16, %s7046_s16, %s7045_s28  }
 0x872   :  { %3236 = dma.done.wait [#allocation4], 256  }
 0x873   :  { %3237 = vsyncadd [#allocation4], 4294967040 }
 0x874   :  { %3026 = vsyncpa [#allocation3], 1 }
 0x875   :  { %3027 = vsyncpa [#allocation4], 1 }

</bundles_post_ra>
